<compile_context>
chip_gen: v5e
topology: v5e:2x2
jax: 0.10.0
libtpu: 0.0.40
codegen_flags: <defaults>
</compile_context>

<pallas_src>
import jax
import jax.numpy as jnp
from jax.experimental import pallas as pl
from jax.experimental.pallas import tpu as pltpu


def _sigmoid(x):
    # EUP-friendly + robust: sigmoid(x) = 0.5 * tanh(0.5 * x) + 0.5
    return 0.5 * jnp.tanh(0.5 * x) + 0.5


# ---------------- fused forward kernel (all layers + head, single invocation) ----------------
def _make_fused_kernel(num_layers, T, B, H, n_seq):
    """Kernel args: x2d, (wih, whh, b) per layer, wfc_fw, wfc_bw, bfc, out, scratches."""

    def kernel(*refs):
        n_in = 1 + 3 * num_layers + 3
        x_ref = refs[0]                                              # (T*B, E) time-major
        layer_refs = [tuple(refs[1 + 3 * l: 4 + 3 * l]) for l in range(num_layers)]
        wfw_ref, wbw_ref, bfc_ref = refs[1 + 3 * num_layers: n_in]   # (H,O), (H,O), (1,O)
        out_ref = refs[n_in]                                         # (B, O)
        xg_sc = refs[n_in + 1]                                       # (4, T*B, H) scratch
        seq_sc = refs[n_in + 2:]                                     # n_seq x (T*B, H) scratch

        finals = []
        for l in range(num_layers):
            wih_ref, whh_ref, b_ref = layer_refs[l]

            # ---- hoisted input projection: all timesteps in one matmul per gate ----
            x_in = x_ref[...] if l == 0 else seq_sc[(l - 1) % n_seq][...]   # (T*B, Din)
            for k in range(4):
                xg_sc[k] = (jnp.dot(x_in, wih_ref[k],
                                    preferred_element_type=jnp.float32) + b_ref[k])

            whh = [whh_ref[k] for k in range(4)]          # (H, H) each, loaded once per layer
            write_seq = l < num_layers - 1                # last layer's sequence is unused

            # ---- serial recurrence; T small & static -> fully unrolled, static slices ----
            h = jnp.zeros((B, H), jnp.float32)
            c = jnp.zeros((B, H), jnp.float32)
            for t in range(T):
                rows = pl.ds(t * B, B)
                pre = [xg_sc[k, rows, :]
                       + jnp.dot(h, whh[k], preferred_element_type=jnp.float32)
                       for k in range(4)]                  # 4 x (B, H), lane-aligned
                i_g = _sigmoid(pre[0])
                f_g = _sigmoid(pre[1])
                g_g = jnp.tanh(pre[2])
                o_g = _sigmoid(pre[3])
                c = f_g * c + i_g * g_g
                h = o_g * jnp.tanh(c)
                if write_seq:
                    seq_sc[l % n_seq][rows, :] = h         # stays in VMEM, feeds next layer
            finals.append(h)                               # h_n for this layer

        # ---- FC + log_softmax head (concat expressed as two half-matmuls) ----
        logits = (jnp.dot(finals[-2], wfw_ref[...], preferred_element_type=jnp.float32)
                  + jnp.dot(finals[-1], wbw_ref[...], preferred_element_type=jnp.float32)
                  + bfc_ref[...])                          # (B, O)
        m = jnp.max(logits, axis=-1, keepdims=True)
        s = logits - m
        lse = jnp.log(jnp.sum(jnp.exp(s), axis=-1, keepdims=True))
        out_ref[...] = s - lse

    return kernel


# ---------------- full forward (embedding gather is plain-JAX glue) ----------------
@jax.jit
def sentiment_rnn_forward(tokens, params):
    emb = params["embedding"]
    B, T = tokens.shape
    lstm = params["lstm"]
    num_layers = len(lstm)
    H = lstm[0]["whh"].shape[-1]
    O = params["bfc"].shape[-1]
    n_seq = min(2, max(num_layers - 1, 1))

    # TODO(synk): the nn.Embedding row gather is data-dependent; kept as plain-JAX
    # jnp.take glue (could be fused via scalar-prefetched token ids + pl.Element BlockSpec).
    # Gather directly in time-major flattened order -> no materialized transpose of the
    # embedded tensor (only the tiny (B,T) int32 index matrix is transposed).
    tok_tm = jnp.transpose(tokens).reshape(-1)                       # (T*B,)
    x2d = jnp.take(emb, tok_tm, axis=0).astype(jnp.float32)          # (T*B, E)

    args = [x2d]
    for layer in lstm:
        args += [layer["wih"], layer["whh"], layer["b"]]
    args += [params["wfc_fw_t"], params["wfc_bw_t"], params["bfc"]]

    vmem = pl.BlockSpec(memory_space=pltpu.MemorySpace.VMEM)
    return pl.pallas_call(
        _make_fused_kernel(num_layers=num_layers, T=T, B=B, H=H, n_seq=n_seq),
        out_shape=jax.ShapeDtypeStruct((B, O), jnp.float32),
        in_specs=[vmem] * len(args),
        out_specs=vmem,
        scratch_shapes=[pltpu.VMEM((4, T * B, H), jnp.float32)]          # hoisted gate projections
                       + [pltpu.VMEM((T * B, H), jnp.float32)] * n_seq,  # hidden sequences
    )(*args)


# ---------------- deterministic parameter init (PyTorch-style, per-gate layout) ----------------
def init_params(key, *, num_layers, vocab_size, hidden_dim, embedding_dim, output_dim):
    H = hidden_dim
    k_emb, k_fc_w, k_fc_b, k_lstm = jax.random.split(key, 4)
    params = {"embedding": jax.random.normal(k_emb, (vocab_size, embedding_dim), jnp.float32)}

    bound = float(1.0 / (H ** 0.5))
    lkeys = jax.random.split(k_lstm, num_layers)
    lstm = []
    for l in range(num_layers):
        din = embedding_dim if l == 0 else H
        k1, k2, k3, k4 = jax.random.split(lkeys[l], 4)
        wih = jax.random.uniform(k1, (4 * H, din), jnp.float32, -bound, bound)  # rows [i|f|g|o]
        whh = jax.random.uniform(k2, (4 * H, H), jnp.float32, -bound, bound)
        bih = jax.random.uniform(k3, (4 * H,), jnp.float32, -bound, bound)
        bhh = jax.random.uniform(k4, (4 * H,), jnp.float32, -bound, bound)
        lstm.append({
            "wih": jnp.transpose(wih.reshape(4, H, din), (0, 2, 1)),   # (4, Din, H)
            "whh": jnp.transpose(whh.reshape(4, H, H), (0, 2, 1)),     # (4, H, H)
            "b": (bih + bhh).reshape(4, 1, H),                         # (4, 1, H)
        })
    params["lstm"] = lstm

    fc_bound = float(1.0 / ((2 * H) ** 0.5))
    wfc = jax.random.uniform(k_fc_w, (output_dim, 2 * H), jnp.float32, -fc_bound, fc_bound)
    bfc = jax.random.uniform(k_fc_b, (output_dim,), jnp.float32, -fc_bound, fc_bound)
    params["wfc_fw_t"] = wfc[:, :H].T     # (H, O) — multiplies h_n[-2]
    params["wfc_bw_t"] = wfc[:, H:].T     # (H, O) — multiplies h_n[-1]
    params["bfc"] = bfc[None, :]          # (1, O)
    return params


# ---------------- pure-JAX reference for correctness ----------------
def reference_forward(tokens, params):
    embeds = jnp.take(params["embedding"], tokens, axis=0)   # (B, T, E)
    B, T, _ = embeds.shape
    x = embeds.astype(jnp.float32)
    finals = []
    for layer in params["lstm"]:
        wih, whh, b = layer["wih"], layer["whh"], layer["b"]
        H = whh.shape[-1]
        h = jnp.zeros((B, H), jnp.float32)
        c = jnp.zeros((B, H), jnp.float32)
        outs = []
        for t in range(T):
            xt = x[:, t, :]
            i = jax.nn.sigmoid(xt @ wih[0] + h @ whh[0] + b[0])
            f = jax.nn.sigmoid(xt @ wih[1] + h @ whh[1] + b[1])
            g = jnp.tanh(xt @ wih[2] + h @ whh[2] + b[2])
            o = jax.nn.sigmoid(xt @ wih[3] + h @ whh[3] + b[3])
            c = f * c + i * g
            h = o * jnp.tanh(c)
            outs.append(h)
        x = jnp.stack(outs, axis=1)
        finals.append(h)
    logits = finals[-2] @ params["wfc_fw_t"] + finals[-1] @ params["wfc_bw_t"] + params["bfc"]
    return jax.nn.log_softmax(logits, axis=-1)


if __name__ == "__main__":
    B, T = 2, 8
    NUM_LAYERS, VOCAB, HIDDEN, EMBED, OUT = 2, 50, 32, 16, 4

    key = jax.random.PRNGKey(0)
    k_tok, k_param = jax.random.split(key)
    tokens = jax.random.randint(k_tok, (B, T), 0, VOCAB, dtype=jnp.int32)
    params = init_params(k_param, num_layers=NUM_LAYERS, vocab_size=VOCAB,
                         hidden_dim=HIDDEN, embedding_dim=EMBED, output_dim=OUT)

    out = jax.block_until_ready(sentiment_rnn_forward(tokens, params))
    ref = reference_forward(tokens, params)

    assert out.shape == (B, OUT), out.shape
    assert jnp.allclose(out, ref, atol=1e-2, rtol=1e-2), (out, ref)
    print("KERNEL_OK")
</pallas_src>

<mosaic_0001>
module attributes {stable_mosaic.version = 11 : i64} {
  func.func @kernel(%arg0: memref<16x16xf32, #tpu.memory_space<vmem>>, %arg1: memref<4x16x32xf32, #tpu.memory_space<vmem>>, %arg2: memref<4x32x32xf32, #tpu.memory_space<vmem>>, %arg3: memref<4x1x32xf32, #tpu.memory_space<vmem>>, %arg4: memref<4x32x32xf32, #tpu.memory_space<vmem>>, %arg5: memref<4x32x32xf32, #tpu.memory_space<vmem>>, %arg6: memref<4x1x32xf32, #tpu.memory_space<vmem>>, %arg7: memref<32x4xf32, #tpu.memory_space<vmem>>, %arg8: memref<32x4xf32, #tpu.memory_space<vmem>>, %arg9: memref<1x4xf32, #tpu.memory_space<vmem>>, %arg10: memref<2x4xf32, #tpu.memory_space<vmem>>, %arg11: memref<4x16x32xf32, #tpu.memory_space<vmem>>, %arg12: memref<16x32xf32, #tpu.memory_space<vmem>>) attributes {dimension_semantics = [], scalar_prefetch = 0 : i64, scratch_operands = 2 : i64, tpu.core_type = #tpu.core_type<tc>} {
    %c0 = arith.constant 0 : index
    %c0_0 = arith.constant 0 : index
    %0 = vector.load %arg0[%c0, %c0_0] : memref<16x16xf32, #tpu.memory_space<vmem>>, vector<16x16xf32>
    %c0_1 = arith.constant 0 : index
    %c0_2 = arith.constant 0 : index
    %c0_3 = arith.constant 0 : index
    %1 = vector.load %arg1[%c0_1, %c0_2, %c0_3] : memref<4x16x32xf32, #tpu.memory_space<vmem>>, vector<1x16x32xf32>
    %2 = vector.shape_cast %1 : vector<1x16x32xf32> to vector<16x32xf32>
    %cst = arith.constant dense<0.000000e+00> : vector<16x32xf32>
    %3 = tpu.matmul %0, %2, %cst {dimension_numbers = #tpu.dot_dimension_numbers<[1], [0], [0], [1], [0, 0, 1, 1], [], []>} : vector<16x16xf32>, vector<16x32xf32>, vector<16x32xf32> -> vector<16x32xf32>
    %c0_4 = arith.constant 0 : index
    %c0_5 = arith.constant 0 : index
    %c0_6 = arith.constant 0 : index
    %4 = vector.load %arg3[%c0_4, %c0_5, %c0_6] : memref<4x1x32xf32, #tpu.memory_space<vmem>>, vector<1x1x32xf32>
    %5 = vector.shape_cast %4 : vector<1x1x32xf32> to vector<1x32xf32>
    %6 = vector.broadcast %5 : vector<1x32xf32> to vector<16x32xf32>
    %7 = arith.addf %3, %6 : vector<16x32xf32>
    %c0_7 = arith.constant 0 : index
    %c0_8 = arith.constant 0 : index
    %c0_9 = arith.constant 0 : index
    %8 = vector.load %arg11[%c0_7, %c0_8, %c0_9] : memref<4x16x32xf32, #tpu.memory_space<vmem>>, vector<1x16x32xf32>
    %9 = vector.shape_cast %8 : vector<1x16x32xf32> to vector<16x32xf32>
    %10 = vector.shape_cast %7 : vector<16x32xf32> to vector<1x16x32xf32>
    tpu.vector_store %arg11[%c0_7, %c0_8, %c0_9], %10 {strides = array<i32>} : memref<4x16x32xf32, #tpu.memory_space<vmem>>, vector<1x16x32xf32>,
    %c1 = arith.constant 1 : index
    %c0_10 = arith.constant 0 : index
    %c0_11 = arith.constant 0 : index
    %11 = vector.load %arg1[%c1, %c0_10, %c0_11] : memref<4x16x32xf32, #tpu.memory_space<vmem>>, vector<1x16x32xf32>
    %12 = vector.shape_cast %11 : vector<1x16x32xf32> to vector<16x32xf32>
    %cst_12 = arith.constant dense<0.000000e+00> : vector<16x32xf32>
    %13 = tpu.matmul %0, %12, %cst_12 {dimension_numbers = #tpu.dot_dimension_numbers<[1], [0], [0], [1], [0, 0, 1, 1], [], []>} : vector<16x16xf32>, vector<16x32xf32>, vector<16x32xf32> -> vector<16x32xf32>
    %c1_13 = arith.constant 1 : index
    %c0_14 = arith.constant 0 : index
    %c0_15 = arith.constant 0 : index
    %14 = vector.load %arg3[%c1_13, %c0_14, %c0_15] : memref<4x1x32xf32, #tpu.memory_space<vmem>>, vector<1x1x32xf32>
    %15 = vector.shape_cast %14 : vector<1x1x32xf32> to vector<1x32xf32>
    %16 = vector.broadcast %15 : vector<1x32xf32> to vector<16x32xf32>
    %17 = arith.addf %13, %16 : vector<16x32xf32>
    %c1_16 = arith.constant 1 : index
    %c0_17 = arith.constant 0 : index
    %c0_18 = arith.constant 0 : index
    %18 = vector.load %arg11[%c1_16, %c0_17, %c0_18] : memref<4x16x32xf32, #tpu.memory_space<vmem>>, vector<1x16x32xf32>
    %19 = vector.shape_cast %18 : vector<1x16x32xf32> to vector<16x32xf32>
    %20 = vector.shape_cast %17 : vector<16x32xf32> to vector<1x16x32xf32>
    tpu.vector_store %arg11[%c1_16, %c0_17, %c0_18], %20 {strides = array<i32>} : memref<4x16x32xf32, #tpu.memory_space<vmem>>, vector<1x16x32xf32>,
    %c2 = arith.constant 2 : index
    %c0_19 = arith.constant 0 : index
    %c0_20 = arith.constant 0 : index
    %21 = vector.load %arg1[%c2, %c0_19, %c0_20] : memref<4x16x32xf32, #tpu.memory_space<vmem>>, vector<1x16x32xf32>
    %22 = vector.shape_cast %21 : vector<1x16x32xf32> to vector<16x32xf32>
    %cst_21 = arith.constant dense<0.000000e+00> : vector<16x32xf32>
    %23 = tpu.matmul %0, %22, %cst_21 {dimension_numbers = #tpu.dot_dimension_numbers<[1], [0], [0], [1], [0, 0, 1, 1], [], []>} : vector<16x16xf32>, vector<16x32xf32>, vector<16x32xf32> -> vector<16x32xf32>
    %c2_22 = arith.constant 2 : index
    %c0_23 = arith.constant 0 : index
    %c0_24 = arith.constant 0 : index
    %24 = vector.load %arg3[%c2_22, %c0_23, %c0_24] : memref<4x1x32xf32, #tpu.memory_space<vmem>>, vector<1x1x32xf32>
    %25 = vector.shape_cast %24 : vector<1x1x32xf32> to vector<1x32xf32>
    %26 = vector.broadcast %25 : vector<1x32xf32> to vector<16x32xf32>
    %27 = arith.addf %23, %26 : vector<16x32xf32>
    %c2_25 = arith.constant 2 : index
    %c0_26 = arith.constant 0 : index
    %c0_27 = arith.constant 0 : index
    %28 = vector.load %arg11[%c2_25, %c0_26, %c0_27] : memref<4x16x32xf32, #tpu.memory_space<vmem>>, vector<1x16x32xf32>
    %29 = vector.shape_cast %28 : vector<1x16x32xf32> to vector<16x32xf32>
    %30 = vector.shape_cast %27 : vector<16x32xf32> to vector<1x16x32xf32>
    tpu.vector_store %arg11[%c2_25, %c0_26, %c0_27], %30 {strides = array<i32>} : memref<4x16x32xf32, #tpu.memory_space<vmem>>, vector<1x16x32xf32>,
    %c3 = arith.constant 3 : index
    %c0_28 = arith.constant 0 : index
    %c0_29 = arith.constant 0 : index
    %31 = vector.load %arg1[%c3, %c0_28, %c0_29] : memref<4x16x32xf32, #tpu.memory_space<vmem>>, vector<1x16x32xf32>
    %32 = vector.shape_cast %31 : vector<1x16x32xf32> to vector<16x32xf32>
    %cst_30 = arith.constant dense<0.000000e+00> : vector<16x32xf32>
    %33 = tpu.matmul %0, %32, %cst_30 {dimension_numbers = #tpu.dot_dimension_numbers<[1], [0], [0], [1], [0, 0, 1, 1], [], []>} : vector<16x16xf32>, vector<16x32xf32>, vector<16x32xf32> -> vector<16x32xf32>
    %c3_31 = arith.constant 3 : index
    %c0_32 = arith.constant 0 : index
    %c0_33 = arith.constant 0 : index
    %34 = vector.load %arg3[%c3_31, %c0_32, %c0_33] : memref<4x1x32xf32, #tpu.memory_space<vmem>>, vector<1x1x32xf32>
    %35 = vector.shape_cast %34 : vector<1x1x32xf32> to vector<1x32xf32>
    %36 = vector.broadcast %35 : vector<1x32xf32> to vector<16x32xf32>
    %37 = arith.addf %33, %36 : vector<16x32xf32>
    %c3_34 = arith.constant 3 : index
    %c0_35 = arith.constant 0 : index
    %c0_36 = arith.constant 0 : index
    %38 = vector.load %arg11[%c3_34, %c0_35, %c0_36] : memref<4x16x32xf32, #tpu.memory_space<vmem>>, vector<1x16x32xf32>
    %39 = vector.shape_cast %38 : vector<1x16x32xf32> to vector<16x32xf32>
    %40 = vector.shape_cast %37 : vector<16x32xf32> to vector<1x16x32xf32>
    tpu.vector_store %arg11[%c3_34, %c0_35, %c0_36], %40 {strides = array<i32>} : memref<4x16x32xf32, #tpu.memory_space<vmem>>, vector<1x16x32xf32>,
    %c0_37 = arith.constant 0 : index
    %c0_38 = arith.constant 0 : index
    %c0_39 = arith.constant 0 : index
    %41 = vector.load %arg2[%c0_37, %c0_38, %c0_39] : memref<4x32x32xf32, #tpu.memory_space<vmem>>, vector<1x32x32xf32>
    %42 = vector.shape_cast %41 : vector<1x32x32xf32> to vector<32x32xf32>
    %c1_40 = arith.constant 1 : index
    %c0_41 = arith.constant 0 : index
    %c0_42 = arith.constant 0 : index
    %43 = vector.load %arg2[%c1_40, %c0_41, %c0_42] : memref<4x32x32xf32, #tpu.memory_space<vmem>>, vector<1x32x32xf32>
    %44 = vector.shape_cast %43 : vector<1x32x32xf32> to vector<32x32xf32>
    %c2_43 = arith.constant 2 : index
    %c0_44 = arith.constant 0 : index
    %c0_45 = arith.constant 0 : index
    %45 = vector.load %arg2[%c2_43, %c0_44, %c0_45] : memref<4x32x32xf32, #tpu.memory_space<vmem>>, vector<1x32x32xf32>
    %46 = vector.shape_cast %45 : vector<1x32x32xf32> to vector<32x32xf32>
    %c3_46 = arith.constant 3 : index
    %c0_47 = arith.constant 0 : index
    %c0_48 = arith.constant 0 : index
    %47 = vector.load %arg2[%c3_46, %c0_47, %c0_48] : memref<4x32x32xf32, #tpu.memory_space<vmem>>, vector<1x32x32xf32>
    %48 = vector.shape_cast %47 : vector<1x32x32xf32> to vector<32x32xf32>
    %cst_49 = arith.constant 0.000000e+00 : f32
    %49 = vector.broadcast %cst_49 : f32 to vector<2x32xf32>
    %cst_50 = arith.constant 0.000000e+00 : f32
    %50 = vector.broadcast %cst_50 : f32 to vector<2x32xf32>
    %c0_51 = arith.constant 0 : index
    %c0_52 = arith.constant 0 : index
    %c0_53 = arith.constant 0 : index
    %51 = vector.load %arg11[%c0_51, %c0_52, %c0_53] : memref<4x16x32xf32, #tpu.memory_space<vmem>>, vector<1x2x32xf32>
    %52 = vector.shape_cast %51 : vector<1x2x32xf32> to vector<2x32xf32>
    %cst_54 = arith.constant dense<0.000000e+00> : vector<2x32xf32>
    %53 = tpu.matmul %49, %42, %cst_54 {dimension_numbers = #tpu.dot_dimension_numbers<[1], [0], [0], [1], [0, 0, 1, 1], [], []>} : vector<2x32xf32>, vector<32x32xf32>, vector<2x32xf32> -> vector<2x32xf32>
    %54 = arith.addf %52, %53 : vector<2x32xf32>
    %c1_55 = arith.constant 1 : index
    %c0_56 = arith.constant 0 : index
    %c0_57 = arith.constant 0 : index
    %55 = vector.load %arg11[%c1_55, %c0_56, %c0_57] : memref<4x16x32xf32, #tpu.memory_space<vmem>>, vector<1x2x32xf32>
    %56 = vector.shape_cast %55 : vector<1x2x32xf32> to vector<2x32xf32>
    %cst_58 = arith.constant dense<0.000000e+00> : vector<2x32xf32>
    %57 = tpu.matmul %49, %44, %cst_58 {dimension_numbers = #tpu.dot_dimension_numbers<[1], [0], [0], [1], [0, 0, 1, 1], [], []>} : vector<2x32xf32>, vector<32x32xf32>, vector<2x32xf32> -> vector<2x32xf32>
    %58 = arith.addf %56, %57 : vector<2x32xf32>
    %c2_59 = arith.constant 2 : index
    %c0_60 = arith.constant 0 : index
    %c0_61 = arith.constant 0 : index
    %59 = vector.load %arg11[%c2_59, %c0_60, %c0_61] : memref<4x16x32xf32, #tpu.memory_space<vmem>>, vector<1x2x32xf32>
    %60 = vector.shape_cast %59 : vector<1x2x32xf32> to vector<2x32xf32>
    %cst_62 = arith.constant dense<0.000000e+00> : vector<2x32xf32>
    %61 = tpu.matmul %49, %46, %cst_62 {dimension_numbers = #tpu.dot_dimension_numbers<[1], [0], [0], [1], [0, 0, 1, 1], [], []>} : vector<2x32xf32>, vector<32x32xf32>, vector<2x32xf32> -> vector<2x32xf32>
    %62 = arith.addf %60, %61 : vector<2x32xf32>
    %c3_63 = arith.constant 3 : index
    %c0_64 = arith.constant 0 : index
    %c0_65 = arith.constant 0 : index
    %63 = vector.load %arg11[%c3_63, %c0_64, %c0_65] : memref<4x16x32xf32, #tpu.memory_space<vmem>>, vector<1x2x32xf32>
    %64 = vector.shape_cast %63 : vector<1x2x32xf32> to vector<2x32xf32>
    %cst_66 = arith.constant dense<0.000000e+00> : vector<2x32xf32>
    %65 = tpu.matmul %49, %48, %cst_66 {dimension_numbers = #tpu.dot_dimension_numbers<[1], [0], [0], [1], [0, 0, 1, 1], [], []>} : vector<2x32xf32>, vector<32x32xf32>, vector<2x32xf32> -> vector<2x32xf32>
    %66 = arith.addf %64, %65 : vector<2x32xf32>
    %cst_67 = arith.constant 5.000000e-01 : f32
    %67 = vector.broadcast %cst_67 : f32 to vector<2x32xf32>
    %68 = arith.mulf %67, %54 : vector<2x32xf32>
    %69 = math.tanh %68 : vector<2x32xf32>
    %cst_68 = arith.constant 5.000000e-01 : f32
    %70 = vector.broadcast %cst_68 : f32 to vector<2x32xf32>
    %71 = arith.mulf %70, %69 : vector<2x32xf32>
    %cst_69 = arith.constant 5.000000e-01 : f32
    %72 = vector.broadcast %cst_69 : f32 to vector<2x32xf32>
    %73 = arith.addf %71, %72 : vector<2x32xf32>
    %cst_70 = arith.constant 5.000000e-01 : f32
    %74 = vector.broadcast %cst_70 : f32 to vector<2x32xf32>
    %75 = arith.mulf %74, %58 : vector<2x32xf32>
    %76 = math.tanh %75 : vector<2x32xf32>
    %cst_71 = arith.constant 5.000000e-01 : f32
    %77 = vector.broadcast %cst_71 : f32 to vector<2x32xf32>
    %78 = arith.mulf %77, %76 : vector<2x32xf32>
    %cst_72 = arith.constant 5.000000e-01 : f32
    %79 = vector.broadcast %cst_72 : f32 to vector<2x32xf32>
    %80 = arith.addf %78, %79 : vector<2x32xf32>
    %81 = math.tanh %62 : vector<2x32xf32>
    %cst_73 = arith.constant 5.000000e-01 : f32
    %82 = vector.broadcast %cst_73 : f32 to vector<2x32xf32>
    %83 = arith.mulf %82, %66 : vector<2x32xf32>
    %84 = math.tanh %83 : vector<2x32xf32>
    %cst_74 = arith.constant 5.000000e-01 : f32
    %85 = vector.broadcast %cst_74 : f32 to vector<2x32xf32>
    %86 = arith.mulf %85, %84 : vector<2x32xf32>
    %cst_75 = arith.constant 5.000000e-01 : f32
    %87 = vector.broadcast %cst_75 : f32 to vector<2x32xf32>
    %88 = arith.addf %86, %87 : vector<2x32xf32>
    %89 = arith.mulf %80, %50 : vector<2x32xf32>
    %90 = arith.mulf %73, %81 : vector<2x32xf32>
    %91 = arith.addf %89, %90 : vector<2x32xf32>
    %92 = math.tanh %91 : vector<2x32xf32>
    %93 = arith.mulf %88, %92 : vector<2x32xf32>
    %c0_76 = arith.constant 0 : index
    %c0_77 = arith.constant 0 : index
    %94 = vector.load %arg12[%c0_76, %c0_77] : memref<16x32xf32, #tpu.memory_space<vmem>>, vector<2x32xf32>
    tpu.vector_store %arg12[%c0_76, %c0_77], %93 {strides = array<i32>} : memref<16x32xf32, #tpu.memory_space<vmem>>, vector<2x32xf32>,
    %c0_78 = arith.constant 0 : index
    %c2_79 = arith.constant 2 : index
    %c0_80 = arith.constant 0 : index
    %95 = vector.load %arg11[%c0_78, %c2_79, %c0_80] : memref<4x16x32xf32, #tpu.memory_space<vmem>>, vector<1x2x32xf32>
    %96 = vector.shape_cast %95 : vector<1x2x32xf32> to vector<2x32xf32>
    %cst_81 = arith.constant dense<0.000000e+00> : vector<2x32xf32>
    %97 = tpu.matmul %93, %42, %cst_81 {dimension_numbers = #tpu.dot_dimension_numbers<[1], [0], [0], [1], [0, 0, 1, 1], [], []>} : vector<2x32xf32>, vector<32x32xf32>, vector<2x32xf32> -> vector<2x32xf32>
    %98 = arith.addf %96, %97 : vector<2x32xf32>
    %c1_82 = arith.constant 1 : index
    %c2_83 = arith.constant 2 : index
    %c0_84 = arith.constant 0 : index
    %99 = vector.load %arg11[%c1_82, %c2_83, %c0_84] : memref<4x16x32xf32, #tpu.memory_space<vmem>>, vector<1x2x32xf32>
    %100 = vector.shape_cast %99 : vector<1x2x32xf32> to vector<2x32xf32>
    %cst_85 = arith.constant dense<0.000000e+00> : vector<2x32xf32>
    %101 = tpu.matmul %93, %44, %cst_85 {dimension_numbers = #tpu.dot_dimension_numbers<[1], [0], [0], [1], [0, 0, 1, 1], [], []>} : vector<2x32xf32>, vector<32x32xf32>, vector<2x32xf32> -> vector<2x32xf32>
    %102 = arith.addf %100, %101 : vector<2x32xf32>
    %c2_86 = arith.constant 2 : index
    %c2_87 = arith.constant 2 : index
    %c0_88 = arith.constant 0 : index
    %103 = vector.load %arg11[%c2_86, %c2_87, %c0_88] : memref<4x16x32xf32, #tpu.memory_space<vmem>>, vector<1x2x32xf32>
    %104 = vector.shape_cast %103 : vector<1x2x32xf32> to vector<2x32xf32>
    %cst_89 = arith.constant dense<0.000000e+00> : vector<2x32xf32>
    %105 = tpu.matmul %93, %46, %cst_89 {dimension_numbers = #tpu.dot_dimension_numbers<[1], [0], [0], [1], [0, 0, 1, 1], [], []>} : vector<2x32xf32>, vector<32x32xf32>, vector<2x32xf32> -> vector<2x32xf32>
    %106 = arith.addf %104, %105 : vector<2x32xf32>
    %c3_90 = arith.constant 3 : index
    %c2_91 = arith.constant 2 : index
    %c0_92 = arith.constant 0 : index
    %107 = vector.load %arg11[%c3_90, %c2_91, %c0_92] : memref<4x16x32xf32, #tpu.memory_space<vmem>>, vector<1x2x32xf32>
    %108 = vector.shape_cast %107 : vector<1x2x32xf32> to vector<2x32xf32>
    %cst_93 = arith.constant dense<0.000000e+00> : vector<2x32xf32>
    %109 = tpu.matmul %93, %48, %cst_93 {dimension_numbers = #tpu.dot_dimension_numbers<[1], [0], [0], [1], [0, 0, 1, 1], [], []>} : vector<2x32xf32>, vector<32x32xf32>, vector<2x32xf32> -> vector<2x32xf32>
    %110 = arith.addf %108, %109 : vector<2x32xf32>
    %cst_94 = arith.constant 5.000000e-01 : f32
    %111 = vector.broadcast %cst_94 : f32 to vector<2x32xf32>
    %112 = arith.mulf %111, %98 : vector<2x32xf32>
    %113 = math.tanh %112 : vector<2x32xf32>
    %cst_95 = arith.constant 5.000000e-01 : f32
    %114 = vector.broadcast %cst_95 : f32 to vector<2x32xf32>
    %115 = arith.mulf %114, %113 : vector<2x32xf32>
    %cst_96 = arith.constant 5.000000e-01 : f32
    %116 = vector.broadcast %cst_96 : f32 to vector<2x32xf32>
    %117 = arith.addf %115, %116 : vector<2x32xf32>
    %cst_97 = arith.constant 5.000000e-01 : f32
    %118 = vector.broadcast %cst_97 : f32 to vector<2x32xf32>
    %119 = arith.mulf %118, %102 : vector<2x32xf32>
    %120 = math.tanh %119 : vector<2x32xf32>
    %cst_98 = arith.constant 5.000000e-01 : f32
    %121 = vector.broadcast %cst_98 : f32 to vector<2x32xf32>
    %122 = arith.mulf %121, %120 : vector<2x32xf32>
    %cst_99 = arith.constant 5.000000e-01 : f32
    %123 = vector.broadcast %cst_99 : f32 to vector<2x32xf32>
    %124 = arith.addf %122, %123 : vector<2x32xf32>
    %125 = math.tanh %106 : vector<2x32xf32>
    %cst_100 = arith.constant 5.000000e-01 : f32
    %126 = vector.broadcast %cst_100 : f32 to vector<2x32xf32>
    %127 = arith.mulf %126, %110 : vector<2x32xf32>
    %128 = math.tanh %127 : vector<2x32xf32>
    %cst_101 = arith.constant 5.000000e-01 : f32
    %129 = vector.broadcast %cst_101 : f32 to vector<2x32xf32>
    %130 = arith.mulf %129, %128 : vector<2x32xf32>
    %cst_102 = arith.constant 5.000000e-01 : f32
    %131 = vector.broadcast %cst_102 : f32 to vector<2x32xf32>
    %132 = arith.addf %130, %131 : vector<2x32xf32>
    %133 = arith.mulf %124, %91 : vector<2x32xf32>
    %134 = arith.mulf %117, %125 : vector<2x32xf32>
    %135 = arith.addf %133, %134 : vector<2x32xf32>
    %136 = math.tanh %135 : vector<2x32xf32>
    %137 = arith.mulf %132, %136 : vector<2x32xf32>
    %c2_103 = arith.constant 2 : index
    %c0_104 = arith.constant 0 : index
    %138 = vector.load %arg12[%c2_103, %c0_104] : memref<16x32xf32, #tpu.memory_space<vmem>>, vector<2x32xf32>
    tpu.vector_store %arg12[%c2_103, %c0_104], %137 {strides = array<i32>} : memref<16x32xf32, #tpu.memory_space<vmem>>, vector<2x32xf32>,
    %c0_105 = arith.constant 0 : index
    %c4 = arith.constant 4 : index
    %c0_106 = arith.constant 0 : index
    %139 = vector.load %arg11[%c0_105, %c4, %c0_106] : memref<4x16x32xf32, #tpu.memory_space<vmem>>, vector<1x2x32xf32>
    %140 = vector.shape_cast %139 : vector<1x2x32xf32> to vector<2x32xf32>
    %cst_107 = arith.constant dense<0.000000e+00> : vector<2x32xf32>
    %141 = tpu.matmul %137, %42, %cst_107 {dimension_numbers = #tpu.dot_dimension_numbers<[1], [0], [0], [1], [0, 0, 1, 1], [], []>} : vector<2x32xf32>, vector<32x32xf32>, vector<2x32xf32> -> vector<2x32xf32>
    %142 = arith.addf %140, %141 : vector<2x32xf32>
    %c1_108 = arith.constant 1 : index
    %c4_109 = arith.constant 4 : index
    %c0_110 = arith.constant 0 : index
    %143 = vector.load %arg11[%c1_108, %c4_109, %c0_110] : memref<4x16x32xf32, #tpu.memory_space<vmem>>, vector<1x2x32xf32>
    %144 = vector.shape_cast %143 : vector<1x2x32xf32> to vector<2x32xf32>
    %cst_111 = arith.constant dense<0.000000e+00> : vector<2x32xf32>
    %145 = tpu.matmul %137, %44, %cst_111 {dimension_numbers = #tpu.dot_dimension_numbers<[1], [0], [0], [1], [0, 0, 1, 1], [], []>} : vector<2x32xf32>, vector<32x32xf32>, vector<2x32xf32> -> vector<2x32xf32>
    %146 = arith.addf %144, %145 : vector<2x32xf32>
    %c2_112 = arith.constant 2 : index
    %c4_113 = arith.constant 4 : index
    %c0_114 = arith.constant 0 : index
    %147 = vector.load %arg11[%c2_112, %c4_113, %c0_114] : memref<4x16x32xf32, #tpu.memory_space<vmem>>, vector<1x2x32xf32>
    %148 = vector.shape_cast %147 : vector<1x2x32xf32> to vector<2x32xf32>
    %cst_115 = arith.constant dense<0.000000e+00> : vector<2x32xf32>
    %149 = tpu.matmul %137, %46, %cst_115 {dimension_numbers = #tpu.dot_dimension_numbers<[1], [0], [0], [1], [0, 0, 1, 1], [], []>} : vector<2x32xf32>, vector<32x32xf32>, vector<2x32xf32> -> vector<2x32xf32>
    %150 = arith.addf %148, %149 : vector<2x32xf32>
    %c3_116 = arith.constant 3 : index
    %c4_117 = arith.constant 4 : index
    %c0_118 = arith.constant 0 : index
    %151 = vector.load %arg11[%c3_116, %c4_117, %c0_118] : memref<4x16x32xf32, #tpu.memory_space<vmem>>, vector<1x2x32xf32>
    %152 = vector.shape_cast %151 : vector<1x2x32xf32> to vector<2x32xf32>
    %cst_119 = arith.constant dense<0.000000e+00> : vector<2x32xf32>
    %153 = tpu.matmul %137, %48, %cst_119 {dimension_numbers = #tpu.dot_dimension_numbers<[1], [0], [0], [1], [0, 0, 1, 1], [], []>} : vector<2x32xf32>, vector<32x32xf32>, vector<2x32xf32> -> vector<2x32xf32>
    %154 = arith.addf %152, %153 : vector<2x32xf32>
    %cst_120 = arith.constant 5.000000e-01 : f32
    %155 = vector.broadcast %cst_120 : f32 to vector<2x32xf32>
    %156 = arith.mulf %155, %142 : vector<2x32xf32>
    %157 = math.tanh %156 : vector<2x32xf32>
    %cst_121 = arith.constant 5.000000e-01 : f32
    %158 = vector.broadcast %cst_121 : f32 to vector<2x32xf32>
    %159 = arith.mulf %158, %157 : vector<2x32xf32>
    %cst_122 = arith.constant 5.000000e-01 : f32
    %160 = vector.broadcast %cst_122 : f32 to vector<2x32xf32>
    %161 = arith.addf %159, %160 : vector<2x32xf32>
    %cst_123 = arith.constant 5.000000e-01 : f32
    %162 = vector.broadcast %cst_123 : f32 to vector<2x32xf32>
    %163 = arith.mulf %162, %146 : vector<2x32xf32>
    %164 = math.tanh %163 : vector<2x32xf32>
    %cst_124 = arith.constant 5.000000e-01 : f32
    %165 = vector.broadcast %cst_124 : f32 to vector<2x32xf32>
    %166 = arith.mulf %165, %164 : vector<2x32xf32>
    %cst_125 = arith.constant 5.000000e-01 : f32
    %167 = vector.broadcast %cst_125 : f32 to vector<2x32xf32>
    %168 = arith.addf %166, %167 : vector<2x32xf32>
    %169 = math.tanh %150 : vector<2x32xf32>
    %cst_126 = arith.constant 5.000000e-01 : f32
    %170 = vector.broadcast %cst_126 : f32 to vector<2x32xf32>
    %171 = arith.mulf %170, %154 : vector<2x32xf32>
    %172 = math.tanh %171 : vector<2x32xf32>
    %cst_127 = arith.constant 5.000000e-01 : f32
    %173 = vector.broadcast %cst_127 : f32 to vector<2x32xf32>
    %174 = arith.mulf %173, %172 : vector<2x32xf32>
    %cst_128 = arith.constant 5.000000e-01 : f32
    %175 = vector.broadcast %cst_128 : f32 to vector<2x32xf32>
    %176 = arith.addf %174, %175 : vector<2x32xf32>
    %177 = arith.mulf %168, %135 : vector<2x32xf32>
    %178 = arith.mulf %161, %169 : vector<2x32xf32>
    %179 = arith.addf %177, %178 : vector<2x32xf32>
    %180 = math.tanh %179 : vector<2x32xf32>
    %181 = arith.mulf %176, %180 : vector<2x32xf32>
    %c4_129 = arith.constant 4 : index
    %c0_130 = arith.constant 0 : index
    %182 = vector.load %arg12[%c4_129, %c0_130] : memref<16x32xf32, #tpu.memory_space<vmem>>, vector<2x32xf32>
    tpu.vector_store %arg12[%c4_129, %c0_130], %181 {strides = array<i32>} : memref<16x32xf32, #tpu.memory_space<vmem>>, vector<2x32xf32>,
    %c0_131 = arith.constant 0 : index
    %c6 = arith.constant 6 : index
    %c0_132 = arith.constant 0 : index
    %183 = vector.load %arg11[%c0_131, %c6, %c0_132] : memref<4x16x32xf32, #tpu.memory_space<vmem>>, vector<1x2x32xf32>
    %184 = vector.shape_cast %183 : vector<1x2x32xf32> to vector<2x32xf32>
    %cst_133 = arith.constant dense<0.000000e+00> : vector<2x32xf32>
    %185 = tpu.matmul %181, %42, %cst_133 {dimension_numbers = #tpu.dot_dimension_numbers<[1], [0], [0], [1], [0, 0, 1, 1], [], []>} : vector<2x32xf32>, vector<32x32xf32>, vector<2x32xf32> -> vector<2x32xf32>
    %186 = arith.addf %184, %185 : vector<2x32xf32>
    %c1_134 = arith.constant 1 : index
    %c6_135 = arith.constant 6 : index
    %c0_136 = arith.constant 0 : index
    %187 = vector.load %arg11[%c1_134, %c6_135, %c0_136] : memref<4x16x32xf32, #tpu.memory_space<vmem>>, vector<1x2x32xf32>
    %188 = vector.shape_cast %187 : vector<1x2x32xf32> to vector<2x32xf32>
    %cst_137 = arith.constant dense<0.000000e+00> : vector<2x32xf32>
    %189 = tpu.matmul %181, %44, %cst_137 {dimension_numbers = #tpu.dot_dimension_numbers<[1], [0], [0], [1], [0, 0, 1, 1], [], []>} : vector<2x32xf32>, vector<32x32xf32>, vector<2x32xf32> -> vector<2x32xf32>
    %190 = arith.addf %188, %189 : vector<2x32xf32>
    %c2_138 = arith.constant 2 : index
    %c6_139 = arith.constant 6 : index
    %c0_140 = arith.constant 0 : index
    %191 = vector.load %arg11[%c2_138, %c6_139, %c0_140] : memref<4x16x32xf32, #tpu.memory_space<vmem>>, vector<1x2x32xf32>
    %192 = vector.shape_cast %191 : vector<1x2x32xf32> to vector<2x32xf32>
    %cst_141 = arith.constant dense<0.000000e+00> : vector<2x32xf32>
    %193 = tpu.matmul %181, %46, %cst_141 {dimension_numbers = #tpu.dot_dimension_numbers<[1], [0], [0], [1], [0, 0, 1, 1], [], []>} : vector<2x32xf32>, vector<32x32xf32>, vector<2x32xf32> -> vector<2x32xf32>
    %194 = arith.addf %192, %193 : vector<2x32xf32>
    %c3_142 = arith.constant 3 : index
    %c6_143 = arith.constant 6 : index
    %c0_144 = arith.constant 0 : index
    %195 = vector.load %arg11[%c3_142, %c6_143, %c0_144] : memref<4x16x32xf32, #tpu.memory_space<vmem>>, vector<1x2x32xf32>
    %196 = vector.shape_cast %195 : vector<1x2x32xf32> to vector<2x32xf32>
    %cst_145 = arith.constant dense<0.000000e+00> : vector<2x32xf32>
    %197 = tpu.matmul %181, %48, %cst_145 {dimension_numbers = #tpu.dot_dimension_numbers<[1], [0], [0], [1], [0, 0, 1, 1], [], []>} : vector<2x32xf32>, vector<32x32xf32>, vector<2x32xf32> -> vector<2x32xf32>
    %198 = arith.addf %196, %197 : vector<2x32xf32>
    %cst_146 = arith.constant 5.000000e-01 : f32
    %199 = vector.broadcast %cst_146 : f32 to vector<2x32xf32>
    %200 = arith.mulf %199, %186 : vector<2x32xf32>
    %201 = math.tanh %200 : vector<2x32xf32>
    %cst_147 = arith.constant 5.000000e-01 : f32
    %202 = vector.broadcast %cst_147 : f32 to vector<2x32xf32>
    %203 = arith.mulf %202, %201 : vector<2x32xf32>
    %cst_148 = arith.constant 5.000000e-01 : f32
    %204 = vector.broadcast %cst_148 : f32 to vector<2x32xf32>
    %205 = arith.addf %203, %204 : vector<2x32xf32>
    %cst_149 = arith.constant 5.000000e-01 : f32
    %206 = vector.broadcast %cst_149 : f32 to vector<2x32xf32>
    %207 = arith.mulf %206, %190 : vector<2x32xf32>
    %208 = math.tanh %207 : vector<2x32xf32>
    %cst_150 = arith.constant 5.000000e-01 : f32
    %209 = vector.broadcast %cst_150 : f32 to vector<2x32xf32>
    %210 = arith.mulf %209, %208 : vector<2x32xf32>
    %cst_151 = arith.constant 5.000000e-01 : f32
    %211 = vector.broadcast %cst_151 : f32 to vector<2x32xf32>
    %212 = arith.addf %210, %211 : vector<2x32xf32>
    %213 = math.tanh %194 : vector<2x32xf32>
    %cst_152 = arith.constant 5.000000e-01 : f32
    %214 = vector.broadcast %cst_152 : f32 to vector<2x32xf32>
    %215 = arith.mulf %214, %198 : vector<2x32xf32>
    %216 = math.tanh %215 : vector<2x32xf32>
    %cst_153 = arith.constant 5.000000e-01 : f32
    %217 = vector.broadcast %cst_153 : f32 to vector<2x32xf32>
    %218 = arith.mulf %217, %216 : vector<2x32xf32>
    %cst_154 = arith.constant 5.000000e-01 : f32
    %219 = vector.broadcast %cst_154 : f32 to vector<2x32xf32>
    %220 = arith.addf %218, %219 : vector<2x32xf32>
    %221 = arith.mulf %212, %179 : vector<2x32xf32>
    %222 = arith.mulf %205, %213 : vector<2x32xf32>
    %223 = arith.addf %221, %222 : vector<2x32xf32>
    %224 = math.tanh %223 : vector<2x32xf32>
    %225 = arith.mulf %220, %224 : vector<2x32xf32>
    %c6_155 = arith.constant 6 : index
    %c0_156 = arith.constant 0 : index
    %226 = vector.load %arg12[%c6_155, %c0_156] : memref<16x32xf32, #tpu.memory_space<vmem>>, vector<2x32xf32>
    tpu.vector_store %arg12[%c6_155, %c0_156], %225 {strides = array<i32>} : memref<16x32xf32, #tpu.memory_space<vmem>>, vector<2x32xf32>,
    %c0_157 = arith.constant 0 : index
    %c8 = arith.constant 8 : index
    %c0_158 = arith.constant 0 : index
    %227 = vector.load %arg11[%c0_157, %c8, %c0_158] : memref<4x16x32xf32, #tpu.memory_space<vmem>>, vector<1x2x32xf32>
    %228 = vector.shape_cast %227 : vector<1x2x32xf32> to vector<2x32xf32>
    %cst_159 = arith.constant dense<0.000000e+00> : vector<2x32xf32>
    %229 = tpu.matmul %225, %42, %cst_159 {dimension_numbers = #tpu.dot_dimension_numbers<[1], [0], [0], [1], [0, 0, 1, 1], [], []>} : vector<2x32xf32>, vector<32x32xf32>, vector<2x32xf32> -> vector<2x32xf32>
    %230 = arith.addf %228, %229 : vector<2x32xf32>
    %c1_160 = arith.constant 1 : index
    %c8_161 = arith.constant 8 : index
    %c0_162 = arith.constant 0 : index
    %231 = vector.load %arg11[%c1_160, %c8_161, %c0_162] : memref<4x16x32xf32, #tpu.memory_space<vmem>>, vector<1x2x32xf32>
    %232 = vector.shape_cast %231 : vector<1x2x32xf32> to vector<2x32xf32>
    %cst_163 = arith.constant dense<0.000000e+00> : vector<2x32xf32>
    %233 = tpu.matmul %225, %44, %cst_163 {dimension_numbers = #tpu.dot_dimension_numbers<[1], [0], [0], [1], [0, 0, 1, 1], [], []>} : vector<2x32xf32>, vector<32x32xf32>, vector<2x32xf32> -> vector<2x32xf32>
    %234 = arith.addf %232, %233 : vector<2x32xf32>
    %c2_164 = arith.constant 2 : index
    %c8_165 = arith.constant 8 : index
    %c0_166 = arith.constant 0 : index
    %235 = vector.load %arg11[%c2_164, %c8_165, %c0_166] : memref<4x16x32xf32, #tpu.memory_space<vmem>>, vector<1x2x32xf32>
    %236 = vector.shape_cast %235 : vector<1x2x32xf32> to vector<2x32xf32>
    %cst_167 = arith.constant dense<0.000000e+00> : vector<2x32xf32>
    %237 = tpu.matmul %225, %46, %cst_167 {dimension_numbers = #tpu.dot_dimension_numbers<[1], [0], [0], [1], [0, 0, 1, 1], [], []>} : vector<2x32xf32>, vector<32x32xf32>, vector<2x32xf32> -> vector<2x32xf32>
    %238 = arith.addf %236, %237 : vector<2x32xf32>
    %c3_168 = arith.constant 3 : index
    %c8_169 = arith.constant 8 : index
    %c0_170 = arith.constant 0 : index
    %239 = vector.load %arg11[%c3_168, %c8_169, %c0_170] : memref<4x16x32xf32, #tpu.memory_space<vmem>>, vector<1x2x32xf32>
    %240 = vector.shape_cast %239 : vector<1x2x32xf32> to vector<2x32xf32>
    %cst_171 = arith.constant dense<0.000000e+00> : vector<2x32xf32>
    %241 = tpu.matmul %225, %48, %cst_171 {dimension_numbers = #tpu.dot_dimension_numbers<[1], [0], [0], [1], [0, 0, 1, 1], [], []>} : vector<2x32xf32>, vector<32x32xf32>, vector<2x32xf32> -> vector<2x32xf32>
    %242 = arith.addf %240, %241 : vector<2x32xf32>
    %cst_172 = arith.constant 5.000000e-01 : f32
    %243 = vector.broadcast %cst_172 : f32 to vector<2x32xf32>
    %244 = arith.mulf %243, %230 : vector<2x32xf32>
    %245 = math.tanh %244 : vector<2x32xf32>
    %cst_173 = arith.constant 5.000000e-01 : f32
    %246 = vector.broadcast %cst_173 : f32 to vector<2x32xf32>
    %247 = arith.mulf %246, %245 : vector<2x32xf32>
    %cst_174 = arith.constant 5.000000e-01 : f32
    %248 = vector.broadcast %cst_174 : f32 to vector<2x32xf32>
    %249 = arith.addf %247, %248 : vector<2x32xf32>
    %cst_175 = arith.constant 5.000000e-01 : f32
    %250 = vector.broadcast %cst_175 : f32 to vector<2x32xf32>
    %251 = arith.mulf %250, %234 : vector<2x32xf32>
    %252 = math.tanh %251 : vector<2x32xf32>
    %cst_176 = arith.constant 5.000000e-01 : f32
    %253 = vector.broadcast %cst_176 : f32 to vector<2x32xf32>
    %254 = arith.mulf %253, %252 : vector<2x32xf32>
    %cst_177 = arith.constant 5.000000e-01 : f32
    %255 = vector.broadcast %cst_177 : f32 to vector<2x32xf32>
    %256 = arith.addf %254, %255 : vector<2x32xf32>
    %257 = math.tanh %238 : vector<2x32xf32>
    %cst_178 = arith.constant 5.000000e-01 : f32
    %258 = vector.broadcast %cst_178 : f32 to vector<2x32xf32>
    %259 = arith.mulf %258, %242 : vector<2x32xf32>
    %260 = math.tanh %259 : vector<2x32xf32>
    %cst_179 = arith.constant 5.000000e-01 : f32
    %261 = vector.broadcast %cst_179 : f32 to vector<2x32xf32>
    %262 = arith.mulf %261, %260 : vector<2x32xf32>
    %cst_180 = arith.constant 5.000000e-01 : f32
    %263 = vector.broadcast %cst_180 : f32 to vector<2x32xf32>
    %264 = arith.addf %262, %263 : vector<2x32xf32>
    %265 = arith.mulf %256, %223 : vector<2x32xf32>
    %266 = arith.mulf %249, %257 : vector<2x32xf32>
    %267 = arith.addf %265, %266 : vector<2x32xf32>
    %268 = math.tanh %267 : vector<2x32xf32>
    %269 = arith.mulf %264, %268 : vector<2x32xf32>
    %c8_181 = arith.constant 8 : index
    %c0_182 = arith.constant 0 : index
    %270 = vector.load %arg12[%c8_181, %c0_182] : memref<16x32xf32, #tpu.memory_space<vmem>>, vector<2x32xf32>
    tpu.vector_store %arg12[%c8_181, %c0_182], %269 {strides = array<i32>} : memref<16x32xf32, #tpu.memory_space<vmem>>, vector<2x32xf32>,
    %c0_183 = arith.constant 0 : index
    %c10 = arith.constant 10 : index
    %c0_184 = arith.constant 0 : index
    %271 = vector.load %arg11[%c0_183, %c10, %c0_184] : memref<4x16x32xf32, #tpu.memory_space<vmem>>, vector<1x2x32xf32>
    %272 = vector.shape_cast %271 : vector<1x2x32xf32> to vector<2x32xf32>
    %cst_185 = arith.constant dense<0.000000e+00> : vector<2x32xf32>
    %273 = tpu.matmul %269, %42, %cst_185 {dimension_numbers = #tpu.dot_dimension_numbers<[1], [0], [0], [1], [0, 0, 1, 1], [], []>} : vector<2x32xf32>, vector<32x32xf32>, vector<2x32xf32> -> vector<2x32xf32>
    %274 = arith.addf %272, %273 : vector<2x32xf32>
    %c1_186 = arith.constant 1 : index
    %c10_187 = arith.constant 10 : index
    %c0_188 = arith.constant 0 : index
    %275 = vector.load %arg11[%c1_186, %c10_187, %c0_188] : memref<4x16x32xf32, #tpu.memory_space<vmem>>, vector<1x2x32xf32>
    %276 = vector.shape_cast %275 : vector<1x2x32xf32> to vector<2x32xf32>
    %cst_189 = arith.constant dense<0.000000e+00> : vector<2x32xf32>
    %277 = tpu.matmul %269, %44, %cst_189 {dimension_numbers = #tpu.dot_dimension_numbers<[1], [0], [0], [1], [0, 0, 1, 1], [], []>} : vector<2x32xf32>, vector<32x32xf32>, vector<2x32xf32> -> vector<2x32xf32>
    %278 = arith.addf %276, %277 : vector<2x32xf32>
    %c2_190 = arith.constant 2 : index
    %c10_191 = arith.constant 10 : index
    %c0_192 = arith.constant 0 : index
    %279 = vector.load %arg11[%c2_190, %c10_191, %c0_192] : memref<4x16x32xf32, #tpu.memory_space<vmem>>, vector<1x2x32xf32>
    %280 = vector.shape_cast %279 : vector<1x2x32xf32> to vector<2x32xf32>
    %cst_193 = arith.constant dense<0.000000e+00> : vector<2x32xf32>
    %281 = tpu.matmul %269, %46, %cst_193 {dimension_numbers = #tpu.dot_dimension_numbers<[1], [0], [0], [1], [0, 0, 1, 1], [], []>} : vector<2x32xf32>, vector<32x32xf32>, vector<2x32xf32> -> vector<2x32xf32>
    %282 = arith.addf %280, %281 : vector<2x32xf32>
    %c3_194 = arith.constant 3 : index
    %c10_195 = arith.constant 10 : index
    %c0_196 = arith.constant 0 : index
    %283 = vector.load %arg11[%c3_194, %c10_195, %c0_196] : memref<4x16x32xf32, #tpu.memory_space<vmem>>, vector<1x2x32xf32>
    %284 = vector.shape_cast %283 : vector<1x2x32xf32> to vector<2x32xf32>
    %cst_197 = arith.constant dense<0.000000e+00> : vector<2x32xf32>
    %285 = tpu.matmul %269, %48, %cst_197 {dimension_numbers = #tpu.dot_dimension_numbers<[1], [0], [0], [1], [0, 0, 1, 1], [], []>} : vector<2x32xf32>, vector<32x32xf32>, vector<2x32xf32> -> vector<2x32xf32>
    %286 = arith.addf %284, %285 : vector<2x32xf32>
    %cst_198 = arith.constant 5.000000e-01 : f32
    %287 = vector.broadcast %cst_198 : f32 to vector<2x32xf32>
    %288 = arith.mulf %287, %274 : vector<2x32xf32>
    %289 = math.tanh %288 : vector<2x32xf32>
    %cst_199 = arith.constant 5.000000e-01 : f32
    %290 = vector.broadcast %cst_199 : f32 to vector<2x32xf32>
    %291 = arith.mulf %290, %289 : vector<2x32xf32>
    %cst_200 = arith.constant 5.000000e-01 : f32
    %292 = vector.broadcast %cst_200 : f32 to vector<2x32xf32>
    %293 = arith.addf %291, %292 : vector<2x32xf32>
    %cst_201 = arith.constant 5.000000e-01 : f32
    %294 = vector.broadcast %cst_201 : f32 to vector<2x32xf32>
    %295 = arith.mulf %294, %278 : vector<2x32xf32>
    %296 = math.tanh %295 : vector<2x32xf32>
    %cst_202 = arith.constant 5.000000e-01 : f32
    %297 = vector.broadcast %cst_202 : f32 to vector<2x32xf32>
    %298 = arith.mulf %297, %296 : vector<2x32xf32>
    %cst_203 = arith.constant 5.000000e-01 : f32
    %299 = vector.broadcast %cst_203 : f32 to vector<2x32xf32>
    %300 = arith.addf %298, %299 : vector<2x32xf32>
    %301 = math.tanh %282 : vector<2x32xf32>
    %cst_204 = arith.constant 5.000000e-01 : f32
    %302 = vector.broadcast %cst_204 : f32 to vector<2x32xf32>
    %303 = arith.mulf %302, %286 : vector<2x32xf32>
    %304 = math.tanh %303 : vector<2x32xf32>
    %cst_205 = arith.constant 5.000000e-01 : f32
    %305 = vector.broadcast %cst_205 : f32 to vector<2x32xf32>
    %306 = arith.mulf %305, %304 : vector<2x32xf32>
    %cst_206 = arith.constant 5.000000e-01 : f32
    %307 = vector.broadcast %cst_206 : f32 to vector<2x32xf32>
    %308 = arith.addf %306, %307 : vector<2x32xf32>
    %309 = arith.mulf %300, %267 : vector<2x32xf32>
    %310 = arith.mulf %293, %301 : vector<2x32xf32>
    %311 = arith.addf %309, %310 : vector<2x32xf32>
    %312 = math.tanh %311 : vector<2x32xf32>
    %313 = arith.mulf %308, %312 : vector<2x32xf32>
    %c10_207 = arith.constant 10 : index
    %c0_208 = arith.constant 0 : index
    %314 = vector.load %arg12[%c10_207, %c0_208] : memref<16x32xf32, #tpu.memory_space<vmem>>, vector<2x32xf32>
    tpu.vector_store %arg12[%c10_207, %c0_208], %313 {strides = array<i32>} : memref<16x32xf32, #tpu.memory_space<vmem>>, vector<2x32xf32>,
    %c0_209 = arith.constant 0 : index
    %c12 = arith.constant 12 : index
    %c0_210 = arith.constant 0 : index
    %315 = vector.load %arg11[%c0_209, %c12, %c0_210] : memref<4x16x32xf32, #tpu.memory_space<vmem>>, vector<1x2x32xf32>
    %316 = vector.shape_cast %315 : vector<1x2x32xf32> to vector<2x32xf32>
    %cst_211 = arith.constant dense<0.000000e+00> : vector<2x32xf32>
    %317 = tpu.matmul %313, %42, %cst_211 {dimension_numbers = #tpu.dot_dimension_numbers<[1], [0], [0], [1], [0, 0, 1, 1], [], []>} : vector<2x32xf32>, vector<32x32xf32>, vector<2x32xf32> -> vector<2x32xf32>
    %318 = arith.addf %316, %317 : vector<2x32xf32>
    %c1_212 = arith.constant 1 : index
    %c12_213 = arith.constant 12 : index
    %c0_214 = arith.constant 0 : index
    %319 = vector.load %arg11[%c1_212, %c12_213, %c0_214] : memref<4x16x32xf32, #tpu.memory_space<vmem>>, vector<1x2x32xf32>
    %320 = vector.shape_cast %319 : vector<1x2x32xf32> to vector<2x32xf32>
    %cst_215 = arith.constant dense<0.000000e+00> : vector<2x32xf32>
    %321 = tpu.matmul %313, %44, %cst_215 {dimension_numbers = #tpu.dot_dimension_numbers<[1], [0], [0], [1], [0, 0, 1, 1], [], []>} : vector<2x32xf32>, vector<32x32xf32>, vector<2x32xf32> -> vector<2x32xf32>
    %322 = arith.addf %320, %321 : vector<2x32xf32>
    %c2_216 = arith.constant 2 : index
    %c12_217 = arith.constant 12 : index
    %c0_218 = arith.constant 0 : index
    %323 = vector.load %arg11[%c2_216, %c12_217, %c0_218] : memref<4x16x32xf32, #tpu.memory_space<vmem>>, vector<1x2x32xf32>
    %324 = vector.shape_cast %323 : vector<1x2x32xf32> to vector<2x32xf32>
    %cst_219 = arith.constant dense<0.000000e+00> : vector<2x32xf32>
    %325 = tpu.matmul %313, %46, %cst_219 {dimension_numbers = #tpu.dot_dimension_numbers<[1], [0], [0], [1], [0, 0, 1, 1], [], []>} : vector<2x32xf32>, vector<32x32xf32>, vector<2x32xf32> -> vector<2x32xf32>
    %326 = arith.addf %324, %325 : vector<2x32xf32>
    %c3_220 = arith.constant 3 : index
    %c12_221 = arith.constant 12 : index
    %c0_222 = arith.constant 0 : index
    %327 = vector.load %arg11[%c3_220, %c12_221, %c0_222] : memref<4x16x32xf32, #tpu.memory_space<vmem>>, vector<1x2x32xf32>
    %328 = vector.shape_cast %327 : vector<1x2x32xf32> to vector<2x32xf32>
    %cst_223 = arith.constant dense<0.000000e+00> : vector<2x32xf32>
    %329 = tpu.matmul %313, %48, %cst_223 {dimension_numbers = #tpu.dot_dimension_numbers<[1], [0], [0], [1], [0, 0, 1, 1], [], []>} : vector<2x32xf32>, vector<32x32xf32>, vector<2x32xf32> -> vector<2x32xf32>
    %330 = arith.addf %328, %329 : vector<2x32xf32>
    %cst_224 = arith.constant 5.000000e-01 : f32
    %331 = vector.broadcast %cst_224 : f32 to vector<2x32xf32>
    %332 = arith.mulf %331, %318 : vector<2x32xf32>
    %333 = math.tanh %332 : vector<2x32xf32>
    %cst_225 = arith.constant 5.000000e-01 : f32
    %334 = vector.broadcast %cst_225 : f32 to vector<2x32xf32>
    %335 = arith.mulf %334, %333 : vector<2x32xf32>
    %cst_226 = arith.constant 5.000000e-01 : f32
    %336 = vector.broadcast %cst_226 : f32 to vector<2x32xf32>
    %337 = arith.addf %335, %336 : vector<2x32xf32>
    %cst_227 = arith.constant 5.000000e-01 : f32
    %338 = vector.broadcast %cst_227 : f32 to vector<2x32xf32>
    %339 = arith.mulf %338, %322 : vector<2x32xf32>
    %340 = math.tanh %339 : vector<2x32xf32>
    %cst_228 = arith.constant 5.000000e-01 : f32
    %341 = vector.broadcast %cst_228 : f32 to vector<2x32xf32>
    %342 = arith.mulf %341, %340 : vector<2x32xf32>
    %cst_229 = arith.constant 5.000000e-01 : f32
    %343 = vector.broadcast %cst_229 : f32 to vector<2x32xf32>
    %344 = arith.addf %342, %343 : vector<2x32xf32>
    %345 = math.tanh %326 : vector<2x32xf32>
    %cst_230 = arith.constant 5.000000e-01 : f32
    %346 = vector.broadcast %cst_230 : f32 to vector<2x32xf32>
    %347 = arith.mulf %346, %330 : vector<2x32xf32>
    %348 = math.tanh %347 : vector<2x32xf32>
    %cst_231 = arith.constant 5.000000e-01 : f32
    %349 = vector.broadcast %cst_231 : f32 to vector<2x32xf32>
    %350 = arith.mulf %349, %348 : vector<2x32xf32>
    %cst_232 = arith.constant 5.000000e-01 : f32
    %351 = vector.broadcast %cst_232 : f32 to vector<2x32xf32>
    %352 = arith.addf %350, %351 : vector<2x32xf32>
    %353 = arith.mulf %344, %311 : vector<2x32xf32>
    %354 = arith.mulf %337, %345 : vector<2x32xf32>
    %355 = arith.addf %353, %354 : vector<2x32xf32>
    %356 = math.tanh %355 : vector<2x32xf32>
    %357 = arith.mulf %352, %356 : vector<2x32xf32>
    %c12_233 = arith.constant 12 : index
    %c0_234 = arith.constant 0 : index
    %358 = vector.load %arg12[%c12_233, %c0_234] : memref<16x32xf32, #tpu.memory_space<vmem>>, vector<2x32xf32>
    tpu.vector_store %arg12[%c12_233, %c0_234], %357 {strides = array<i32>} : memref<16x32xf32, #tpu.memory_space<vmem>>, vector<2x32xf32>,
    %c0_235 = arith.constant 0 : index
    %c14 = arith.constant 14 : index
    %c0_236 = arith.constant 0 : index
    %359 = vector.load %arg11[%c0_235, %c14, %c0_236] : memref<4x16x32xf32, #tpu.memory_space<vmem>>, vector<1x2x32xf32>
    %360 = vector.shape_cast %359 : vector<1x2x32xf32> to vector<2x32xf32>
    %cst_237 = arith.constant dense<0.000000e+00> : vector<2x32xf32>
    %361 = tpu.matmul %357, %42, %cst_237 {dimension_numbers = #tpu.dot_dimension_numbers<[1], [0], [0], [1], [0, 0, 1, 1], [], []>} : vector<2x32xf32>, vector<32x32xf32>, vector<2x32xf32> -> vector<2x32xf32>
    %362 = arith.addf %360, %361 : vector<2x32xf32>
    %c1_238 = arith.constant 1 : index
    %c14_239 = arith.constant 14 : index
    %c0_240 = arith.constant 0 : index
    %363 = vector.load %arg11[%c1_238, %c14_239, %c0_240] : memref<4x16x32xf32, #tpu.memory_space<vmem>>, vector<1x2x32xf32>
    %364 = vector.shape_cast %363 : vector<1x2x32xf32> to vector<2x32xf32>
    %cst_241 = arith.constant dense<0.000000e+00> : vector<2x32xf32>
    %365 = tpu.matmul %357, %44, %cst_241 {dimension_numbers = #tpu.dot_dimension_numbers<[1], [0], [0], [1], [0, 0, 1, 1], [], []>} : vector<2x32xf32>, vector<32x32xf32>, vector<2x32xf32> -> vector<2x32xf32>
    %366 = arith.addf %364, %365 : vector<2x32xf32>
    %c2_242 = arith.constant 2 : index
    %c14_243 = arith.constant 14 : index
    %c0_244 = arith.constant 0 : index
    %367 = vector.load %arg11[%c2_242, %c14_243, %c0_244] : memref<4x16x32xf32, #tpu.memory_space<vmem>>, vector<1x2x32xf32>
    %368 = vector.shape_cast %367 : vector<1x2x32xf32> to vector<2x32xf32>
    %cst_245 = arith.constant dense<0.000000e+00> : vector<2x32xf32>
    %369 = tpu.matmul %357, %46, %cst_245 {dimension_numbers = #tpu.dot_dimension_numbers<[1], [0], [0], [1], [0, 0, 1, 1], [], []>} : vector<2x32xf32>, vector<32x32xf32>, vector<2x32xf32> -> vector<2x32xf32>
    %370 = arith.addf %368, %369 : vector<2x32xf32>
    %c3_246 = arith.constant 3 : index
    %c14_247 = arith.constant 14 : index
    %c0_248 = arith.constant 0 : index
    %371 = vector.load %arg11[%c3_246, %c14_247, %c0_248] : memref<4x16x32xf32, #tpu.memory_space<vmem>>, vector<1x2x32xf32>
    %372 = vector.shape_cast %371 : vector<1x2x32xf32> to vector<2x32xf32>
    %cst_249 = arith.constant dense<0.000000e+00> : vector<2x32xf32>
    %373 = tpu.matmul %357, %48, %cst_249 {dimension_numbers = #tpu.dot_dimension_numbers<[1], [0], [0], [1], [0, 0, 1, 1], [], []>} : vector<2x32xf32>, vector<32x32xf32>, vector<2x32xf32> -> vector<2x32xf32>
    %374 = arith.addf %372, %373 : vector<2x32xf32>
    %cst_250 = arith.constant 5.000000e-01 : f32
    %375 = vector.broadcast %cst_250 : f32 to vector<2x32xf32>
    %376 = arith.mulf %375, %362 : vector<2x32xf32>
    %377 = math.tanh %376 : vector<2x32xf32>
    %cst_251 = arith.constant 5.000000e-01 : f32
    %378 = vector.broadcast %cst_251 : f32 to vector<2x32xf32>
    %379 = arith.mulf %378, %377 : vector<2x32xf32>
    %cst_252 = arith.constant 5.000000e-01 : f32
    %380 = vector.broadcast %cst_252 : f32 to vector<2x32xf32>
    %381 = arith.addf %379, %380 : vector<2x32xf32>
    %cst_253 = arith.constant 5.000000e-01 : f32
    %382 = vector.broadcast %cst_253 : f32 to vector<2x32xf32>
    %383 = arith.mulf %382, %366 : vector<2x32xf32>
    %384 = math.tanh %383 : vector<2x32xf32>
    %cst_254 = arith.constant 5.000000e-01 : f32
    %385 = vector.broadcast %cst_254 : f32 to vector<2x32xf32>
    %386 = arith.mulf %385, %384 : vector<2x32xf32>
    %cst_255 = arith.constant 5.000000e-01 : f32
    %387 = vector.broadcast %cst_255 : f32 to vector<2x32xf32>
    %388 = arith.addf %386, %387 : vector<2x32xf32>
    %389 = math.tanh %370 : vector<2x32xf32>
    %cst_256 = arith.constant 5.000000e-01 : f32
    %390 = vector.broadcast %cst_256 : f32 to vector<2x32xf32>
    %391 = arith.mulf %390, %374 : vector<2x32xf32>
    %392 = math.tanh %391 : vector<2x32xf32>
    %cst_257 = arith.constant 5.000000e-01 : f32
    %393 = vector.broadcast %cst_257 : f32 to vector<2x32xf32>
    %394 = arith.mulf %393, %392 : vector<2x32xf32>
    %cst_258 = arith.constant 5.000000e-01 : f32
    %395 = vector.broadcast %cst_258 : f32 to vector<2x32xf32>
    %396 = arith.addf %394, %395 : vector<2x32xf32>
    %397 = arith.mulf %388, %355 : vector<2x32xf32>
    %398 = arith.mulf %381, %389 : vector<2x32xf32>
    %399 = arith.addf %397, %398 : vector<2x32xf32>
    %400 = math.tanh %399 : vector<2x32xf32>
    %401 = arith.mulf %396, %400 : vector<2x32xf32>
    %c14_259 = arith.constant 14 : index
    %c0_260 = arith.constant 0 : index
    %402 = vector.load %arg12[%c14_259, %c0_260] : memref<16x32xf32, #tpu.memory_space<vmem>>, vector<2x32xf32>
    tpu.vector_store %arg12[%c14_259, %c0_260], %401 {strides = array<i32>} : memref<16x32xf32, #tpu.memory_space<vmem>>, vector<2x32xf32>,
    %c0_261 = arith.constant 0 : index
    %c0_262 = arith.constant 0 : index
    %403 = vector.load %arg12[%c0_261, %c0_262] : memref<16x32xf32, #tpu.memory_space<vmem>>, vector<16x32xf32>
    %c0_263 = arith.constant 0 : index
    %c0_264 = arith.constant 0 : index
    %c0_265 = arith.constant 0 : index
    %404 = vector.load %arg4[%c0_263, %c0_264, %c0_265] : memref<4x32x32xf32, #tpu.memory_space<vmem>>, vector<1x32x32xf32>
    %405 = vector.shape_cast %404 : vector<1x32x32xf32> to vector<32x32xf32>
    %cst_266 = arith.constant dense<0.000000e+00> : vector<16x32xf32>
    %406 = tpu.matmul %403, %405, %cst_266 {dimension_numbers = #tpu.dot_dimension_numbers<[1], [0], [0], [1], [0, 0, 1, 1], [], []>} : vector<16x32xf32>, vector<32x32xf32>, vector<16x32xf32> -> vector<16x32xf32>
    %c0_267 = arith.constant 0 : index
    %c0_268 = arith.constant 0 : index
    %c0_269 = arith.constant 0 : index
    %407 = vector.load %arg6[%c0_267, %c0_268, %c0_269] : memref<4x1x32xf32, #tpu.memory_space<vmem>>, vector<1x1x32xf32>
    %408 = vector.shape_cast %407 : vector<1x1x32xf32> to vector<1x32xf32>
    %409 = vector.broadcast %408 : vector<1x32xf32> to vector<16x32xf32>
    %410 = arith.addf %406, %409 : vector<16x32xf32>
    %c0_270 = arith.constant 0 : index
    %c0_271 = arith.constant 0 : index
    %c0_272 = arith.constant 0 : index
    %411 = vector.load %arg11[%c0_270, %c0_271, %c0_272] : memref<4x16x32xf32, #tpu.memory_space<vmem>>, vector<1x16x32xf32>
    %412 = vector.shape_cast %411 : vector<1x16x32xf32> to vector<16x32xf32>
    %413 = vector.shape_cast %410 : vector<16x32xf32> to vector<1x16x32xf32>
    tpu.vector_store %arg11[%c0_270, %c0_271, %c0_272], %413 {strides = array<i32>} : memref<4x16x32xf32, #tpu.memory_space<vmem>>, vector<1x16x32xf32>,
    %c1_273 = arith.constant 1 : index
    %c0_274 = arith.constant 0 : index
    %c0_275 = arith.constant 0 : index
    %414 = vector.load %arg4[%c1_273, %c0_274, %c0_275] : memref<4x32x32xf32, #tpu.memory_space<vmem>>, vector<1x32x32xf32>
    %415 = vector.shape_cast %414 : vector<1x32x32xf32> to vector<32x32xf32>
    %cst_276 = arith.constant dense<0.000000e+00> : vector<16x32xf32>
    %416 = tpu.matmul %403, %415, %cst_276 {dimension_numbers = #tpu.dot_dimension_numbers<[1], [0], [0], [1], [0, 0, 1, 1], [], []>} : vector<16x32xf32>, vector<32x32xf32>, vector<16x32xf32> -> vector<16x32xf32>
    %c1_277 = arith.constant 1 : index
    %c0_278 = arith.constant 0 : index
    %c0_279 = arith.constant 0 : index
    %417 = vector.load %arg6[%c1_277, %c0_278, %c0_279] : memref<4x1x32xf32, #tpu.memory_space<vmem>>, vector<1x1x32xf32>
    %418 = vector.shape_cast %417 : vector<1x1x32xf32> to vector<1x32xf32>
    %419 = vector.broadcast %418 : vector<1x32xf32> to vector<16x32xf32>
    %420 = arith.addf %416, %419 : vector<16x32xf32>
    %c1_280 = arith.constant 1 : index
    %c0_281 = arith.constant 0 : index
    %c0_282 = arith.constant 0 : index
    %421 = vector.load %arg11[%c1_280, %c0_281, %c0_282] : memref<4x16x32xf32, #tpu.memory_space<vmem>>, vector<1x16x32xf32>
    %422 = vector.shape_cast %421 : vector<1x16x32xf32> to vector<16x32xf32>
    %423 = vector.shape_cast %420 : vector<16x32xf32> to vector<1x16x32xf32>
    tpu.vector_store %arg11[%c1_280, %c0_281, %c0_282], %423 {strides = array<i32>} : memref<4x16x32xf32, #tpu.memory_space<vmem>>, vector<1x16x32xf32>,
    %c2_283 = arith.constant 2 : index
    %c0_284 = arith.constant 0 : index
    %c0_285 = arith.constant 0 : index
    %424 = vector.load %arg4[%c2_283, %c0_284, %c0_285] : memref<4x32x32xf32, #tpu.memory_space<vmem>>, vector<1x32x32xf32>
    %425 = vector.shape_cast %424 : vector<1x32x32xf32> to vector<32x32xf32>
    %cst_286 = arith.constant dense<0.000000e+00> : vector<16x32xf32>
    %426 = tpu.matmul %403, %425, %cst_286 {dimension_numbers = #tpu.dot_dimension_numbers<[1], [0], [0], [1], [0, 0, 1, 1], [], []>} : vector<16x32xf32>, vector<32x32xf32>, vector<16x32xf32> -> vector<16x32xf32>
    %c2_287 = arith.constant 2 : index
    %c0_288 = arith.constant 0 : index
    %c0_289 = arith.constant 0 : index
    %427 = vector.load %arg6[%c2_287, %c0_288, %c0_289] : memref<4x1x32xf32, #tpu.memory_space<vmem>>, vector<1x1x32xf32>
    %428 = vector.shape_cast %427 : vector<1x1x32xf32> to vector<1x32xf32>
    %429 = vector.broadcast %428 : vector<1x32xf32> to vector<16x32xf32>
    %430 = arith.addf %426, %429 : vector<16x32xf32>
    %c2_290 = arith.constant 2 : index
    %c0_291 = arith.constant 0 : index
    %c0_292 = arith.constant 0 : index
    %431 = vector.load %arg11[%c2_290, %c0_291, %c0_292] : memref<4x16x32xf32, #tpu.memory_space<vmem>>, vector<1x16x32xf32>
    %432 = vector.shape_cast %431 : vector<1x16x32xf32> to vector<16x32xf32>
    %433 = vector.shape_cast %430 : vector<16x32xf32> to vector<1x16x32xf32>
    tpu.vector_store %arg11[%c2_290, %c0_291, %c0_292], %433 {strides = array<i32>} : memref<4x16x32xf32, #tpu.memory_space<vmem>>, vector<1x16x32xf32>,
    %c3_293 = arith.constant 3 : index
    %c0_294 = arith.constant 0 : index
    %c0_295 = arith.constant 0 : index
    %434 = vector.load %arg4[%c3_293, %c0_294, %c0_295] : memref<4x32x32xf32, #tpu.memory_space<vmem>>, vector<1x32x32xf32>
    %435 = vector.shape_cast %434 : vector<1x32x32xf32> to vector<32x32xf32>
    %cst_296 = arith.constant dense<0.000000e+00> : vector<16x32xf32>
    %436 = tpu.matmul %403, %435, %cst_296 {dimension_numbers = #tpu.dot_dimension_numbers<[1], [0], [0], [1], [0, 0, 1, 1], [], []>} : vector<16x32xf32>, vector<32x32xf32>, vector<16x32xf32> -> vector<16x32xf32>
    %c3_297 = arith.constant 3 : index
    %c0_298 = arith.constant 0 : index
    %c0_299 = arith.constant 0 : index
    %437 = vector.load %arg6[%c3_297, %c0_298, %c0_299] : memref<4x1x32xf32, #tpu.memory_space<vmem>>, vector<1x1x32xf32>
    %438 = vector.shape_cast %437 : vector<1x1x32xf32> to vector<1x32xf32>
    %439 = vector.broadcast %438 : vector<1x32xf32> to vector<16x32xf32>
    %440 = arith.addf %436, %439 : vector<16x32xf32>
    %c3_300 = arith.constant 3 : index
    %c0_301 = arith.constant 0 : index
    %c0_302 = arith.constant 0 : index
    %441 = vector.load %arg11[%c3_300, %c0_301, %c0_302] : memref<4x16x32xf32, #tpu.memory_space<vmem>>, vector<1x16x32xf32>
    %442 = vector.shape_cast %441 : vector<1x16x32xf32> to vector<16x32xf32>
    %443 = vector.shape_cast %440 : vector<16x32xf32> to vector<1x16x32xf32>
    tpu.vector_store %arg11[%c3_300, %c0_301, %c0_302], %443 {strides = array<i32>} : memref<4x16x32xf32, #tpu.memory_space<vmem>>, vector<1x16x32xf32>,
    %c0_303 = arith.constant 0 : index
    %c0_304 = arith.constant 0 : index
    %c0_305 = arith.constant 0 : index
    %444 = vector.load %arg5[%c0_303, %c0_304, %c0_305] : memref<4x32x32xf32, #tpu.memory_space<vmem>>, vector<1x32x32xf32>
    %445 = vector.shape_cast %444 : vector<1x32x32xf32> to vector<32x32xf32>
    %c1_306 = arith.constant 1 : index
    %c0_307 = arith.constant 0 : index
    %c0_308 = arith.constant 0 : index
    %446 = vector.load %arg5[%c1_306, %c0_307, %c0_308] : memref<4x32x32xf32, #tpu.memory_space<vmem>>, vector<1x32x32xf32>
    %447 = vector.shape_cast %446 : vector<1x32x32xf32> to vector<32x32xf32>
    %c2_309 = arith.constant 2 : index
    %c0_310 = arith.constant 0 : index
    %c0_311 = arith.constant 0 : index
    %448 = vector.load %arg5[%c2_309, %c0_310, %c0_311] : memref<4x32x32xf32, #tpu.memory_space<vmem>>, vector<1x32x32xf32>
    %449 = vector.shape_cast %448 : vector<1x32x32xf32> to vector<32x32xf32>
    %c3_312 = arith.constant 3 : index
    %c0_313 = arith.constant 0 : index
    %c0_314 = arith.constant 0 : index
    %450 = vector.load %arg5[%c3_312, %c0_313, %c0_314] : memref<4x32x32xf32, #tpu.memory_space<vmem>>, vector<1x32x32xf32>
    %451 = vector.shape_cast %450 : vector<1x32x32xf32> to vector<32x32xf32>
    %cst_315 = arith.constant 0.000000e+00 : f32
    %452 = vector.broadcast %cst_315 : f32 to vector<2x32xf32>
    %cst_316 = arith.constant 0.000000e+00 : f32
    %453 = vector.broadcast %cst_316 : f32 to vector<2x32xf32>
    %c0_317 = arith.constant 0 : index
    %c0_318 = arith.constant 0 : index
    %c0_319 = arith.constant 0 : index
    %454 = vector.load %arg11[%c0_317, %c0_318, %c0_319] : memref<4x16x32xf32, #tpu.memory_space<vmem>>, vector<1x2x32xf32>
    %455 = vector.shape_cast %454 : vector<1x2x32xf32> to vector<2x32xf32>
    %cst_320 = arith.constant dense<0.000000e+00> : vector<2x32xf32>
    %456 = tpu.matmul %452, %445, %cst_320 {dimension_numbers = #tpu.dot_dimension_numbers<[1], [0], [0], [1], [0, 0, 1, 1], [], []>} : vector<2x32xf32>, vector<32x32xf32>, vector<2x32xf32> -> vector<2x32xf32>
    %457 = arith.addf %455, %456 : vector<2x32xf32>
    %c1_321 = arith.constant 1 : index
    %c0_322 = arith.constant 0 : index
    %c0_323 = arith.constant 0 : index
    %458 = vector.load %arg11[%c1_321, %c0_322, %c0_323] : memref<4x16x32xf32, #tpu.memory_space<vmem>>, vector<1x2x32xf32>
    %459 = vector.shape_cast %458 : vector<1x2x32xf32> to vector<2x32xf32>
    %cst_324 = arith.constant dense<0.000000e+00> : vector<2x32xf32>
    %460 = tpu.matmul %452, %447, %cst_324 {dimension_numbers = #tpu.dot_dimension_numbers<[1], [0], [0], [1], [0, 0, 1, 1], [], []>} : vector<2x32xf32>, vector<32x32xf32>, vector<2x32xf32> -> vector<2x32xf32>
    %461 = arith.addf %459, %460 : vector<2x32xf32>
    %c2_325 = arith.constant 2 : index
    %c0_326 = arith.constant 0 : index
    %c0_327 = arith.constant 0 : index
    %462 = vector.load %arg11[%c2_325, %c0_326, %c0_327] : memref<4x16x32xf32, #tpu.memory_space<vmem>>, vector<1x2x32xf32>
    %463 = vector.shape_cast %462 : vector<1x2x32xf32> to vector<2x32xf32>
    %cst_328 = arith.constant dense<0.000000e+00> : vector<2x32xf32>
    %464 = tpu.matmul %452, %449, %cst_328 {dimension_numbers = #tpu.dot_dimension_numbers<[1], [0], [0], [1], [0, 0, 1, 1], [], []>} : vector<2x32xf32>, vector<32x32xf32>, vector<2x32xf32> -> vector<2x32xf32>
    %465 = arith.addf %463, %464 : vector<2x32xf32>
    %c3_329 = arith.constant 3 : index
    %c0_330 = arith.constant 0 : index
    %c0_331 = arith.constant 0 : index
    %466 = vector.load %arg11[%c3_329, %c0_330, %c0_331] : memref<4x16x32xf32, #tpu.memory_space<vmem>>, vector<1x2x32xf32>
    %467 = vector.shape_cast %466 : vector<1x2x32xf32> to vector<2x32xf32>
    %cst_332 = arith.constant dense<0.000000e+00> : vector<2x32xf32>
    %468 = tpu.matmul %452, %451, %cst_332 {dimension_numbers = #tpu.dot_dimension_numbers<[1], [0], [0], [1], [0, 0, 1, 1], [], []>} : vector<2x32xf32>, vector<32x32xf32>, vector<2x32xf32> -> vector<2x32xf32>
    %469 = arith.addf %467, %468 : vector<2x32xf32>
    %cst_333 = arith.constant 5.000000e-01 : f32
    %470 = vector.broadcast %cst_333 : f32 to vector<2x32xf32>
    %471 = arith.mulf %470, %457 : vector<2x32xf32>
    %472 = math.tanh %471 : vector<2x32xf32>
    %cst_334 = arith.constant 5.000000e-01 : f32
    %473 = vector.broadcast %cst_334 : f32 to vector<2x32xf32>
    %474 = arith.mulf %473, %472 : vector<2x32xf32>
    %cst_335 = arith.constant 5.000000e-01 : f32
    %475 = vector.broadcast %cst_335 : f32 to vector<2x32xf32>
    %476 = arith.addf %474, %475 : vector<2x32xf32>
    %cst_336 = arith.constant 5.000000e-01 : f32
    %477 = vector.broadcast %cst_336 : f32 to vector<2x32xf32>
    %478 = arith.mulf %477, %461 : vector<2x32xf32>
    %479 = math.tanh %478 : vector<2x32xf32>
    %cst_337 = arith.constant 5.000000e-01 : f32
    %480 = vector.broadcast %cst_337 : f32 to vector<2x32xf32>
    %481 = arith.mulf %480, %479 : vector<2x32xf32>
    %cst_338 = arith.constant 5.000000e-01 : f32
    %482 = vector.broadcast %cst_338 : f32 to vector<2x32xf32>
    %483 = arith.addf %481, %482 : vector<2x32xf32>
    %484 = math.tanh %465 : vector<2x32xf32>
    %cst_339 = arith.constant 5.000000e-01 : f32
    %485 = vector.broadcast %cst_339 : f32 to vector<2x32xf32>
    %486 = arith.mulf %485, %469 : vector<2x32xf32>
    %487 = math.tanh %486 : vector<2x32xf32>
    %cst_340 = arith.constant 5.000000e-01 : f32
    %488 = vector.broadcast %cst_340 : f32 to vector<2x32xf32>
    %489 = arith.mulf %488, %487 : vector<2x32xf32>
    %cst_341 = arith.constant 5.000000e-01 : f32
    %490 = vector.broadcast %cst_341 : f32 to vector<2x32xf32>
    %491 = arith.addf %489, %490 : vector<2x32xf32>
    %492 = arith.mulf %483, %453 : vector<2x32xf32>
    %493 = arith.mulf %476, %484 : vector<2x32xf32>
    %494 = arith.addf %492, %493 : vector<2x32xf32>
    %495 = math.tanh %494 : vector<2x32xf32>
    %496 = arith.mulf %491, %495 : vector<2x32xf32>
    %c0_342 = arith.constant 0 : index
    %c2_343 = arith.constant 2 : index
    %c0_344 = arith.constant 0 : index
    %497 = vector.load %arg11[%c0_342, %c2_343, %c0_344] : memref<4x16x32xf32, #tpu.memory_space<vmem>>, vector<1x2x32xf32>
    %498 = vector.shape_cast %497 : vector<1x2x32xf32> to vector<2x32xf32>
    %cst_345 = arith.constant dense<0.000000e+00> : vector<2x32xf32>
    %499 = tpu.matmul %496, %445, %cst_345 {dimension_numbers = #tpu.dot_dimension_numbers<[1], [0], [0], [1], [0, 0, 1, 1], [], []>} : vector<2x32xf32>, vector<32x32xf32>, vector<2x32xf32> -> vector<2x32xf32>
    %500 = arith.addf %498, %499 : vector<2x32xf32>
    %c1_346 = arith.constant 1 : index
    %c2_347 = arith.constant 2 : index
    %c0_348 = arith.constant 0 : index
    %501 = vector.load %arg11[%c1_346, %c2_347, %c0_348] : memref<4x16x32xf32, #tpu.memory_space<vmem>>, vector<1x2x32xf32>
    %502 = vector.shape_cast %501 : vector<1x2x32xf32> to vector<2x32xf32>
    %cst_349 = arith.constant dense<0.000000e+00> : vector<2x32xf32>
    %503 = tpu.matmul %496, %447, %cst_349 {dimension_numbers = #tpu.dot_dimension_numbers<[1], [0], [0], [1], [0, 0, 1, 1], [], []>} : vector<2x32xf32>, vector<32x32xf32>, vector<2x32xf32> -> vector<2x32xf32>
    %504 = arith.addf %502, %503 : vector<2x32xf32>
    %c2_350 = arith.constant 2 : index
    %c2_351 = arith.constant 2 : index
    %c0_352 = arith.constant 0 : index
    %505 = vector.load %arg11[%c2_350, %c2_351, %c0_352] : memref<4x16x32xf32, #tpu.memory_space<vmem>>, vector<1x2x32xf32>
    %506 = vector.shape_cast %505 : vector<1x2x32xf32> to vector<2x32xf32>
    %cst_353 = arith.constant dense<0.000000e+00> : vector<2x32xf32>
    %507 = tpu.matmul %496, %449, %cst_353 {dimension_numbers = #tpu.dot_dimension_numbers<[1], [0], [0], [1], [0, 0, 1, 1], [], []>} : vector<2x32xf32>, vector<32x32xf32>, vector<2x32xf32> -> vector<2x32xf32>
    %508 = arith.addf %506, %507 : vector<2x32xf32>
    %c3_354 = arith.constant 3 : index
    %c2_355 = arith.constant 2 : index
    %c0_356 = arith.constant 0 : index
    %509 = vector.load %arg11[%c3_354, %c2_355, %c0_356] : memref<4x16x32xf32, #tpu.memory_space<vmem>>, vector<1x2x32xf32>
    %510 = vector.shape_cast %509 : vector<1x2x32xf32> to vector<2x32xf32>
    %cst_357 = arith.constant dense<0.000000e+00> : vector<2x32xf32>
    %511 = tpu.matmul %496, %451, %cst_357 {dimension_numbers = #tpu.dot_dimension_numbers<[1], [0], [0], [1], [0, 0, 1, 1], [], []>} : vector<2x32xf32>, vector<32x32xf32>, vector<2x32xf32> -> vector<2x32xf32>
    %512 = arith.addf %510, %511 : vector<2x32xf32>
    %cst_358 = arith.constant 5.000000e-01 : f32
    %513 = vector.broadcast %cst_358 : f32 to vector<2x32xf32>
    %514 = arith.mulf %513, %500 : vector<2x32xf32>
    %515 = math.tanh %514 : vector<2x32xf32>
    %cst_359 = arith.constant 5.000000e-01 : f32
    %516 = vector.broadcast %cst_359 : f32 to vector<2x32xf32>
    %517 = arith.mulf %516, %515 : vector<2x32xf32>
    %cst_360 = arith.constant 5.000000e-01 : f32
    %518 = vector.broadcast %cst_360 : f32 to vector<2x32xf32>
    %519 = arith.addf %517, %518 : vector<2x32xf32>
    %cst_361 = arith.constant 5.000000e-01 : f32
    %520 = vector.broadcast %cst_361 : f32 to vector<2x32xf32>
    %521 = arith.mulf %520, %504 : vector<2x32xf32>
    %522 = math.tanh %521 : vector<2x32xf32>
    %cst_362 = arith.constant 5.000000e-01 : f32
    %523 = vector.broadcast %cst_362 : f32 to vector<2x32xf32>
    %524 = arith.mulf %523, %522 : vector<2x32xf32>
    %cst_363 = arith.constant 5.000000e-01 : f32
    %525 = vector.broadcast %cst_363 : f32 to vector<2x32xf32>
    %526 = arith.addf %524, %525 : vector<2x32xf32>
    %527 = math.tanh %508 : vector<2x32xf32>
    %cst_364 = arith.constant 5.000000e-01 : f32
    %528 = vector.broadcast %cst_364 : f32 to vector<2x32xf32>
    %529 = arith.mulf %528, %512 : vector<2x32xf32>
    %530 = math.tanh %529 : vector<2x32xf32>
    %cst_365 = arith.constant 5.000000e-01 : f32
    %531 = vector.broadcast %cst_365 : f32 to vector<2x32xf32>
    %532 = arith.mulf %531, %530 : vector<2x32xf32>
    %cst_366 = arith.constant 5.000000e-01 : f32
    %533 = vector.broadcast %cst_366 : f32 to vector<2x32xf32>
    %534 = arith.addf %532, %533 : vector<2x32xf32>
    %535 = arith.mulf %526, %494 : vector<2x32xf32>
    %536 = arith.mulf %519, %527 : vector<2x32xf32>
    %537 = arith.addf %535, %536 : vector<2x32xf32>
    %538 = math.tanh %537 : vector<2x32xf32>
    %539 = arith.mulf %534, %538 : vector<2x32xf32>
    %c0_367 = arith.constant 0 : index
    %c4_368 = arith.constant 4 : index
    %c0_369 = arith.constant 0 : index
    %540 = vector.load %arg11[%c0_367, %c4_368, %c0_369] : memref<4x16x32xf32, #tpu.memory_space<vmem>>, vector<1x2x32xf32>
    %541 = vector.shape_cast %540 : vector<1x2x32xf32> to vector<2x32xf32>
    %cst_370 = arith.constant dense<0.000000e+00> : vector<2x32xf32>
    %542 = tpu.matmul %539, %445, %cst_370 {dimension_numbers = #tpu.dot_dimension_numbers<[1], [0], [0], [1], [0, 0, 1, 1], [], []>} : vector<2x32xf32>, vector<32x32xf32>, vector<2x32xf32> -> vector<2x32xf32>
    %543 = arith.addf %541, %542 : vector<2x32xf32>
    %c1_371 = arith.constant 1 : index
    %c4_372 = arith.constant 4 : index
    %c0_373 = arith.constant 0 : index
    %544 = vector.load %arg11[%c1_371, %c4_372, %c0_373] : memref<4x16x32xf32, #tpu.memory_space<vmem>>, vector<1x2x32xf32>
    %545 = vector.shape_cast %544 : vector<1x2x32xf32> to vector<2x32xf32>
    %cst_374 = arith.constant dense<0.000000e+00> : vector<2x32xf32>
    %546 = tpu.matmul %539, %447, %cst_374 {dimension_numbers = #tpu.dot_dimension_numbers<[1], [0], [0], [1], [0, 0, 1, 1], [], []>} : vector<2x32xf32>, vector<32x32xf32>, vector<2x32xf32> -> vector<2x32xf32>
    %547 = arith.addf %545, %546 : vector<2x32xf32>
    %c2_375 = arith.constant 2 : index
    %c4_376 = arith.constant 4 : index
    %c0_377 = arith.constant 0 : index
    %548 = vector.load %arg11[%c2_375, %c4_376, %c0_377] : memref<4x16x32xf32, #tpu.memory_space<vmem>>, vector<1x2x32xf32>
    %549 = vector.shape_cast %548 : vector<1x2x32xf32> to vector<2x32xf32>
    %cst_378 = arith.constant dense<0.000000e+00> : vector<2x32xf32>
    %550 = tpu.matmul %539, %449, %cst_378 {dimension_numbers = #tpu.dot_dimension_numbers<[1], [0], [0], [1], [0, 0, 1, 1], [], []>} : vector<2x32xf32>, vector<32x32xf32>, vector<2x32xf32> -> vector<2x32xf32>
    %551 = arith.addf %549, %550 : vector<2x32xf32>
    %c3_379 = arith.constant 3 : index
    %c4_380 = arith.constant 4 : index
    %c0_381 = arith.constant 0 : index
    %552 = vector.load %arg11[%c3_379, %c4_380, %c0_381] : memref<4x16x32xf32, #tpu.memory_space<vmem>>, vector<1x2x32xf32>
    %553 = vector.shape_cast %552 : vector<1x2x32xf32> to vector<2x32xf32>
    %cst_382 = arith.constant dense<0.000000e+00> : vector<2x32xf32>
    %554 = tpu.matmul %539, %451, %cst_382 {dimension_numbers = #tpu.dot_dimension_numbers<[1], [0], [0], [1], [0, 0, 1, 1], [], []>} : vector<2x32xf32>, vector<32x32xf32>, vector<2x32xf32> -> vector<2x32xf32>
    %555 = arith.addf %553, %554 : vector<2x32xf32>
    %cst_383 = arith.constant 5.000000e-01 : f32
    %556 = vector.broadcast %cst_383 : f32 to vector<2x32xf32>
    %557 = arith.mulf %556, %543 : vector<2x32xf32>
    %558 = math.tanh %557 : vector<2x32xf32>
    %cst_384 = arith.constant 5.000000e-01 : f32
    %559 = vector.broadcast %cst_384 : f32 to vector<2x32xf32>
    %560 = arith.mulf %559, %558 : vector<2x32xf32>
    %cst_385 = arith.constant 5.000000e-01 : f32
    %561 = vector.broadcast %cst_385 : f32 to vector<2x32xf32>
    %562 = arith.addf %560, %561 : vector<2x32xf32>
    %cst_386 = arith.constant 5.000000e-01 : f32
    %563 = vector.broadcast %cst_386 : f32 to vector<2x32xf32>
    %564 = arith.mulf %563, %547 : vector<2x32xf32>
    %565 = math.tanh %564 : vector<2x32xf32>
    %cst_387 = arith.constant 5.000000e-01 : f32
    %566 = vector.broadcast %cst_387 : f32 to vector<2x32xf32>
    %567 = arith.mulf %566, %565 : vector<2x32xf32>
    %cst_388 = arith.constant 5.000000e-01 : f32
    %568 = vector.broadcast %cst_388 : f32 to vector<2x32xf32>
    %569 = arith.addf %567, %568 : vector<2x32xf32>
    %570 = math.tanh %551 : vector<2x32xf32>
    %cst_389 = arith.constant 5.000000e-01 : f32
    %571 = vector.broadcast %cst_389 : f32 to vector<2x32xf32>
    %572 = arith.mulf %571, %555 : vector<2x32xf32>
    %573 = math.tanh %572 : vector<2x32xf32>
    %cst_390 = arith.constant 5.000000e-01 : f32
    %574 = vector.broadcast %cst_390 : f32 to vector<2x32xf32>
    %575 = arith.mulf %574, %573 : vector<2x32xf32>
    %cst_391 = arith.constant 5.000000e-01 : f32
    %576 = vector.broadcast %cst_391 : f32 to vector<2x32xf32>
    %577 = arith.addf %575, %576 : vector<2x32xf32>
    %578 = arith.mulf %569, %537 : vector<2x32xf32>
    %579 = arith.mulf %562, %570 : vector<2x32xf32>
    %580 = arith.addf %578, %579 : vector<2x32xf32>
    %581 = math.tanh %580 : vector<2x32xf32>
    %582 = arith.mulf %577, %581 : vector<2x32xf32>
    %c0_392 = arith.constant 0 : index
    %c6_393 = arith.constant 6 : index
    %c0_394 = arith.constant 0 : index
    %583 = vector.load %arg11[%c0_392, %c6_393, %c0_394] : memref<4x16x32xf32, #tpu.memory_space<vmem>>, vector<1x2x32xf32>
    %584 = vector.shape_cast %583 : vector<1x2x32xf32> to vector<2x32xf32>
    %cst_395 = arith.constant dense<0.000000e+00> : vector<2x32xf32>
    %585 = tpu.matmul %582, %445, %cst_395 {dimension_numbers = #tpu.dot_dimension_numbers<[1], [0], [0], [1], [0, 0, 1, 1], [], []>} : vector<2x32xf32>, vector<32x32xf32>, vector<2x32xf32> -> vector<2x32xf32>
    %586 = arith.addf %584, %585 : vector<2x32xf32>
    %c1_396 = arith.constant 1 : index
    %c6_397 = arith.constant 6 : index
    %c0_398 = arith.constant 0 : index
    %587 = vector.load %arg11[%c1_396, %c6_397, %c0_398] : memref<4x16x32xf32, #tpu.memory_space<vmem>>, vector<1x2x32xf32>
    %588 = vector.shape_cast %587 : vector<1x2x32xf32> to vector<2x32xf32>
    %cst_399 = arith.constant dense<0.000000e+00> : vector<2x32xf32>
    %589 = tpu.matmul %582, %447, %cst_399 {dimension_numbers = #tpu.dot_dimension_numbers<[1], [0], [0], [1], [0, 0, 1, 1], [], []>} : vector<2x32xf32>, vector<32x32xf32>, vector<2x32xf32> -> vector<2x32xf32>
    %590 = arith.addf %588, %589 : vector<2x32xf32>
    %c2_400 = arith.constant 2 : index
    %c6_401 = arith.constant 6 : index
    %c0_402 = arith.constant 0 : index
    %591 = vector.load %arg11[%c2_400, %c6_401, %c0_402] : memref<4x16x32xf32, #tpu.memory_space<vmem>>, vector<1x2x32xf32>
    %592 = vector.shape_cast %591 : vector<1x2x32xf32> to vector<2x32xf32>
    %cst_403 = arith.constant dense<0.000000e+00> : vector<2x32xf32>
    %593 = tpu.matmul %582, %449, %cst_403 {dimension_numbers = #tpu.dot_dimension_numbers<[1], [0], [0], [1], [0, 0, 1, 1], [], []>} : vector<2x32xf32>, vector<32x32xf32>, vector<2x32xf32> -> vector<2x32xf32>
    %594 = arith.addf %592, %593 : vector<2x32xf32>
    %c3_404 = arith.constant 3 : index
    %c6_405 = arith.constant 6 : index
    %c0_406 = arith.constant 0 : index
    %595 = vector.load %arg11[%c3_404, %c6_405, %c0_406] : memref<4x16x32xf32, #tpu.memory_space<vmem>>, vector<1x2x32xf32>
    %596 = vector.shape_cast %595 : vector<1x2x32xf32> to vector<2x32xf32>
    %cst_407 = arith.constant dense<0.000000e+00> : vector<2x32xf32>
    %597 = tpu.matmul %582, %451, %cst_407 {dimension_numbers = #tpu.dot_dimension_numbers<[1], [0], [0], [1], [0, 0, 1, 1], [], []>} : vector<2x32xf32>, vector<32x32xf32>, vector<2x32xf32> -> vector<2x32xf32>
    %598 = arith.addf %596, %597 : vector<2x32xf32>
    %cst_408 = arith.constant 5.000000e-01 : f32
    %599 = vector.broadcast %cst_408 : f32 to vector<2x32xf32>
    %600 = arith.mulf %599, %586 : vector<2x32xf32>
    %601 = math.tanh %600 : vector<2x32xf32>
    %cst_409 = arith.constant 5.000000e-01 : f32
    %602 = vector.broadcast %cst_409 : f32 to vector<2x32xf32>
    %603 = arith.mulf %602, %601 : vector<2x32xf32>
    %cst_410 = arith.constant 5.000000e-01 : f32
    %604 = vector.broadcast %cst_410 : f32 to vector<2x32xf32>
    %605 = arith.addf %603, %604 : vector<2x32xf32>
    %cst_411 = arith.constant 5.000000e-01 : f32
    %606 = vector.broadcast %cst_411 : f32 to vector<2x32xf32>
    %607 = arith.mulf %606, %590 : vector<2x32xf32>
    %608 = math.tanh %607 : vector<2x32xf32>
    %cst_412 = arith.constant 5.000000e-01 : f32
    %609 = vector.broadcast %cst_412 : f32 to vector<2x32xf32>
    %610 = arith.mulf %609, %608 : vector<2x32xf32>
    %cst_413 = arith.constant 5.000000e-01 : f32
    %611 = vector.broadcast %cst_413 : f32 to vector<2x32xf32>
    %612 = arith.addf %610, %611 : vector<2x32xf32>
    %613 = math.tanh %594 : vector<2x32xf32>
    %cst_414 = arith.constant 5.000000e-01 : f32
    %614 = vector.broadcast %cst_414 : f32 to vector<2x32xf32>
    %615 = arith.mulf %614, %598 : vector<2x32xf32>
    %616 = math.tanh %615 : vector<2x32xf32>
    %cst_415 = arith.constant 5.000000e-01 : f32
    %617 = vector.broadcast %cst_415 : f32 to vector<2x32xf32>
    %618 = arith.mulf %617, %616 : vector<2x32xf32>
    %cst_416 = arith.constant 5.000000e-01 : f32
    %619 = vector.broadcast %cst_416 : f32 to vector<2x32xf32>
    %620 = arith.addf %618, %619 : vector<2x32xf32>
    %621 = arith.mulf %612, %580 : vector<2x32xf32>
    %622 = arith.mulf %605, %613 : vector<2x32xf32>
    %623 = arith.addf %621, %622 : vector<2x32xf32>
    %624 = math.tanh %623 : vector<2x32xf32>
    %625 = arith.mulf %620, %624 : vector<2x32xf32>
    %c0_417 = arith.constant 0 : index
    %c8_418 = arith.constant 8 : index
    %c0_419 = arith.constant 0 : index
    %626 = vector.load %arg11[%c0_417, %c8_418, %c0_419] : memref<4x16x32xf32, #tpu.memory_space<vmem>>, vector<1x2x32xf32>
    %627 = vector.shape_cast %626 : vector<1x2x32xf32> to vector<2x32xf32>
    %cst_420 = arith.constant dense<0.000000e+00> : vector<2x32xf32>
    %628 = tpu.matmul %625, %445, %cst_420 {dimension_numbers = #tpu.dot_dimension_numbers<[1], [0], [0], [1], [0, 0, 1, 1], [], []>} : vector<2x32xf32>, vector<32x32xf32>, vector<2x32xf32> -> vector<2x32xf32>
    %629 = arith.addf %627, %628 : vector<2x32xf32>
    %c1_421 = arith.constant 1 : index
    %c8_422 = arith.constant 8 : index
    %c0_423 = arith.constant 0 : index
    %630 = vector.load %arg11[%c1_421, %c8_422, %c0_423] : memref<4x16x32xf32, #tpu.memory_space<vmem>>, vector<1x2x32xf32>
    %631 = vector.shape_cast %630 : vector<1x2x32xf32> to vector<2x32xf32>
    %cst_424 = arith.constant dense<0.000000e+00> : vector<2x32xf32>
    %632 = tpu.matmul %625, %447, %cst_424 {dimension_numbers = #tpu.dot_dimension_numbers<[1], [0], [0], [1], [0, 0, 1, 1], [], []>} : vector<2x32xf32>, vector<32x32xf32>, vector<2x32xf32> -> vector<2x32xf32>
    %633 = arith.addf %631, %632 : vector<2x32xf32>
    %c2_425 = arith.constant 2 : index
    %c8_426 = arith.constant 8 : index
    %c0_427 = arith.constant 0 : index
    %634 = vector.load %arg11[%c2_425, %c8_426, %c0_427] : memref<4x16x32xf32, #tpu.memory_space<vmem>>, vector<1x2x32xf32>
    %635 = vector.shape_cast %634 : vector<1x2x32xf32> to vector<2x32xf32>
    %cst_428 = arith.constant dense<0.000000e+00> : vector<2x32xf32>
    %636 = tpu.matmul %625, %449, %cst_428 {dimension_numbers = #tpu.dot_dimension_numbers<[1], [0], [0], [1], [0, 0, 1, 1], [], []>} : vector<2x32xf32>, vector<32x32xf32>, vector<2x32xf32> -> vector<2x32xf32>
    %637 = arith.addf %635, %636 : vector<2x32xf32>
    %c3_429 = arith.constant 3 : index
    %c8_430 = arith.constant 8 : index
    %c0_431 = arith.constant 0 : index
    %638 = vector.load %arg11[%c3_429, %c8_430, %c0_431] : memref<4x16x32xf32, #tpu.memory_space<vmem>>, vector<1x2x32xf32>
    %639 = vector.shape_cast %638 : vector<1x2x32xf32> to vector<2x32xf32>
    %cst_432 = arith.constant dense<0.000000e+00> : vector<2x32xf32>
    %640 = tpu.matmul %625, %451, %cst_432 {dimension_numbers = #tpu.dot_dimension_numbers<[1], [0], [0], [1], [0, 0, 1, 1], [], []>} : vector<2x32xf32>, vector<32x32xf32>, vector<2x32xf32> -> vector<2x32xf32>
    %641 = arith.addf %639, %640 : vector<2x32xf32>
    %cst_433 = arith.constant 5.000000e-01 : f32
    %642 = vector.broadcast %cst_433 : f32 to vector<2x32xf32>
    %643 = arith.mulf %642, %629 : vector<2x32xf32>
    %644 = math.tanh %643 : vector<2x32xf32>
    %cst_434 = arith.constant 5.000000e-01 : f32
    %645 = vector.broadcast %cst_434 : f32 to vector<2x32xf32>
    %646 = arith.mulf %645, %644 : vector<2x32xf32>
    %cst_435 = arith.constant 5.000000e-01 : f32
    %647 = vector.broadcast %cst_435 : f32 to vector<2x32xf32>
    %648 = arith.addf %646, %647 : vector<2x32xf32>
    %cst_436 = arith.constant 5.000000e-01 : f32
    %649 = vector.broadcast %cst_436 : f32 to vector<2x32xf32>
    %650 = arith.mulf %649, %633 : vector<2x32xf32>
    %651 = math.tanh %650 : vector<2x32xf32>
    %cst_437 = arith.constant 5.000000e-01 : f32
    %652 = vector.broadcast %cst_437 : f32 to vector<2x32xf32>
    %653 = arith.mulf %652, %651 : vector<2x32xf32>
    %cst_438 = arith.constant 5.000000e-01 : f32
    %654 = vector.broadcast %cst_438 : f32 to vector<2x32xf32>
    %655 = arith.addf %653, %654 : vector<2x32xf32>
    %656 = math.tanh %637 : vector<2x32xf32>
    %cst_439 = arith.constant 5.000000e-01 : f32
    %657 = vector.broadcast %cst_439 : f32 to vector<2x32xf32>
    %658 = arith.mulf %657, %641 : vector<2x32xf32>
    %659 = math.tanh %658 : vector<2x32xf32>
    %cst_440 = arith.constant 5.000000e-01 : f32
    %660 = vector.broadcast %cst_440 : f32 to vector<2x32xf32>
    %661 = arith.mulf %660, %659 : vector<2x32xf32>
    %cst_441 = arith.constant 5.000000e-01 : f32
    %662 = vector.broadcast %cst_441 : f32 to vector<2x32xf32>
    %663 = arith.addf %661, %662 : vector<2x32xf32>
    %664 = arith.mulf %655, %623 : vector<2x32xf32>
    %665 = arith.mulf %648, %656 : vector<2x32xf32>
    %666 = arith.addf %664, %665 : vector<2x32xf32>
    %667 = math.tanh %666 : vector<2x32xf32>
    %668 = arith.mulf %663, %667 : vector<2x32xf32>
    %c0_442 = arith.constant 0 : index
    %c10_443 = arith.constant 10 : index
    %c0_444 = arith.constant 0 : index
    %669 = vector.load %arg11[%c0_442, %c10_443, %c0_444] : memref<4x16x32xf32, #tpu.memory_space<vmem>>, vector<1x2x32xf32>
    %670 = vector.shape_cast %669 : vector<1x2x32xf32> to vector<2x32xf32>
    %cst_445 = arith.constant dense<0.000000e+00> : vector<2x32xf32>
    %671 = tpu.matmul %668, %445, %cst_445 {dimension_numbers = #tpu.dot_dimension_numbers<[1], [0], [0], [1], [0, 0, 1, 1], [], []>} : vector<2x32xf32>, vector<32x32xf32>, vector<2x32xf32> -> vector<2x32xf32>
    %672 = arith.addf %670, %671 : vector<2x32xf32>
    %c1_446 = arith.constant 1 : index
    %c10_447 = arith.constant 10 : index
    %c0_448 = arith.constant 0 : index
    %673 = vector.load %arg11[%c1_446, %c10_447, %c0_448] : memref<4x16x32xf32, #tpu.memory_space<vmem>>, vector<1x2x32xf32>
    %674 = vector.shape_cast %673 : vector<1x2x32xf32> to vector<2x32xf32>
    %cst_449 = arith.constant dense<0.000000e+00> : vector<2x32xf32>
    %675 = tpu.matmul %668, %447, %cst_449 {dimension_numbers = #tpu.dot_dimension_numbers<[1], [0], [0], [1], [0, 0, 1, 1], [], []>} : vector<2x32xf32>, vector<32x32xf32>, vector<2x32xf32> -> vector<2x32xf32>
    %676 = arith.addf %674, %675 : vector<2x32xf32>
    %c2_450 = arith.constant 2 : index
    %c10_451 = arith.constant 10 : index
    %c0_452 = arith.constant 0 : index
    %677 = vector.load %arg11[%c2_450, %c10_451, %c0_452] : memref<4x16x32xf32, #tpu.memory_space<vmem>>, vector<1x2x32xf32>
    %678 = vector.shape_cast %677 : vector<1x2x32xf32> to vector<2x32xf32>
    %cst_453 = arith.constant dense<0.000000e+00> : vector<2x32xf32>
    %679 = tpu.matmul %668, %449, %cst_453 {dimension_numbers = #tpu.dot_dimension_numbers<[1], [0], [0], [1], [0, 0, 1, 1], [], []>} : vector<2x32xf32>, vector<32x32xf32>, vector<2x32xf32> -> vector<2x32xf32>
    %680 = arith.addf %678, %679 : vector<2x32xf32>
    %c3_454 = arith.constant 3 : index
    %c10_455 = arith.constant 10 : index
    %c0_456 = arith.constant 0 : index
    %681 = vector.load %arg11[%c3_454, %c10_455, %c0_456] : memref<4x16x32xf32, #tpu.memory_space<vmem>>, vector<1x2x32xf32>
    %682 = vector.shape_cast %681 : vector<1x2x32xf32> to vector<2x32xf32>
    %cst_457 = arith.constant dense<0.000000e+00> : vector<2x32xf32>
    %683 = tpu.matmul %668, %451, %cst_457 {dimension_numbers = #tpu.dot_dimension_numbers<[1], [0], [0], [1], [0, 0, 1, 1], [], []>} : vector<2x32xf32>, vector<32x32xf32>, vector<2x32xf32> -> vector<2x32xf32>
    %684 = arith.addf %682, %683 : vector<2x32xf32>
    %cst_458 = arith.constant 5.000000e-01 : f32
    %685 = vector.broadcast %cst_458 : f32 to vector<2x32xf32>
    %686 = arith.mulf %685, %672 : vector<2x32xf32>
    %687 = math.tanh %686 : vector<2x32xf32>
    %cst_459 = arith.constant 5.000000e-01 : f32
    %688 = vector.broadcast %cst_459 : f32 to vector<2x32xf32>
    %689 = arith.mulf %688, %687 : vector<2x32xf32>
    %cst_460 = arith.constant 5.000000e-01 : f32
    %690 = vector.broadcast %cst_460 : f32 to vector<2x32xf32>
    %691 = arith.addf %689, %690 : vector<2x32xf32>
    %cst_461 = arith.constant 5.000000e-01 : f32
    %692 = vector.broadcast %cst_461 : f32 to vector<2x32xf32>
    %693 = arith.mulf %692, %676 : vector<2x32xf32>
    %694 = math.tanh %693 : vector<2x32xf32>
    %cst_462 = arith.constant 5.000000e-01 : f32
    %695 = vector.broadcast %cst_462 : f32 to vector<2x32xf32>
    %696 = arith.mulf %695, %694 : vector<2x32xf32>
    %cst_463 = arith.constant 5.000000e-01 : f32
    %697 = vector.broadcast %cst_463 : f32 to vector<2x32xf32>
    %698 = arith.addf %696, %697 : vector<2x32xf32>
    %699 = math.tanh %680 : vector<2x32xf32>
    %cst_464 = arith.constant 5.000000e-01 : f32
    %700 = vector.broadcast %cst_464 : f32 to vector<2x32xf32>
    %701 = arith.mulf %700, %684 : vector<2x32xf32>
    %702 = math.tanh %701 : vector<2x32xf32>
    %cst_465 = arith.constant 5.000000e-01 : f32
    %703 = vector.broadcast %cst_465 : f32 to vector<2x32xf32>
    %704 = arith.mulf %703, %702 : vector<2x32xf32>
    %cst_466 = arith.constant 5.000000e-01 : f32
    %705 = vector.broadcast %cst_466 : f32 to vector<2x32xf32>
    %706 = arith.addf %704, %705 : vector<2x32xf32>
    %707 = arith.mulf %698, %666 : vector<2x32xf32>
    %708 = arith.mulf %691, %699 : vector<2x32xf32>
    %709 = arith.addf %707, %708 : vector<2x32xf32>
    %710 = math.tanh %709 : vector<2x32xf32>
    %711 = arith.mulf %706, %710 : vector<2x32xf32>
    %c0_467 = arith.constant 0 : index
    %c12_468 = arith.constant 12 : index
    %c0_469 = arith.constant 0 : index
    %712 = vector.load %arg11[%c0_467, %c12_468, %c0_469] : memref<4x16x32xf32, #tpu.memory_space<vmem>>, vector<1x2x32xf32>
    %713 = vector.shape_cast %712 : vector<1x2x32xf32> to vector<2x32xf32>
    %cst_470 = arith.constant dense<0.000000e+00> : vector<2x32xf32>
    %714 = tpu.matmul %711, %445, %cst_470 {dimension_numbers = #tpu.dot_dimension_numbers<[1], [0], [0], [1], [0, 0, 1, 1], [], []>} : vector<2x32xf32>, vector<32x32xf32>, vector<2x32xf32> -> vector<2x32xf32>
    %715 = arith.addf %713, %714 : vector<2x32xf32>
    %c1_471 = arith.constant 1 : index
    %c12_472 = arith.constant 12 : index
    %c0_473 = arith.constant 0 : index
    %716 = vector.load %arg11[%c1_471, %c12_472, %c0_473] : memref<4x16x32xf32, #tpu.memory_space<vmem>>, vector<1x2x32xf32>
    %717 = vector.shape_cast %716 : vector<1x2x32xf32> to vector<2x32xf32>
    %cst_474 = arith.constant dense<0.000000e+00> : vector<2x32xf32>
    %718 = tpu.matmul %711, %447, %cst_474 {dimension_numbers = #tpu.dot_dimension_numbers<[1], [0], [0], [1], [0, 0, 1, 1], [], []>} : vector<2x32xf32>, vector<32x32xf32>, vector<2x32xf32> -> vector<2x32xf32>
    %719 = arith.addf %717, %718 : vector<2x32xf32>
    %c2_475 = arith.constant 2 : index
    %c12_476 = arith.constant 12 : index
    %c0_477 = arith.constant 0 : index
    %720 = vector.load %arg11[%c2_475, %c12_476, %c0_477] : memref<4x16x32xf32, #tpu.memory_space<vmem>>, vector<1x2x32xf32>
    %721 = vector.shape_cast %720 : vector<1x2x32xf32> to vector<2x32xf32>
    %cst_478 = arith.constant dense<0.000000e+00> : vector<2x32xf32>
    %722 = tpu.matmul %711, %449, %cst_478 {dimension_numbers = #tpu.dot_dimension_numbers<[1], [0], [0], [1], [0, 0, 1, 1], [], []>} : vector<2x32xf32>, vector<32x32xf32>, vector<2x32xf32> -> vector<2x32xf32>
    %723 = arith.addf %721, %722 : vector<2x32xf32>
    %c3_479 = arith.constant 3 : index
    %c12_480 = arith.constant 12 : index
    %c0_481 = arith.constant 0 : index
    %724 = vector.load %arg11[%c3_479, %c12_480, %c0_481] : memref<4x16x32xf32, #tpu.memory_space<vmem>>, vector<1x2x32xf32>
    %725 = vector.shape_cast %724 : vector<1x2x32xf32> to vector<2x32xf32>
    %cst_482 = arith.constant dense<0.000000e+00> : vector<2x32xf32>
    %726 = tpu.matmul %711, %451, %cst_482 {dimension_numbers = #tpu.dot_dimension_numbers<[1], [0], [0], [1], [0, 0, 1, 1], [], []>} : vector<2x32xf32>, vector<32x32xf32>, vector<2x32xf32> -> vector<2x32xf32>
    %727 = arith.addf %725, %726 : vector<2x32xf32>
    %cst_483 = arith.constant 5.000000e-01 : f32
    %728 = vector.broadcast %cst_483 : f32 to vector<2x32xf32>
    %729 = arith.mulf %728, %715 : vector<2x32xf32>
    %730 = math.tanh %729 : vector<2x32xf32>
    %cst_484 = arith.constant 5.000000e-01 : f32
    %731 = vector.broadcast %cst_484 : f32 to vector<2x32xf32>
    %732 = arith.mulf %731, %730 : vector<2x32xf32>
    %cst_485 = arith.constant 5.000000e-01 : f32
    %733 = vector.broadcast %cst_485 : f32 to vector<2x32xf32>
    %734 = arith.addf %732, %733 : vector<2x32xf32>
    %cst_486 = arith.constant 5.000000e-01 : f32
    %735 = vector.broadcast %cst_486 : f32 to vector<2x32xf32>
    %736 = arith.mulf %735, %719 : vector<2x32xf32>
    %737 = math.tanh %736 : vector<2x32xf32>
    %cst_487 = arith.constant 5.000000e-01 : f32
    %738 = vector.broadcast %cst_487 : f32 to vector<2x32xf32>
    %739 = arith.mulf %738, %737 : vector<2x32xf32>
    %cst_488 = arith.constant 5.000000e-01 : f32
    %740 = vector.broadcast %cst_488 : f32 to vector<2x32xf32>
    %741 = arith.addf %739, %740 : vector<2x32xf32>
    %742 = math.tanh %723 : vector<2x32xf32>
    %cst_489 = arith.constant 5.000000e-01 : f32
    %743 = vector.broadcast %cst_489 : f32 to vector<2x32xf32>
    %744 = arith.mulf %743, %727 : vector<2x32xf32>
    %745 = math.tanh %744 : vector<2x32xf32>
    %cst_490 = arith.constant 5.000000e-01 : f32
    %746 = vector.broadcast %cst_490 : f32 to vector<2x32xf32>
    %747 = arith.mulf %746, %745 : vector<2x32xf32>
    %cst_491 = arith.constant 5.000000e-01 : f32
    %748 = vector.broadcast %cst_491 : f32 to vector<2x32xf32>
    %749 = arith.addf %747, %748 : vector<2x32xf32>
    %750 = arith.mulf %741, %709 : vector<2x32xf32>
    %751 = arith.mulf %734, %742 : vector<2x32xf32>
    %752 = arith.addf %750, %751 : vector<2x32xf32>
    %753 = math.tanh %752 : vector<2x32xf32>
    %754 = arith.mulf %749, %753 : vector<2x32xf32>
    %c0_492 = arith.constant 0 : index
    %c14_493 = arith.constant 14 : index
    %c0_494 = arith.constant 0 : index
    %755 = vector.load %arg11[%c0_492, %c14_493, %c0_494] : memref<4x16x32xf32, #tpu.memory_space<vmem>>, vector<1x2x32xf32>
    %756 = vector.shape_cast %755 : vector<1x2x32xf32> to vector<2x32xf32>
    %cst_495 = arith.constant dense<0.000000e+00> : vector<2x32xf32>
    %757 = tpu.matmul %754, %445, %cst_495 {dimension_numbers = #tpu.dot_dimension_numbers<[1], [0], [0], [1], [0, 0, 1, 1], [], []>} : vector<2x32xf32>, vector<32x32xf32>, vector<2x32xf32> -> vector<2x32xf32>
    %758 = arith.addf %756, %757 : vector<2x32xf32>
    %c1_496 = arith.constant 1 : index
    %c14_497 = arith.constant 14 : index
    %c0_498 = arith.constant 0 : index
    %759 = vector.load %arg11[%c1_496, %c14_497, %c0_498] : memref<4x16x32xf32, #tpu.memory_space<vmem>>, vector<1x2x32xf32>
    %760 = vector.shape_cast %759 : vector<1x2x32xf32> to vector<2x32xf32>
    %cst_499 = arith.constant dense<0.000000e+00> : vector<2x32xf32>
    %761 = tpu.matmul %754, %447, %cst_499 {dimension_numbers = #tpu.dot_dimension_numbers<[1], [0], [0], [1], [0, 0, 1, 1], [], []>} : vector<2x32xf32>, vector<32x32xf32>, vector<2x32xf32> -> vector<2x32xf32>
    %762 = arith.addf %760, %761 : vector<2x32xf32>
    %c2_500 = arith.constant 2 : index
    %c14_501 = arith.constant 14 : index
    %c0_502 = arith.constant 0 : index
    %763 = vector.load %arg11[%c2_500, %c14_501, %c0_502] : memref<4x16x32xf32, #tpu.memory_space<vmem>>, vector<1x2x32xf32>
    %764 = vector.shape_cast %763 : vector<1x2x32xf32> to vector<2x32xf32>
    %cst_503 = arith.constant dense<0.000000e+00> : vector<2x32xf32>
    %765 = tpu.matmul %754, %449, %cst_503 {dimension_numbers = #tpu.dot_dimension_numbers<[1], [0], [0], [1], [0, 0, 1, 1], [], []>} : vector<2x32xf32>, vector<32x32xf32>, vector<2x32xf32> -> vector<2x32xf32>
    %766 = arith.addf %764, %765 : vector<2x32xf32>
    %c3_504 = arith.constant 3 : index
    %c14_505 = arith.constant 14 : index
    %c0_506 = arith.constant 0 : index
    %767 = vector.load %arg11[%c3_504, %c14_505, %c0_506] : memref<4x16x32xf32, #tpu.memory_space<vmem>>, vector<1x2x32xf32>
    %768 = vector.shape_cast %767 : vector<1x2x32xf32> to vector<2x32xf32>
    %cst_507 = arith.constant dense<0.000000e+00> : vector<2x32xf32>
    %769 = tpu.matmul %754, %451, %cst_507 {dimension_numbers = #tpu.dot_dimension_numbers<[1], [0], [0], [1], [0, 0, 1, 1], [], []>} : vector<2x32xf32>, vector<32x32xf32>, vector<2x32xf32> -> vector<2x32xf32>
    %770 = arith.addf %768, %769 : vector<2x32xf32>
    %cst_508 = arith.constant 5.000000e-01 : f32
    %771 = vector.broadcast %cst_508 : f32 to vector<2x32xf32>
    %772 = arith.mulf %771, %758 : vector<2x32xf32>
    %773 = math.tanh %772 : vector<2x32xf32>
    %cst_509 = arith.constant 5.000000e-01 : f32
    %774 = vector.broadcast %cst_509 : f32 to vector<2x32xf32>
    %775 = arith.mulf %774, %773 : vector<2x32xf32>
    %cst_510 = arith.constant 5.000000e-01 : f32
    %776 = vector.broadcast %cst_510 : f32 to vector<2x32xf32>
    %777 = arith.addf %775, %776 : vector<2x32xf32>
    %cst_511 = arith.constant 5.000000e-01 : f32
    %778 = vector.broadcast %cst_511 : f32 to vector<2x32xf32>
    %779 = arith.mulf %778, %762 : vector<2x32xf32>
    %780 = math.tanh %779 : vector<2x32xf32>
    %cst_512 = arith.constant 5.000000e-01 : f32
    %781 = vector.broadcast %cst_512 : f32 to vector<2x32xf32>
    %782 = arith.mulf %781, %780 : vector<2x32xf32>
    %cst_513 = arith.constant 5.000000e-01 : f32
    %783 = vector.broadcast %cst_513 : f32 to vector<2x32xf32>
    %784 = arith.addf %782, %783 : vector<2x32xf32>
    %785 = math.tanh %766 : vector<2x32xf32>
    %cst_514 = arith.constant 5.000000e-01 : f32
    %786 = vector.broadcast %cst_514 : f32 to vector<2x32xf32>
    %787 = arith.mulf %786, %770 : vector<2x32xf32>
    %788 = math.tanh %787 : vector<2x32xf32>
    %cst_515 = arith.constant 5.000000e-01 : f32
    %789 = vector.broadcast %cst_515 : f32 to vector<2x32xf32>
    %790 = arith.mulf %789, %788 : vector<2x32xf32>
    %cst_516 = arith.constant 5.000000e-01 : f32
    %791 = vector.broadcast %cst_516 : f32 to vector<2x32xf32>
    %792 = arith.addf %790, %791 : vector<2x32xf32>
    %793 = arith.mulf %784, %752 : vector<2x32xf32>
    %794 = arith.mulf %777, %785 : vector<2x32xf32>
    %795 = arith.addf %793, %794 : vector<2x32xf32>
    %796 = math.tanh %795 : vector<2x32xf32>
    %797 = arith.mulf %792, %796 : vector<2x32xf32>
    %c0_517 = arith.constant 0 : index
    %c0_518 = arith.constant 0 : index
    %798 = vector.load %arg7[%c0_517, %c0_518] : memref<32x4xf32, #tpu.memory_space<vmem>>, vector<32x4xf32>
    %cst_519 = arith.constant dense<0.000000e+00> : vector<2x4xf32>
    %799 = tpu.matmul %401, %798, %cst_519 {dimension_numbers = #tpu.dot_dimension_numbers<[1], [0], [0], [1], [0, 0, 1, 1], [], []>} : vector<2x32xf32>, vector<32x4xf32>, vector<2x4xf32> -> vector<2x4xf32>
    %c0_520 = arith.constant 0 : index
    %c0_521 = arith.constant 0 : index
    %800 = vector.load %arg8[%c0_520, %c0_521] : memref<32x4xf32, #tpu.memory_space<vmem>>, vector<32x4xf32>
    %cst_522 = arith.constant dense<0.000000e+00> : vector<2x4xf32>
    %801 = tpu.matmul %797, %800, %cst_522 {dimension_numbers = #tpu.dot_dimension_numbers<[1], [0], [0], [1], [0, 0, 1, 1], [], []>} : vector<2x32xf32>, vector<32x4xf32>, vector<2x4xf32> -> vector<2x4xf32>
    %802 = arith.addf %799, %801 : vector<2x4xf32>
    %c0_523 = arith.constant 0 : index
    %c0_524 = arith.constant 0 : index
    %803 = vector.load %arg9[%c0_523, %c0_524] : memref<1x4xf32, #tpu.memory_space<vmem>>, vector<1x4xf32>
    %804 = vector.broadcast %803 : vector<1x4xf32> to vector<2x4xf32>
    %805 = arith.addf %802, %804 : vector<2x4xf32>
    %cst_525 = arith.constant dense<0xFF800000> : vector<2xf32>
    %806 = vector.multi_reduction <maximumf>, %805, %cst_525 [1] : vector<2x4xf32> to vector<2xf32>
    %807 = vector.shape_cast %806 : vector<2xf32> to vector<2x1xf32>
    %808 = vector.broadcast %807 : vector<2x1xf32> to vector<2x4xf32>
    %809 = arith.subf %805, %808 : vector<2x4xf32>
    %810 = math.exp %809 : vector<2x4xf32>
    %cst_526 = arith.constant dense<0.000000e+00> : vector<2xf32>
    %811 = vector.multi_reduction <add>, %810, %cst_526 [1] : vector<2x4xf32> to vector<2xf32>
    %812 = vector.shape_cast %811 : vector<2xf32> to vector<2x1xf32>
    %813 = math.log %812 : vector<2x1xf32>
    %814 = vector.broadcast %813 : vector<2x1xf32> to vector<2x4xf32>
    %815 = arith.subf %809, %814 : vector<2x4xf32>
    %c0_527 = arith.constant 0 : index
    %c0_528 = arith.constant 0 : index
    %816 = vector.load %arg10[%c0_527, %c0_528] : memref<2x4xf32, #tpu.memory_space<vmem>>, vector<2x4xf32>
    tpu.vector_store %arg10[%c0_527, %c0_528], %815 {strides = array<i32>} : memref<2x4xf32, #tpu.memory_space<vmem>>, vector<2x4xf32>,
    return
  }
}

</mosaic_0001>

<bundles_post_ra>
// kernel: sentiment_rnn_forward.1
= control target key start
LH: loop header
LB: loop body
LE: loop exit
PB: predicated region body
PF: predicated region fallthrough
CT: control target
= control target key end

     0   :  { %15 = vsyncpa [#allocation5], 0  ;;  %s3259_s0 = inlined_call_operand.vmem [shape: f32[16,16], index: 0, kind: input, shape index: {}]   ;;  %s3260_s1 = inlined_call_operand.vmem [shape: f32[4,16,32], index: 1, kind: input, shape index: {}]   ;;  %s3261_s2 = inlined_call_operand.vmem [shape: f32[4,32,32], index: 2, kind: input, shape index: {}]   ;;  %s3262_s3 = inlined_call_operand.vmem [shape: f32[4,1,32], index: 3, kind: input, shape index: {}]   ;;  %s3263_s4 = inlined_call_operand.vmem [shape: f32[4,32,32], index: 4, kind: input, shape index: {}]   ;;  %s3264_s5 = inlined_call_operand.hbm [shape: f32[4,32,32], index: 5, kind: input, shape index: {}]   ;;  %s3265_s6 = inlined_call_operand.vmem [shape: f32[4,1,32], index: 6, kind: input, shape index: {}]   ;;  %s3266_s7 = inlined_call_operand.vmem [shape: f32[32,4], index: 7, kind: input, shape index: {}]   ;;  %s3267_s8 = inlined_call_operand.vmem [shape: f32[32,4], index: 8, kind: input, shape index: {}]   ;;  %s3268_s9 = inlined_call_operand.vmem [shape: f32[1,4], index: 9, kind: input, shape index: {}]   ;;  %s3269_s10 = inlined_call_operand.hbm [shape: f32[2,4], index: 10, kind: output, shape index: {}]  }
   0x1   :  { %16 = vsyncpa [#allocation6], 0  ;;  %s31_s15 = sshll.u32 %s3264_s5, 4  ;;  %s2559_s16 = smov [#allocation4]   ;;  %s32_s15 = int_to_ptr.hbm [resolvable:$true] %s31_s15 }
   0x2   :  { %s33_s17 = sshll.u32 %s2559_s16, 4  ;;  %s2560_s18 = smov 128   ;;  %s34_s17 = int_to_ptr.vmem [resolvable:$true] %s33_s17 }
   0x3   :  { %s2561_s19 = smov 8  }
   0x4   :  { %39 = dma.hbm_to_vmem [thread:$0]  %s32_s15, 2048, %s34_s17, [#allocation5], %s2560_s18, %s2560_s18, %s2561_s19  }
   0x5   :  { %2555 = dma.done.wait [#allocation5], 2048  }
   0x6   :  { %2556 = vsyncadd [#allocation5], 4294965248  ;;  %v55_v0 = vld [vmem:[%s3260_s1 + $0x8] sm:$0xff]  ;;  %v2222_v1 = vld [vmem:[%s3260_s1 + $0x18] sm:$0xff]  ;;  %vm60_vm0 = vcmask 130048   ;;  %v2562_v26 = vmov 0.0  }
   0x7   :  { %v2227_v2 = vld [vmem:[%s3260_s1 + $0x28] sm:$0xff]  ;;  %81 = vmatpush.msra.mxu0 %v55_v0  ;;  %115 = vmatpush.msra.mxu1 %v2222_v1  ;;  %v2232_v3 = vld [vmem:[%s3260_s1 + $0x38] sm:$0xff]  ;;  %v54_v4 = vld [vmem:[%s3260_s1] sm:$0xff]  ;;  %vm90_vm1 = vcmask 261120   ;;  %vm323_vm2 = vcmask 254976   ;;  %vm2188_vm3 = vcmask 25600  }
   0x8   :  { %v2221_v5 = vld [vmem:[%s3260_s1 + $0x10] sm:$0xff]  ;;  %149 = vmatpush.msra.mxu2 %v2227_v2  ;;  %183 = vmatpush.msra.mxu3 %v2232_v3  ;;  %v2226_v6 = vld [vmem:[%s3260_s1 + $0x20] sm:$0xff]  ;;  %v2652_v9 = vld [vmem:[%s3261_s2 + $0x18] sm:$0xff] }
   0x9   :  { %v2231_v7 = vld [vmem:[%s3260_s1 + $0x30] sm:$0xff]  ;;  %v52_v8 = vld [vmem:[%s3259_s0] sm:$0xff]  ;;  %82 = vmatpush.msra.mxu0 %v54_v4  ;;  %116 = vmatpush.msra.mxu1 %v2221_v5  ;;  %v2657_v10 = vld [vmem:[%s3261_s2 + $0x38] sm:$0xff] }
   0xa   :  { %150 = vmatpush.msra.mxu2 %v2226_v6  ;;  %184 = vmatpush.msra.mxu3 %v2231_v7  ;;  %v2664_v11 = vld [vmem:[%s3261_s2 + $0x58] sm:$0xff]  ;;  %v2676_v13 = vld [vmem:[%s3261_s2 + $0x10] sm:$0xff]  ;;  %v2693_v16 = vld [vmem:[%s3261_s2 + $0x8] sm:$0xff] }
   0xb   :  { %2219 = vmatmul.msk.f32.vlgmr.msra.gmra.mxu0 %vm60_vm0, %v52_v8  ;;  %2224 = vmatmul.msk.f32.vlgmr.msra.gmra.mxu1 %vm60_vm0, %v52_v8  ;;  %v2669_v12 = vld [vmem:[%s3261_s2 + $0x78] sm:$0xff]  ;;  %v2681_v14 = vld [vmem:[%s3261_s2 + $0x30] sm:$0xff]  ;;  %v53_v18 = vld [vmem:[%s3259_s0 + $0x8] sm:$0xff] }
   0xc   :  { %2229 = vmatmul.msk.f32.vlgmr.msra.gmra.mxu2 %vm60_vm0, %v52_v8  ;;  %2234 = vmatmul.msk.f32.vlgmr.msra.gmra.mxu3 %vm60_vm0, %v52_v8  ;;  %v2688_v15 = vld [vmem:[%s3261_s2 + $0x50] sm:$0xff]  ;;  %v2708_v19 = vld [vmem:[%s3261_s2 + $0x28] sm:$0xff]  ;;  %v2730_v22 = vld [vmem:[%s3261_s2] sm:$0xff] }
   0xd   :  { %230 = vmatpush.msrb.mxu0 %v2652_v9  ;;  %252 = vmatpush.msrb.mxu1 %v2657_v10  ;;  %v2698_v17 = vld [vmem:[%s3261_s2 + $0x70] sm:$0xff]  ;;  %v2713_v20 = vld [vmem:[%s3261_s2 + $0x48] sm:$0xff]  ;;  %v2735_v23 = vld [vmem:[%s3261_s2 + $0x20] sm:$0xff] }
   0xe   :  { %274 = vmatpush.msrb.mxu2 %v2664_v11  ;;  %296 = vmatpush.msrb.mxu3 %v2669_v12  ;;  %v2720_v21 = vld [vmem:[%s3261_s2 + $0x68] sm:$0xff]  ;;  %v2743_v24 = vld [vmem:[%s3261_s2 + $0x40] sm:$0xff] }
   0xf   :  { %231 = vmatpush.msrb.mxu0 %v2676_v13  ;;  %253 = vmatpush.msrb.mxu1 %v2681_v14  ;;  %v2748_v25 = vld [vmem:[%s3261_s2 + $0x60] sm:$0xff] }
  0x10   :  { %275 = vmatpush.msrb.mxu2 %v2688_v15  ;;  %297 = vmatpush.msrb.mxu3 %v2698_v17  ;;  %v2334_v27 = vld [vmem:[%s3262_s3] ss:$0 sm:$0xff]  ;;  %v2335_v28 = vld [vmem:[%s3262_s3 + $0x1] ss:$0 sm:$0xff]  ;;  %v2336_v33 = vld [vmem:[%s3262_s3 + $0x2] ss:$0 sm:$0xff] }
  0x11   :  { %232 = vmatpush.msrb.mxu0 %v2693_v16  ;;  %254 = vmatpush.msrb.mxu1 %v2708_v19  ;;  %v2337_v34 = vld [vmem:[%s3262_s3 + $0x3] ss:$0 sm:$0xff] }
  0x12   :  { %276 = vmatpush.msrb.mxu2 %v2713_v20  ;;  %298 = vmatpush.msrb.mxu3 %v2720_v21 }
  0x13   :  { %2220 = vmatmul.msk.f32.gmra.mxu0 %vm60_vm0, %v53_v18  ;;  %2225 = vmatmul.msk.f32.gmra.mxu1 %vm60_vm0, %v53_v18 }
  0x14   :  { %2230 = vmatmul.msk.f32.gmra.mxu2 %vm60_vm0, %v53_v18  ;;  %2235 = vmatmul.msk.f32.gmra.mxu3 %vm60_vm0, %v53_v18 }
  0x15   :  { %233 = vmatpush.msrb.mxu0 %v2730_v22  ;;  %255 = vmatpush.msrb.mxu1 %v2735_v23 }
  0x16   :  { %277 = vmatpush.msrb.mxu2 %v2743_v24  ;;  %299 = vmatpush.msrb.mxu3 %v2748_v25 }
  0x17   :  { %341 = vmatpush.msra.mxu0 %v2652_v9  ;;  %363 = vmatpush.msra.mxu1 %v2657_v10 }
  0x18   :  { %385 = vmatpush.msra.mxu2 %v2664_v11  ;;  %407 = vmatpush.msra.mxu3 %v2669_v12 }
  0x19   :  { %342 = vmatpush.msra.mxu0 %v2676_v13  ;;  %364 = vmatpush.msra.mxu1 %v2681_v14 }
  0x1a   :  { %386 = vmatpush.msra.mxu2 %v2688_v15  ;;  %408 = vmatpush.msra.mxu3 %v2698_v17 }
  0x1b   :  { %234 = vmatmul.f32.vlgmr.msrb.gmra.mxu0 %v2562_v26  ;;  %256 = vmatmul.f32.vlgmr.msrb.gmra.mxu1 %v2562_v26 }
  0x1c   :  { %278 = vmatmul.f32.vlgmr.msrb.gmra.mxu2 %v2562_v26  ;;  %300 = vmatmul.f32.vlgmr.msrb.gmra.mxu3 %v2562_v26 }
  0x1d   :  { %343 = vmatpush.msra.mxu0 %v2693_v16  ;;  %365 = vmatpush.msra.mxu1 %v2708_v19 }
  0x1e   :  { %387 = vmatpush.msra.mxu2 %v2713_v20  ;;  %409 = vmatpush.msra.mxu3 %v2720_v21 }
  0x1f   :  { %344 = vmatpush.msra.mxu0 %v2730_v22  ;;  %366 = vmatpush.msra.mxu1 %v2735_v23 }
  0x20   :  { %388 = vmatpush.msra.mxu2 %v2743_v24  ;;  %410 = vmatpush.msra.mxu3 %v2748_v25 }
  0x21   :  { %451 = vmatpush.msrb.mxu0 %v2652_v9  ;;  %473 = vmatpush.msrb.mxu1 %v2657_v10 }
  0x22   :  { %495 = vmatpush.msrb.mxu2 %v2664_v11  ;;  %517 = vmatpush.msrb.mxu3 %v2669_v12 }
  0x23   :  { %452 = vmatpush.msrb.mxu0 %v2676_v13  ;;  %474 = vmatpush.msrb.mxu1 %v2681_v14 }
  0x24   :  { %496 = vmatpush.msrb.mxu2 %v2688_v15  ;;  %518 = vmatpush.msrb.mxu3 %v2698_v17 }
  0x25   :  { %453 = vmatpush.msrb.mxu0 %v2693_v16  ;;  %475 = vmatpush.msrb.mxu1 %v2708_v19 }
  0x26   :  { %497 = vmatpush.msrb.mxu2 %v2713_v20  ;;  %519 = vmatpush.msrb.mxu3 %v2720_v21 }
  0x27   :  { %454 = vmatpush.msrb.mxu0 %v2730_v22  ;;  %476 = vmatpush.msrb.mxu1 %v2735_v23 }
  0x28   :  { %498 = vmatpush.msrb.mxu2 %v2743_v24  ;;  %520 = vmatpush.msrb.mxu3 %v2748_v25 }
  0x88   :  { %v84_v29 = vpop.f32.mrf.mxu0  ;;  %v118_v30 = vpop.f32.mrf.mxu1 }
  0x89   :  { %v85_v31 = vadd.f32 %v2334_v27, %v84_v29  ;;  %v119_v32 = vadd.f32 %v2335_v28, %v118_v30 }
  0x8b   :  { %91 = vst.msk [vmem:[#allocation2] sm:$0xff] %vm90_vm1, %v85_v31 }
  0x8c   :  { %125 = vst.msk [vmem:[#allocation2 + $0x10] sm:$0xff] %vm90_vm1, %v119_v32 }
  0x8f   :  { %v152_v35 = vpop.f32.mrf.mxu2  ;;  %v186_v36 = vpop.f32.mrf.mxu3 }
  0x90   :  { %v153_v37 = vadd.f32 %v2336_v33, %v152_v35  ;;  %v187_v38 = vadd.f32 %v2337_v34, %v186_v36  ;;  %v87_v39 = vpop.f32.mrf.mxu0  ;;  %v121_v40 = vpop.f32.mrf.mxu1 }
  0x91   :  { %v88_v41 = vadd.f32 %v2334_v27, %v87_v39  ;;  %v122_v42 = vadd.f32 %v2335_v28, %v121_v40 }
  0x92   :  { %159 = vst.msk [vmem:[#allocation2 + $0x20] sm:$0xff] %vm90_vm1, %v153_v37  ;;  %v214_v47 = vld [vmem:[#allocation2] sm:$0x3]  ;;  %v325_v30 = vld [vmem:[#allocation2 + $0x2] sm:$0x3] }
  0x93   :  { %193 = vst.msk [vmem:[#allocation2 + $0x30] sm:$0xff] %vm90_vm1, %v187_v38  ;;  %v239_v49 = vld [vmem:[#allocation2 + $0x10] sm:$0x3]  ;;  %v350_v32 = vld [vmem:[#allocation2 + $0x12] sm:$0x3] }
  0x94   :  { %92 = vst.msk [vmem:[#allocation2 + $0x8] sm:$0xff] %vm90_vm1, %v88_v41 }
  0x95   :  { %126 = vst.msk [vmem:[#allocation2 + $0x18] sm:$0xff] %vm90_vm1, %v122_v42 }
  0x97   :  { %v155_v43 = vpop.f32.mrf.mxu2  ;;  %v189_v44 = vpop.f32.mrf.mxu3 }
  0x98   :  { %v156_v45 = vadd.f32 %v2336_v33, %v155_v43  ;;  %v190_v46 = vadd.f32 %v2337_v34, %v189_v44  ;;  %v235_v48 = vpop.f32.mrf.mxu0  ;;  %v257_v50 = vpop.f32.mrf.mxu1 }
  0x99   :  { %v238_v51 = vadd.f32 %v235_v48, %v214_v47  ;;  %v260_v52 = vadd.f32 %v257_v50, %v239_v49  ;;  %v261_v56 = vld [vmem:[#allocation2 + $0x20] sm:$0x3]  ;;  %v372_v38 = vld [vmem:[#allocation2 + $0x22] sm:$0x3] }
  0x9a   :  { %160 = vst.msk [vmem:[#allocation2 + $0x28] sm:$0xff] %vm90_vm1, %v156_v45  ;;  %v283_v55 = vld [vmem:[#allocation2 + $0x30] sm:$0x3]  ;;  %v394_v40 = vld [vmem:[#allocation2 + $0x32] sm:$0x3] }
  0x9b   :  { %194 = vst.msk [vmem:[#allocation2 + $0x38] sm:$0xff] %vm90_vm1, %v190_v46  ;;  %v305_v53 = vmul.f32 0.5, %v238_v51  ;;  %v309_v54 = vmul.f32 0.5, %v260_v52 }
  0x9d   :  { %2343 = vtanh.f32 %v305_v53 }
  0x9e   :  { %2345 = vtanh.f32 %v309_v54 }
  0x9f   :  { %v279_v57 = vpop.f32.mrf.mxu2  ;;  %v301_v58 = vpop.f32.mrf.mxu3 }
  0xa0   :  { %v282_v59 = vadd.f32 %v279_v57, %v261_v56  ;;  %v304_v60 = vadd.f32 %v301_v58, %v283_v55 }
  0xa2   :  { %2347 = vtanh.f32 %v282_v59  ;;  %v314_v61 = vmul.f32 0.5, %v304_v60  ;;  %v435_v60 = vld [vmem:[#allocation2 + $0x4] sm:$0x3] }
  0xa3   :  { %v2344_v62 = vpop.eup %2343 }
  0xa4   :  { %v2346_v63 = vpop.eup %2345  ;;  %v307_v0 = vmul.f32 0.5, %v2344_v62  ;;  %2349 = vtanh.f32 %v314_v61  ;;  %v460_v62 = vld [vmem:[#allocation2 + $0x14] sm:$0x3] }
  0xa5   :  { %v311_v1 = vmul.f32 0.5, %v2346_v63 }
  0xa6   :  { %v308_v2 = vadd.f32 0.5, %v307_v0 }
  0xa7   :  { %v312_v3 = vadd.f32 0.5, %v311_v1 }
  0xa8   :  { %v2348_v4 = vpop.eup %2347 }
  0xa9   :  { %v318_v5 = vmul.f32 0.0, %v312_v3  ;;  %v319_v6 = vmul.f32 %v2348_v4, %v308_v2  ;;  %v482_v4 = vld [vmem:[#allocation2 + $0x24] sm:$0x3] }
  0xaa   :  { %v2350_v7 = vpop.eup %2349 }
  0xab   :  { %v320_v8 = vadd.f32 %v319_v6, %v318_v5  ;;  %v316_v18 = vmul.f32 0.5, %v2350_v7  ;;  %v504_v6 = vld [vmem:[#allocation2 + $0x34] sm:$0x3] }
  0xad   :  { %2351 = vtanh.f32 %v320_v8  ;;  %v317_v27 = vadd.f32 0.5, %v316_v18 }
  0xb3   :  { %v2352_v28 = vpop.eup %2351 }
  0xb4   :  { %v322_v29 = vmul.f32 %v2352_v28, %v317_v27 }
  0xb6   :  { %324 = vst.msk [vmem:[#allocation3] sm:$0x3] %vm323_vm2, %v322_v29  ;;  %2248 = vmatmul.msk.f32.vlgmr.msra.gmra.mxu0 %vm90_vm1, %v322_v29  ;;  %2249 = vmatmul.msk.f32.vlgmr.msra.gmra.mxu1 %vm90_vm1, %v322_v29 }
  0xb7   :  { %2250 = vmatmul.msk.f32.vlgmr.msra.gmra.mxu2 %vm90_vm1, %v322_v29  ;;  %2251 = vmatmul.msk.f32.vlgmr.msra.gmra.mxu3 %vm90_vm1, %v322_v29 }
  0xb8   :  { %561 = vmatpush.msra.mxu0 %v2652_v9  ;;  %583 = vmatpush.msra.mxu1 %v2657_v10 }
  0xb9   :  { %605 = vmatpush.msra.mxu2 %v2664_v11  ;;  %627 = vmatpush.msra.mxu3 %v2669_v12 }
  0xba   :  { %562 = vmatpush.msra.mxu0 %v2676_v13  ;;  %584 = vmatpush.msra.mxu1 %v2681_v14 }
  0xbb   :  { %606 = vmatpush.msra.mxu2 %v2688_v15  ;;  %628 = vmatpush.msra.mxu3 %v2698_v17 }
  0xbc   :  { %563 = vmatpush.msra.mxu0 %v2693_v16  ;;  %585 = vmatpush.msra.mxu1 %v2708_v19 }
  0xbd   :  { %607 = vmatpush.msra.mxu2 %v2713_v20  ;;  %629 = vmatpush.msra.mxu3 %v2720_v21 }
  0xbe   :  { %564 = vmatpush.msra.mxu0 %v2730_v22  ;;  %586 = vmatpush.msra.mxu1 %v2735_v23 }
  0xbf   :  { %608 = vmatpush.msra.mxu2 %v2743_v24  ;;  %630 = vmatpush.msra.mxu3 %v2748_v25 }
 0x133   :  { %v346_v31 = vpop.f32.mrf.mxu0  ;;  %v368_v33 = vpop.f32.mrf.mxu1 }
 0x134   :  { %v349_v34 = vadd.f32 %v346_v31, %v325_v30  ;;  %v371_v35 = vadd.f32 %v368_v33, %v350_v32 }
 0x136   :  { %v416_v36 = vmul.f32 0.5, %v349_v34  ;;  %v420_v37 = vmul.f32 0.5, %v371_v35 }
 0x138   :  { %2353 = vtanh.f32 %v416_v36 }
 0x139   :  { %2355 = vtanh.f32 %v420_v37 }
 0x13a   :  { %v390_v39 = vpop.f32.mrf.mxu2  ;;  %v412_v41 = vpop.f32.mrf.mxu3 }
 0x13b   :  { %v393_v42 = vadd.f32 %v390_v39, %v372_v38  ;;  %v415_v43 = vadd.f32 %v412_v41, %v394_v40 }
 0x13d   :  { %2357 = vtanh.f32 %v393_v42  ;;  %v425_v44 = vmul.f32 0.5, %v415_v43  ;;  %v545_v43 = vld [vmem:[#allocation2 + $0x6] sm:$0x3] }
 0x13e   :  { %v2354_v45 = vpop.eup %2353 }
 0x13f   :  { %v2356_v46 = vpop.eup %2355  ;;  %v418_v47 = vmul.f32 0.5, %v2354_v45  ;;  %2359 = vtanh.f32 %v425_v44  ;;  %v570_v45 = vld [vmem:[#allocation2 + $0x16] sm:$0x3] }
 0x140   :  { %v422_v48 = vmul.f32 0.5, %v2356_v46 }
 0x141   :  { %v419_v49 = vadd.f32 0.5, %v418_v47 }
 0x142   :  { %v423_v50 = vadd.f32 0.5, %v422_v48 }
 0x143   :  { %v2358_v51 = vpop.eup %2357 }
 0x144   :  { %v429_v52 = vmul.f32 %v423_v50, %v320_v8  ;;  %v430_v53 = vmul.f32 %v2358_v51, %v419_v49  ;;  %v592_v51 = vld [vmem:[#allocation2 + $0x26] sm:$0x3] }
 0x145   :  { %v2360_v54 = vpop.eup %2359 }
 0x146   :  { %v431_v55 = vadd.f32 %v430_v53, %v429_v52  ;;  %v427_v56 = vmul.f32 0.5, %v2360_v54  ;;  %v614_v53 = vld [vmem:[#allocation2 + $0x36] sm:$0x3] }
 0x148   :  { %2361 = vtanh.f32 %v431_v55  ;;  %v428_v57 = vadd.f32 0.5, %v427_v56 }
 0x14e   :  { %v2362_v58 = vpop.eup %2361 }
 0x14f   :  { %v433_v59 = vmul.f32 %v2362_v58, %v428_v57 }
 0x151   :  { %434 = vst.msk [vmem:[#allocation3 + $0x2] sm:$0x3] %vm323_vm2, %v433_v59  ;;  %2252 = vmatmul.msk.f32.vlgmr.msrb.gmra.mxu0 %vm90_vm1, %v433_v59  ;;  %2253 = vmatmul.msk.f32.vlgmr.msrb.gmra.mxu1 %vm90_vm1, %v433_v59 }
 0x152   :  { %2254 = vmatmul.msk.f32.vlgmr.msrb.gmra.mxu2 %vm90_vm1, %v433_v59  ;;  %2255 = vmatmul.msk.f32.vlgmr.msrb.gmra.mxu3 %vm90_vm1, %v433_v59 }
 0x153   :  { %671 = vmatpush.msrb.mxu0 %v2652_v9  ;;  %693 = vmatpush.msrb.mxu1 %v2657_v10 }
 0x154   :  { %715 = vmatpush.msrb.mxu2 %v2664_v11  ;;  %737 = vmatpush.msrb.mxu3 %v2669_v12 }
 0x155   :  { %672 = vmatpush.msrb.mxu0 %v2676_v13  ;;  %694 = vmatpush.msrb.mxu1 %v2681_v14 }
 0x156   :  { %716 = vmatpush.msrb.mxu2 %v2688_v15  ;;  %738 = vmatpush.msrb.mxu3 %v2698_v17 }
 0x157   :  { %673 = vmatpush.msrb.mxu0 %v2693_v16  ;;  %695 = vmatpush.msrb.mxu1 %v2708_v19 }
 0x158   :  { %717 = vmatpush.msrb.mxu2 %v2713_v20  ;;  %739 = vmatpush.msrb.mxu3 %v2720_v21 }
 0x159   :  { %674 = vmatpush.msrb.mxu0 %v2730_v22  ;;  %696 = vmatpush.msrb.mxu1 %v2735_v23 }
 0x15a   :  { %718 = vmatpush.msrb.mxu2 %v2743_v24  ;;  %740 = vmatpush.msrb.mxu3 %v2748_v25 }
 0x1ce   :  { %v456_v61 = vpop.f32.mrf.mxu0  ;;  %v478_v63 = vpop.f32.mrf.mxu1 }
 0x1cf   :  { %v459_v0 = vadd.f32 %v456_v61, %v435_v60  ;;  %v481_v1 = vadd.f32 %v478_v63, %v460_v62 }
 0x1d1   :  { %v526_v2 = vmul.f32 0.5, %v459_v0  ;;  %v530_v3 = vmul.f32 0.5, %v481_v1 }
 0x1d3   :  { %2363 = vtanh.f32 %v526_v2 }
 0x1d4   :  { %2365 = vtanh.f32 %v530_v3 }
 0x1d5   :  { %v500_v5 = vpop.f32.mrf.mxu2  ;;  %v522_v7 = vpop.f32.mrf.mxu3 }
 0x1d6   :  { %v503_v8 = vadd.f32 %v500_v5, %v482_v4  ;;  %v525_v18 = vadd.f32 %v522_v7, %v504_v6 }
 0x1d8   :  { %2367 = vtanh.f32 %v503_v8  ;;  %v535_v27 = vmul.f32 0.5, %v525_v18  ;;  %v655_v18 = vld [vmem:[#allocation2 + $0x8] sm:$0x3] }
 0x1d9   :  { %v2364_v28 = vpop.eup %2363 }
 0x1da   :  { %v2366_v29 = vpop.eup %2365  ;;  %v528_v30 = vmul.f32 0.5, %v2364_v28  ;;  %2369 = vtanh.f32 %v535_v27  ;;  %v680_v28 = vld [vmem:[#allocation2 + $0x18] sm:$0x3] }
 0x1db   :  { %v532_v31 = vmul.f32 0.5, %v2366_v29 }
 0x1dc   :  { %v529_v32 = vadd.f32 0.5, %v528_v30 }
 0x1dd   :  { %v533_v33 = vadd.f32 0.5, %v532_v31 }
 0x1de   :  { %v2368_v34 = vpop.eup %2367 }
 0x1df   :  { %v539_v35 = vmul.f32 %v533_v33, %v431_v55  ;;  %v540_v36 = vmul.f32 %v2368_v34, %v529_v32  ;;  %v702_v34 = vld [vmem:[#allocation2 + $0x28] sm:$0x3] }
 0x1e0   :  { %v2370_v37 = vpop.eup %2369 }
 0x1e1   :  { %v541_v38 = vadd.f32 %v540_v36, %v539_v35  ;;  %v537_v39 = vmul.f32 0.5, %v2370_v37  ;;  %v724_v36 = vld [vmem:[#allocation2 + $0x38] sm:$0x3] }
 0x1e3   :  { %2371 = vtanh.f32 %v541_v38  ;;  %v538_v40 = vadd.f32 0.5, %v537_v39 }
 0x1e9   :  { %v2372_v41 = vpop.eup %2371 }
 0x1ea   :  { %v543_v42 = vmul.f32 %v2372_v41, %v538_v40 }
 0x1ec   :  { %544 = vst.msk [vmem:[#allocation3 + $0x4] sm:$0x3] %vm323_vm2, %v543_v42  ;;  %2256 = vmatmul.msk.f32.vlgmr.msra.gmra.mxu0 %vm90_vm1, %v543_v42  ;;  %2257 = vmatmul.msk.f32.vlgmr.msra.gmra.mxu1 %vm90_vm1, %v543_v42 }
 0x1ed   :  { %2258 = vmatmul.msk.f32.vlgmr.msra.gmra.mxu2 %vm90_vm1, %v543_v42  ;;  %2259 = vmatmul.msk.f32.vlgmr.msra.gmra.mxu3 %vm90_vm1, %v543_v42 }
 0x1ee   :  { %781 = vmatpush.msra.mxu0 %v2652_v9  ;;  %803 = vmatpush.msra.mxu1 %v2657_v10 }
 0x1ef   :  { %825 = vmatpush.msra.mxu2 %v2664_v11  ;;  %847 = vmatpush.msra.mxu3 %v2669_v12 }
 0x1f0   :  { %782 = vmatpush.msra.mxu0 %v2676_v13  ;;  %804 = vmatpush.msra.mxu1 %v2681_v14 }
 0x1f1   :  { %826 = vmatpush.msra.mxu2 %v2688_v15  ;;  %848 = vmatpush.msra.mxu3 %v2698_v17 }
 0x1f2   :  { %783 = vmatpush.msra.mxu0 %v2693_v16  ;;  %805 = vmatpush.msra.mxu1 %v2708_v19 }
 0x1f3   :  { %827 = vmatpush.msra.mxu2 %v2713_v20  ;;  %849 = vmatpush.msra.mxu3 %v2720_v21 }
 0x1f4   :  { %784 = vmatpush.msra.mxu0 %v2730_v22  ;;  %806 = vmatpush.msra.mxu1 %v2735_v23 }
 0x1f5   :  { %828 = vmatpush.msra.mxu2 %v2743_v24  ;;  %850 = vmatpush.msra.mxu3 %v2748_v25 }
 0x269   :  { %v566_v44 = vpop.f32.mrf.mxu0  ;;  %v588_v46 = vpop.f32.mrf.mxu1 }
 0x26a   :  { %v569_v47 = vadd.f32 %v566_v44, %v545_v43  ;;  %v591_v48 = vadd.f32 %v588_v46, %v570_v45 }
 0x26c   :  { %v636_v49 = vmul.f32 0.5, %v569_v47  ;;  %v640_v50 = vmul.f32 0.5, %v591_v48 }
 0x26e   :  { %2373 = vtanh.f32 %v636_v49 }
 0x26f   :  { %2375 = vtanh.f32 %v640_v50 }
 0x270   :  { %v610_v52 = vpop.f32.mrf.mxu2  ;;  %v632_v54 = vpop.f32.mrf.mxu3 }
 0x271   :  { %v613_v55 = vadd.f32 %v610_v52, %v592_v51  ;;  %v635_v56 = vadd.f32 %v632_v54, %v614_v53 }
 0x273   :  { %2377 = vtanh.f32 %v613_v55  ;;  %v645_v57 = vmul.f32 0.5, %v635_v56 }
 0x274   :  { %v2374_v58 = vpop.eup %2373 }
 0x275   :  { %v2376_v59 = vpop.eup %2375  ;;  %v638_v60 = vmul.f32 0.5, %v2374_v58  ;;  %2379 = vtanh.f32 %v645_v57 }
 0x276   :  { %v642_v61 = vmul.f32 0.5, %v2376_v59 }
 0x277   :  { %v639_v62 = vadd.f32 0.5, %v638_v60 }
 0x278   :  { %v643_v63 = vadd.f32 0.5, %v642_v61 }
 0x279   :  { %v2378_v0 = vpop.eup %2377 }
 0x27a   :  { %v649_v1 = vmul.f32 %v643_v63, %v541_v38  ;;  %v650_v2 = vmul.f32 %v2378_v0, %v639_v62 }
 0x27b   :  { %v2380_v3 = vpop.eup %2379 }
 0x27c   :  { %v651_v4 = vadd.f32 %v650_v2, %v649_v1  ;;  %v647_v5 = vmul.f32 0.5, %v2380_v3 }
 0x27e   :  { %2381 = vtanh.f32 %v651_v4  ;;  %v648_v6 = vadd.f32 0.5, %v647_v5 }
 0x284   :  { %v2382_v7 = vpop.eup %2381 }
 0x285   :  { %v653_v8 = vmul.f32 %v2382_v7, %v648_v6  ;;  %v875_v6 = vld [vmem:[#allocation2 + $0xc] sm:$0x3]  ;;  %v900_v7 = vld [vmem:[#allocation2 + $0x1c] sm:$0x3] }
 0x287   :  { %654 = vst.msk [vmem:[#allocation3 + $0x6] sm:$0x3] %vm323_vm2, %v653_v8  ;;  %2260 = vmatmul.msk.f32.vlgmr.msrb.gmra.mxu0 %vm90_vm1, %v653_v8  ;;  %2261 = vmatmul.msk.f32.vlgmr.msrb.gmra.mxu1 %vm90_vm1, %v653_v8 }
 0x288   :  { %2262 = vmatmul.msk.f32.vlgmr.msrb.gmra.mxu2 %vm90_vm1, %v653_v8  ;;  %2263 = vmatmul.msk.f32.vlgmr.msrb.gmra.mxu3 %vm90_vm1, %v653_v8  ;;  %v1100_v8 = vld [vmem:[%s3263_s4 + $0x18] sm:$0xff] }
 0x289   :  { %891 = vmatpush.msrb.mxu0 %v2652_v9  ;;  %913 = vmatpush.msrb.mxu1 %v2657_v10 }
 0x28a   :  { %935 = vmatpush.msrb.mxu2 %v2664_v11  ;;  %957 = vmatpush.msrb.mxu3 %v2669_v12 }
 0x28b   :  { %892 = vmatpush.msrb.mxu0 %v2676_v13  ;;  %914 = vmatpush.msrb.mxu1 %v2681_v14 }
 0x28c   :  { %936 = vmatpush.msrb.mxu2 %v2688_v15  ;;  %958 = vmatpush.msrb.mxu3 %v2698_v17 }
 0x28d   :  { %893 = vmatpush.msrb.mxu0 %v2693_v16  ;;  %915 = vmatpush.msrb.mxu1 %v2708_v19 }
 0x28e   :  { %937 = vmatpush.msrb.mxu2 %v2713_v20  ;;  %959 = vmatpush.msrb.mxu3 %v2720_v21 }
 0x28f   :  { %894 = vmatpush.msrb.mxu0 %v2730_v22  ;;  %916 = vmatpush.msrb.mxu1 %v2735_v23 }
 0x290   :  { %938 = vmatpush.msrb.mxu2 %v2743_v24  ;;  %960 = vmatpush.msrb.mxu3 %v2748_v25 }
 0x304   :  { %v676_v27 = vpop.f32.mrf.mxu0  ;;  %v698_v29 = vpop.f32.mrf.mxu1 }
 0x305   :  { %v679_v30 = vadd.f32 %v676_v27, %v655_v18  ;;  %v701_v31 = vadd.f32 %v698_v29, %v680_v28  ;;  %v2281_v18 = vld [vmem:[%s3263_s4 + $0x38] sm:$0xff] }
 0x306   :  { %v2288_v27 = vld [vmem:[%s3263_s4 + $0x58] sm:$0xff] }
 0x307   :  { %v746_v32 = vmul.f32 0.5, %v679_v30  ;;  %v750_v33 = vmul.f32 0.5, %v701_v31  ;;  %v2295_v30 = vld [vmem:[%s3263_s4 + $0x78] sm:$0xff]  ;;  %v1099_v31 = vld [vmem:[%s3263_s4 + $0x10] sm:$0xff] }
 0x309   :  { %2383 = vtanh.f32 %v746_v32  ;;  %v2280_v32 = vld [vmem:[%s3263_s4 + $0x30] sm:$0xff] }
 0x30a   :  { %2385 = vtanh.f32 %v750_v33 }
 0x30b   :  { %v720_v35 = vpop.f32.mrf.mxu2  ;;  %v742_v37 = vpop.f32.mrf.mxu3 }
 0x30c   :  { %v723_v38 = vadd.f32 %v720_v35, %v702_v34  ;;  %v745_v39 = vadd.f32 %v742_v37, %v724_v36  ;;  %v2287_v35 = vld [vmem:[%s3263_s4 + $0x50] sm:$0xff]  ;;  %v1098_v37 = vld [vmem:[%s3263_s4 + $0x8] sm:$0xff] }
 0x30d   :  { %v2294_v36 = vld [vmem:[%s3263_s4 + $0x70] sm:$0xff] }
 0x30e   :  { %2387 = vtanh.f32 %v723_v38  ;;  %v755_v40 = vmul.f32 0.5, %v745_v39  ;;  %v2279_v38 = vld [vmem:[%s3263_s4 + $0x28] sm:$0xff] }
 0x30f   :  { %v2384_v41 = vpop.eup %2383  ;;  %v2286_v39 = vld [vmem:[%s3263_s4 + $0x48] sm:$0xff] }
 0x310   :  { %v2386_v42 = vpop.eup %2385  ;;  %v748_v43 = vmul.f32 0.5, %v2384_v41  ;;  %2389 = vtanh.f32 %v755_v40  ;;  %v2293_v40 = vld [vmem:[%s3263_s4 + $0x68] sm:$0xff] }
 0x311   :  { %v752_v44 = vmul.f32 0.5, %v2386_v42 }
 0x312   :  { %v749_v45 = vadd.f32 0.5, %v748_v43  ;;  %v1097_v43 = vld [vmem:[%s3263_s4] sm:$0xff] }
 0x313   :  { %v753_v46 = vadd.f32 0.5, %v752_v44  ;;  %v2278_v44 = vld [vmem:[%s3263_s4 + $0x20] sm:$0xff] }
 0x314   :  { %v2388_v47 = vpop.eup %2387 }
 0x315   :  { %v759_v48 = vmul.f32 %v753_v46, %v651_v4  ;;  %v760_v49 = vmul.f32 %v2388_v47, %v749_v45  ;;  %v2285_v45 = vld [vmem:[%s3263_s4 + $0x40] sm:$0xff]  ;;  %v922_v47 = vld [vmem:[#allocation2 + $0x2c] sm:$0x3] }
 0x316   :  { %v2390_v50 = vpop.eup %2389  ;;  %v2292_v46 = vld [vmem:[%s3263_s4 + $0x60] sm:$0xff]  ;;  %s2209_s4 = sshll.u32 %s3269_s10, 4  ;;  %s2210_s4 = int_to_ptr.hbm [resolvable:$true] %s2209_s4 }
 0x317   :  { %v761_v51 = vadd.f32 %v760_v49, %v759_v48  ;;  %v757_v52 = vmul.f32 0.5, %v2390_v50  ;;  %v944_v49 = vld [vmem:[#allocation2 + $0x3c] sm:$0x3] }
 0x319   :  { %2391 = vtanh.f32 %v761_v51  ;;  %v758_v53 = vadd.f32 0.5, %v757_v52 }
 0x31f   :  { %v2392_v54 = vpop.eup %2391 }
 0x320   :  { %v763_v55 = vmul.f32 %v2392_v54, %v758_v53 }
 0x322   :  { %764 = vst.msk [vmem:[#allocation3 + $0x8] sm:$0x3] %vm323_vm2, %v763_v55  ;;  %2264 = vmatmul.msk.f32.vlgmr.msra.gmra.mxu0 %vm90_vm1, %v763_v55  ;;  %2265 = vmatmul.msk.f32.vlgmr.msra.gmra.mxu1 %vm90_vm1, %v763_v55 }
 0x323   :  { %2266 = vmatmul.msk.f32.vlgmr.msra.gmra.mxu2 %vm90_vm1, %v763_v55  ;;  %2267 = vmatmul.msk.f32.vlgmr.msra.gmra.mxu3 %vm90_vm1, %v763_v55 }
 0x324   :  { %1001 = vmatpush.msra.mxu0 %v2652_v9  ;;  %1023 = vmatpush.msra.mxu1 %v2657_v10  ;;  %v765_v9 = vld [vmem:[#allocation2 + $0xa] sm:$0x3] }
 0x325   :  { %1045 = vmatpush.msra.mxu2 %v2664_v11  ;;  %1067 = vmatpush.msra.mxu3 %v2669_v12  ;;  %v790_v11 = vld [vmem:[#allocation2 + $0x1a] sm:$0x3] }
 0x326   :  { %1002 = vmatpush.msra.mxu0 %v2676_v13  ;;  %1024 = vmatpush.msra.mxu1 %v2681_v14 }
 0x327   :  { %1046 = vmatpush.msra.mxu2 %v2688_v15  ;;  %1068 = vmatpush.msra.mxu3 %v2698_v17  ;;  %v812_v17 = vld [vmem:[#allocation2 + $0x2a] sm:$0x3] }
 0x328   :  { %1003 = vmatpush.msra.mxu0 %v2693_v16  ;;  %1025 = vmatpush.msra.mxu1 %v2708_v19 }
 0x329   :  { %1047 = vmatpush.msra.mxu2 %v2713_v20  ;;  %1069 = vmatpush.msra.mxu3 %v2720_v21  ;;  %v834_v20 = vld [vmem:[#allocation2 + $0x3a] sm:$0x3] }
 0x32a   :  { %1004 = vmatpush.msra.mxu0 %v2730_v22  ;;  %1026 = vmatpush.msra.mxu1 %v2735_v23 }
 0x32b   :  { %1048 = vmatpush.msra.mxu2 %v2743_v24  ;;  %1070 = vmatpush.msra.mxu3 %v2748_v25 }
 0x39f   :  { %v786_v10 = vpop.f32.mrf.mxu0  ;;  %v808_v12 = vpop.f32.mrf.mxu1 }
 0x3a0   :  { %v789_v13 = vadd.f32 %v786_v10, %v765_v9  ;;  %v811_v14 = vadd.f32 %v808_v12, %v790_v11 }
 0x3a2   :  { %v856_v15 = vmul.f32 0.5, %v789_v13  ;;  %v860_v16 = vmul.f32 0.5, %v811_v14 }
 0x3a4   :  { %2393 = vtanh.f32 %v856_v15 }
 0x3a5   :  { %2395 = vtanh.f32 %v860_v16 }
 0x3a6   :  { %v830_v19 = vpop.f32.mrf.mxu2  ;;  %v852_v21 = vpop.f32.mrf.mxu3 }
 0x3a7   :  { %v833_v22 = vadd.f32 %v830_v19, %v812_v17  ;;  %v855_v23 = vadd.f32 %v852_v21, %v834_v20 }
 0x3a9   :  { %2397 = vtanh.f32 %v833_v22  ;;  %v865_v24 = vmul.f32 0.5, %v855_v23  ;;  %v1095_v23 = vld [vmem:[#allocation3] sm:$0xff] }
 0x3aa   :  { %v2394_v56 = vpop.eup %2393 }
 0x3ab   :  { %v2396_v25 = vpop.eup %2395  ;;  %v858_v57 = vmul.f32 0.5, %v2394_v56  ;;  %2399 = vtanh.f32 %v865_v24  ;;  %v2986_v24 = vld [vmem:[#allocation4 + $0x18] sm:$0xff] }
 0x3ac   :  { %v862_v58 = vmul.f32 0.5, %v2396_v25  ;;  %v2988_v56 = vld [vmem:[#allocation4 + $0x38] sm:$0xff] }
 0x3ad   :  { %v859_v59 = vadd.f32 0.5, %v858_v57  ;;  %v2990_v25 = vld [vmem:[#allocation4 + $0x58] sm:$0xff]  ;;  %v2994_v57 = vld [vmem:[#allocation4 + $0x10] sm:$0xff] }
 0x3ae   :  { %v863_v60 = vadd.f32 0.5, %v862_v58  ;;  %v2996_v58 = vld [vmem:[#allocation4 + $0x30] sm:$0xff] }
 0x3af   :  { %v2398_v61 = vpop.eup %2397 }
 0x3b0   :  { %v869_v62 = vmul.f32 %v863_v60, %v761_v51  ;;  %v870_v63 = vmul.f32 %v2398_v61, %v859_v59  ;;  %v2998_v59 = vld [vmem:[#allocation4 + $0x50] sm:$0xff]  ;;  %v985_v60 = vld [vmem:[#allocation2 + $0xe] sm:$0x3] }
 0x3b1   :  { %v2400_v0 = vpop.eup %2399 }
 0x3b2   :  { %v2917_v1 = vadd.f32 %v870_v63, %v869_v62  ;;  %v867_v2 = vmul.f32 0.5, %v2400_v0  ;;  %v1010_v62 = vld [vmem:[#allocation2 + $0x1e] sm:$0x3]  ;;  %v3001_v0 = vld [vmem:[#allocation4 + $0x78] sm:$0xff] }
 0x3b4   :  { %2401 = vtanh.f32 %v2917_v1  ;;  %v868_v3 = vadd.f32 0.5, %v867_v2 }
 0x3ba   :  { %v2402_v4 = vpop.eup %2401 }
 0x3bb   :  { %v873_v5 = vmul.f32 %v2402_v4, %v868_v3 }
 0x3bd   :  { %874 = vst.msk [vmem:[#allocation3 + $0xa] sm:$0x3] %vm323_vm2, %v873_v5  ;;  %2268 = vmatmul.msk.f32.vlgmr.msrb.gmra.mxu0 %vm90_vm1, %v873_v5  ;;  %2269 = vmatmul.msk.f32.vlgmr.msrb.gmra.mxu1 %vm90_vm1, %v873_v5 }
 0x3be   :  { %2270 = vmatmul.msk.f32.vlgmr.msrb.gmra.mxu2 %vm90_vm1, %v873_v5  ;;  %2271 = vmatmul.msk.f32.vlgmr.msrb.gmra.mxu3 %vm90_vm1, %v873_v5  ;;  %v3010_v5 = vld [vmem:[%s3265_s6] ss:$0 sm:$0xff] }
 0x3bf   :  { %1123 = vmatpush.msrb.mxu0 %v1100_v8  ;;  %1158 = vmatpush.msrb.mxu1 %v2281_v18  ;;  %v1054_v8 = vld [vmem:[#allocation2 + $0x3e] sm:$0x3] }
 0x3c0   :  { %1193 = vmatpush.msrb.mxu2 %v2288_v27  ;;  %1228 = vmatpush.msrb.mxu3 %v2295_v30  ;;  %v3021_v30 = vld [vmem:[#allocation4 + $0x48] sm:$0xff] }
 0x3c1   :  { %1124 = vmatpush.msrb.mxu0 %v1099_v31  ;;  %1159 = vmatpush.msrb.mxu1 %v2280_v32 }
 0x3c2   :  { %1194 = vmatpush.msrb.mxu2 %v2287_v35  ;;  %1229 = vmatpush.msrb.mxu3 %v2294_v36  ;;  %v3025_v35 = vld [vmem:[#allocation4 + $0x70] sm:$0xff]  ;;  %v3027_v36 = vld [vmem:[#allocation4] sm:$0xff] }
 0x3c3   :  { %1125 = vmatpush.msrb.mxu0 %v1098_v37  ;;  %1160 = vmatpush.msrb.mxu1 %v2279_v38  ;;  %v3029_v37 = vld [vmem:[#allocation4 + $0x20] sm:$0xff] }
 0x3c4   :  { %1195 = vmatpush.msrb.mxu2 %v2286_v39  ;;  %1230 = vmatpush.msrb.mxu3 %v2293_v40  ;;  %v3035_v40 = vld [vmem:[#allocation4 + $0x40] sm:$0xff] }
 0x3c5   :  { %1126 = vmatpush.msrb.mxu0 %v1097_v43  ;;  %1161 = vmatpush.msrb.mxu1 %v2278_v44  ;;  %v3041_v43 = vld [vmem:[#allocation4 + $0x60] sm:$0xff] }
 0x3c6   :  { %1196 = vmatpush.msrb.mxu2 %v2285_v45  ;;  %1231 = vmatpush.msrb.mxu3 %v2292_v46 }
 0x43a   :  { %v896_v28 = vpop.f32.mrf.mxu0  ;;  %v918_v29 = vpop.f32.mrf.mxu1 }
 0x43b   :  { %v899_v33 = vadd.f32 %v896_v28, %v875_v6  ;;  %v921_v34 = vadd.f32 %v918_v29, %v900_v7  ;;  %v3015_v6 = vld [vmem:[%s3265_s6 + $0x1] ss:$0 sm:$0xff]  ;;  %v1032_v7 = vld [vmem:[#allocation2 + $0x2e] sm:$0x3]  ;;  %v3017_v28 = vld [vmem:[#allocation4 + $0x8] sm:$0xff] }
 0x43c   :  { %v3019_v29 = vld [vmem:[#allocation4 + $0x28] sm:$0xff] }
 0x43d   :  { %v966_v41 = vmul.f32 0.5, %v899_v33  ;;  %v970_v42 = vmul.f32 0.5, %v921_v34 }
 0x43f   :  { %2403 = vtanh.f32 %v966_v41  ;;  %v3037_v41 = vld [vmem:[#allocation4 + $0x68] sm:$0xff] }
 0x440   :  { %2405 = vtanh.f32 %v970_v42 }
 0x441   :  { %v940_v48 = vpop.f32.mrf.mxu2  ;;  %v962_v50 = vpop.f32.mrf.mxu3 }
 0x442   :  { %v943_v51 = vadd.f32 %v940_v48, %v922_v47  ;;  %v965_v52 = vadd.f32 %v962_v50, %v944_v49  ;;  %v3050_v47 = vld [vmem:[%s3265_s6 + $0x2] ss:$0 sm:$0xff]  ;;  %v3055_v48 = vld [vmem:[%s3265_s6 + $0x3] ss:$0 sm:$0xff] }
 0x444   :  { %2407 = vtanh.f32 %v943_v51  ;;  %v975_v53 = vmul.f32 0.5, %v965_v52 }
 0x445   :  { %v2404_v54 = vpop.eup %2403 }
 0x446   :  { %v2406_v55 = vpop.eup %2405  ;;  %v968_v9 = vmul.f32 0.5, %v2404_v54  ;;  %2409 = vtanh.f32 %v975_v53 }
 0x447   :  { %v972_v10 = vmul.f32 0.5, %v2406_v55 }
 0x448   :  { %v969_v11 = vadd.f32 0.5, %v968_v9 }
 0x449   :  { %v973_v12 = vadd.f32 0.5, %v972_v10 }
 0x44a   :  { %v2408_v13 = vpop.eup %2407 }
 0x44b   :  { %v979_v14 = vmul.f32 %v973_v12, %v2917_v1  ;;  %v980_v15 = vmul.f32 %v2408_v13, %v969_v11 }
 0x44c   :  { %v2410_v16 = vpop.eup %2409 }
 0x44d   :  { %v2974_v17 = vadd.f32 %v980_v15, %v979_v14  ;;  %v977_v19 = vmul.f32 0.5, %v2410_v16 }
 0x44f   :  { %2411 = vtanh.f32 %v2974_v17  ;;  %v978_v20 = vadd.f32 0.5, %v977_v19 }
 0x455   :  { %v2412_v21 = vpop.eup %2411 }
 0x456   :  { %v983_v22 = vmul.f32 %v2412_v21, %v978_v20 }
 0x458   :  { %984 = vst.msk [vmem:[#allocation3 + $0xc] sm:$0x3] %vm323_vm2, %v983_v22  ;;  %2272 = vmatmul.msk.f32.vlgmr.msra.gmra.mxu0 %vm90_vm1, %v983_v22  ;;  %2273 = vmatmul.msk.f32.vlgmr.msra.gmra.mxu1 %vm90_vm1, %v983_v22 }
 0x459   :  { %2274 = vmatmul.msk.f32.vlgmr.msra.gmra.mxu2 %vm90_vm1, %v983_v22  ;;  %2275 = vmatmul.msk.f32.vlgmr.msra.gmra.mxu3 %vm90_vm1, %v983_v22 }
 0x45a   :  { %1273 = vmatpush.msra.mxu0 %v2986_v24  ;;  %1295 = vmatpush.msra.mxu1 %v2988_v56 }
 0x45b   :  { %1317 = vmatpush.msra.mxu2 %v2990_v25  ;;  %1339 = vmatpush.msra.mxu3 %v3001_v0 }
 0x45c   :  { %1274 = vmatpush.msra.mxu0 %v2994_v57  ;;  %1296 = vmatpush.msra.mxu1 %v2996_v58 }
 0x45d   :  { %1318 = vmatpush.msra.mxu2 %v2998_v59  ;;  %1340 = vmatpush.msra.mxu3 %v3025_v35 }
 0x45e   :  { %1275 = vmatpush.msra.mxu0 %v3017_v28  ;;  %1297 = vmatpush.msra.mxu1 %v3019_v29 }
 0x45f   :  { %1319 = vmatpush.msra.mxu2 %v3021_v30  ;;  %1341 = vmatpush.msra.mxu3 %v3037_v41 }
 0x460   :  { %2276 = vmatmul.msk.f32.vlgmr.msrb.gmra.mxu0 %vm90_vm1, %v1095_v23  ;;  %2283 = vmatmul.msk.f32.vlgmr.msrb.gmra.mxu1 %vm90_vm1, %v1095_v23 }
 0x461   :  { %2290 = vmatmul.msk.f32.vlgmr.msrb.gmra.mxu2 %vm90_vm1, %v1095_v23  ;;  %2297 = vmatmul.msk.f32.vlgmr.msrb.gmra.mxu3 %vm90_vm1, %v1095_v23 }
 0x462   :  { %1276 = vmatpush.msra.mxu0 %v3027_v36  ;;  %1298 = vmatpush.msra.mxu1 %v3029_v37 }
 0x463   :  { %1320 = vmatpush.msra.mxu2 %v3035_v40  ;;  %1342 = vmatpush.msra.mxu3 %v3041_v43 }
 0x464   :  { %1382 = vmatpush.msrb.mxu0 %v2986_v24  ;;  %1404 = vmatpush.msrb.mxu1 %v2988_v56 }
 0x465   :  { %1426 = vmatpush.msrb.mxu2 %v2990_v25  ;;  %1448 = vmatpush.msrb.mxu3 %v3001_v0 }
 0x466   :  { %1383 = vmatpush.msrb.mxu0 %v2994_v57  ;;  %1405 = vmatpush.msrb.mxu1 %v2996_v58 }
 0x467   :  { %1427 = vmatpush.msrb.mxu2 %v2998_v59  ;;  %1449 = vmatpush.msrb.mxu3 %v3025_v35 }
 0x468   :  { %1384 = vmatpush.msrb.mxu0 %v3017_v28  ;;  %1406 = vmatpush.msrb.mxu1 %v3019_v29 }
 0x469   :  { %1428 = vmatpush.msrb.mxu2 %v3021_v30  ;;  %1450 = vmatpush.msrb.mxu3 %v3037_v41 }
 0x46a   :  { %1385 = vmatpush.msrb.mxu0 %v3027_v36  ;;  %1407 = vmatpush.msrb.mxu1 %v3029_v37 }
 0x46b   :  { %1429 = vmatpush.msrb.mxu2 %v3035_v40  ;;  %1451 = vmatpush.msrb.mxu3 %v3041_v43 }
 0x4d5   :  { %v1006_v61 = vpop.f32.mrf.mxu0  ;;  %v1028_v63 = vpop.f32.mrf.mxu1 }
 0x4d6   :  { %v1009_v1 = vadd.f32 %v1006_v61, %v985_v60  ;;  %v1031_v2 = vadd.f32 %v1028_v63, %v1010_v62 }
 0x4d8   :  { %v1076_v3 = vmul.f32 0.5, %v1009_v1  ;;  %v1080_v4 = vmul.f32 0.5, %v1031_v2 }
 0x4da   :  { %2413 = vtanh.f32 %v1076_v3 }
 0x4db   :  { %2415 = vtanh.f32 %v1080_v4 }
 0x4dc   :  { %v1050_v18 = vpop.f32.mrf.mxu2  ;;  %v1072_v27 = vpop.f32.mrf.mxu3 }
 0x4dd   :  { %v1053_v31 = vadd.f32 %v1050_v18, %v1032_v7  ;;  %v1075_v32 = vadd.f32 %v1072_v27, %v1054_v8  ;;  %v1128_v33 = vpop.f32.mrf.mxu0  ;;  %v1163_v34 = vpop.f32.mrf.mxu1 }
 0x4de   :  { %v1129_v38 = vadd.f32 %v3010_v5, %v1128_v33  ;;  %v1164_v39 = vadd.f32 %v3015_v6, %v1163_v34 }
 0x4df   :  { %2417 = vtanh.f32 %v1053_v31  ;;  %v1085_v42 = vmul.f32 0.5, %v1075_v32 }
 0x4e0   :  { %v2414_v44 = vpop.eup %2413  ;;  %1134 = vst.msk [vmem:[#allocation2] sm:$0xff] %vm90_vm1, %v1129_v38 }
 0x4e1   :  { %v2416_v45 = vpop.eup %2415  ;;  %v1078_v46 = vmul.f32 0.5, %v2414_v44  ;;  %1169 = vst.msk [vmem:[#allocation2 + $0x10] sm:$0xff] %vm90_vm1, %v1164_v39  ;;  %2419 = vtanh.f32 %v1085_v42 }
 0x4e2   :  { %v1082_v49 = vmul.f32 0.5, %v2416_v45 }
 0x4e3   :  { %v1079_v50 = vadd.f32 0.5, %v1078_v46 }
 0x4e4   :  { %v1083_v51 = vadd.f32 0.5, %v1082_v49  ;;  %v1198_v52 = vpop.f32.mrf.mxu2  ;;  %v1233_v53 = vpop.f32.mrf.mxu3 }
 0x4e5   :  { %v2418_v54 = vpop.eup %2417  ;;  %v1199_v55 = vadd.f32 %v3050_v47, %v1198_v52  ;;  %v1234_v9 = vadd.f32 %v3055_v48, %v1233_v53 }
 0x4e6   :  { %v1089_v10 = vmul.f32 %v1083_v51, %v2974_v17  ;;  %v1090_v11 = vmul.f32 %v2418_v54, %v1079_v50 }
 0x4e7   :  { %1204 = vst.msk [vmem:[#allocation2 + $0x20] sm:$0xff] %vm90_vm1, %v1199_v55  ;;  %v2420_v12 = vpop.eup %2419  ;;  %v1260_v63 = vld [vmem:[#allocation2] sm:$0x3] }
 0x4e8   :  { %v1091_v13 = vadd.f32 %v1090_v11, %v1089_v10  ;;  %1239 = vst.msk [vmem:[#allocation2 + $0x30] sm:$0xff] %vm90_vm1, %v1234_v9  ;;  %v1087_v14 = vmul.f32 0.5, %v2420_v12  ;;  %v1282_v2 = vld [vmem:[#allocation2 + $0x10] sm:$0x3]  ;;  %v1366_v9 = vld [vmem:[#allocation2 + $0x2] sm:$0x3] }
 0x4e9   :  { %v1391_v11 = vld [vmem:[#allocation2 + $0x12] sm:$0x3] }
 0x4ea   :  { %2421 = vtanh.f32 %v1091_v13  ;;  %v1088_v15 = vadd.f32 0.5, %v1087_v14 }
 0x4ee   :  { %v1304_v8 = vld [vmem:[#allocation2 + $0x20] sm:$0x3] }
 0x4ef   :  { %v1326_v27 = vld [vmem:[#allocation2 + $0x30] sm:$0x3] }
 0x4f0   :  { %v2422_v16 = vpop.eup %2421 }
 0x4f1   :  { %v3079_v17 = vmul.f32 %v2422_v16, %v1088_v15 }
 0x4f3   :  { %1094 = vst.msk [vmem:[#allocation3 + $0xe] sm:$0x3] %vm323_vm2, %v3079_v17 }
 0x4fa   :  { %v1096_v19 = vld [vmem:[#allocation3 + $0x8] sm:$0xff] }
 0x4fb   :  { %2277 = vmatmul.msk.f32.gmra.mxu0 %vm90_vm1, %v1096_v19  ;;  %2284 = vmatmul.msk.f32.gmra.mxu1 %vm90_vm1, %v1096_v19 }
 0x4fc   :  { %2291 = vmatmul.msk.f32.gmra.mxu2 %vm90_vm1, %v1096_v19  ;;  %2298 = vmatmul.msk.f32.gmra.mxu3 %vm90_vm1, %v1096_v19  ;;  %v1413_v19 = vld [vmem:[#allocation2 + $0x22] sm:$0x3] }
 0x503   :  { %1277 = vmatmul.f32.vlgmr.msra.gmra.mxu0 %v2562_v26  ;;  %1299 = vmatmul.f32.vlgmr.msra.gmra.mxu1 %v2562_v26 }
 0x504   :  { %1321 = vmatmul.f32.vlgmr.msra.gmra.mxu2 %v2562_v26  ;;  %1343 = vmatmul.f32.vlgmr.msra.gmra.mxu3 %v2562_v26 }
 0x505   :  { %1491 = vmatpush.msra.mxu0 %v2986_v24  ;;  %1513 = vmatpush.msra.mxu1 %v2988_v56 }
 0x506   :  { %1535 = vmatpush.msra.mxu2 %v2990_v25  ;;  %1557 = vmatpush.msra.mxu3 %v3001_v0 }
 0x507   :  { %1492 = vmatpush.msra.mxu0 %v2994_v57  ;;  %1514 = vmatpush.msra.mxu1 %v2996_v58 }
 0x508   :  { %1536 = vmatpush.msra.mxu2 %v2998_v59  ;;  %1558 = vmatpush.msra.mxu3 %v3025_v35 }
 0x509   :  { %1493 = vmatpush.msra.mxu0 %v3017_v28  ;;  %1515 = vmatpush.msra.mxu1 %v3019_v29 }
 0x50a   :  { %1537 = vmatpush.msra.mxu2 %v3021_v30  ;;  %1559 = vmatpush.msra.mxu3 %v3037_v41 }
 0x50b   :  { %1494 = vmatpush.msra.mxu0 %v3027_v36  ;;  %1516 = vmatpush.msra.mxu1 %v3029_v37 }
 0x50c   :  { %1538 = vmatpush.msra.mxu2 %v3035_v40  ;;  %1560 = vmatpush.msra.mxu3 %v3041_v43 }
 0x578   :  { %v1131_v26 = vpop.f32.mrf.mxu0  ;;  %v1166_v20 = vpop.f32.mrf.mxu1 }
 0x579   :  { %v1132_v21 = vadd.f32 %v3010_v5, %v1131_v26  ;;  %v1167_v22 = vadd.f32 %v3015_v6, %v1166_v20  ;;  %v1435_v20 = vld [vmem:[#allocation2 + $0x32] sm:$0x3] }
 0x57b   :  { %1135 = vst.msk [vmem:[#allocation2 + $0x8] sm:$0xff] %vm90_vm1, %v1132_v21 }
 0x57c   :  { %1170 = vst.msk [vmem:[#allocation2 + $0x18] sm:$0xff] %vm90_vm1, %v1167_v22 }
 0x57f   :  { %v1201_v23 = vpop.f32.mrf.mxu2  ;;  %v1236_v60 = vpop.f32.mrf.mxu3 }
 0x580   :  { %v1202_v61 = vadd.f32 %v3050_v47, %v1201_v23  ;;  %v1237_v62 = vadd.f32 %v3055_v48, %v1236_v60  ;;  %v1278_v1 = vpop.f32.mrf.mxu0  ;;  %v1300_v3 = vpop.f32.mrf.mxu1 }
 0x581   :  { %v1281_v4 = vadd.f32 %v1278_v1, %v1260_v63  ;;  %v1303_v7 = vadd.f32 %v1300_v3, %v1282_v2 }
 0x582   :  { %1205 = vst.msk [vmem:[#allocation2 + $0x28] sm:$0xff] %vm90_vm1, %v1202_v61 }
 0x583   :  { %1240 = vst.msk [vmem:[#allocation2 + $0x38] sm:$0xff] %vm90_vm1, %v1237_v62  ;;  %v1348_v5 = vmul.f32 0.5, %v1281_v4  ;;  %v1352_v6 = vmul.f32 0.5, %v1303_v7 }
 0x585   :  { %2423 = vtanh.f32 %v1348_v5 }
 0x586   :  { %2425 = vtanh.f32 %v1352_v6 }
 0x587   :  { %v1322_v18 = vpop.f32.mrf.mxu2  ;;  %v1344_v31 = vpop.f32.mrf.mxu3 }
 0x588   :  { %v1325_v32 = vadd.f32 %v1322_v18, %v1304_v8  ;;  %v1347_v33 = vadd.f32 %v1344_v31, %v1326_v27 }
 0x58a   :  { %2427 = vtanh.f32 %v1325_v32  ;;  %v1357_v34 = vmul.f32 0.5, %v1347_v33  ;;  %v1475_v33 = vld [vmem:[#allocation2 + $0x4] sm:$0x3] }
 0x58b   :  { %v2424_v38 = vpop.eup %2423 }
 0x58c   :  { %v2426_v39 = vpop.eup %2425  ;;  %v1350_v42 = vmul.f32 0.5, %v2424_v38  ;;  %2429 = vtanh.f32 %v1357_v34  ;;  %v1500_v38 = vld [vmem:[#allocation2 + $0x14] sm:$0x3] }
 0x58d   :  { %v1354_v44 = vmul.f32 0.5, %v2426_v39 }
 0x58e   :  { %v1351_v45 = vadd.f32 0.5, %v1350_v42 }
 0x58f   :  { %v1355_v46 = vadd.f32 0.5, %v1354_v44 }
 0x590   :  { %v2428_v47 = vpop.eup %2427 }
 0x591   :  { %v1361_v48 = vmul.f32 0.0, %v1355_v46  ;;  %v1362_v49 = vmul.f32 %v2428_v47, %v1351_v45  ;;  %v1522_v47 = vld [vmem:[#allocation2 + $0x24] sm:$0x3] }
 0x592   :  { %v2430_v50 = vpop.eup %2429 }
 0x593   :  { %v1363_v51 = vadd.f32 %v1362_v49, %v1361_v48  ;;  %v1359_v52 = vmul.f32 0.5, %v2430_v50  ;;  %v1544_v49 = vld [vmem:[#allocation2 + $0x34] sm:$0x3] }
 0x595   :  { %2431 = vtanh.f32 %v1363_v51  ;;  %v1360_v53 = vadd.f32 0.5, %v1359_v52 }
 0x59b   :  { %v2432_v54 = vpop.eup %2431 }
 0x59c   :  { %v1365_v55 = vmul.f32 %v2432_v54, %v1360_v53 }
 0x59e   :  { %2299 = vmatmul.msk.f32.vlgmr.msrb.gmra.mxu0 %vm90_vm1, %v1365_v55  ;;  %2300 = vmatmul.msk.f32.vlgmr.msrb.gmra.mxu1 %vm90_vm1, %v1365_v55 }
 0x59f   :  { %2301 = vmatmul.msk.f32.vlgmr.msrb.gmra.mxu2 %vm90_vm1, %v1365_v55  ;;  %2302 = vmatmul.msk.f32.vlgmr.msrb.gmra.mxu3 %vm90_vm1, %v1365_v55 }
 0x5a0   :  { %1600 = vmatpush.msrb.mxu0 %v2986_v24  ;;  %1622 = vmatpush.msrb.mxu1 %v2988_v56 }
 0x5a1   :  { %1644 = vmatpush.msrb.mxu2 %v2990_v25  ;;  %1666 = vmatpush.msrb.mxu3 %v3001_v0 }
 0x5a2   :  { %1601 = vmatpush.msrb.mxu0 %v2994_v57  ;;  %1623 = vmatpush.msrb.mxu1 %v2996_v58 }
 0x5a3   :  { %1645 = vmatpush.msrb.mxu2 %v2998_v59  ;;  %1667 = vmatpush.msrb.mxu3 %v3025_v35 }
 0x5a4   :  { %1602 = vmatpush.msrb.mxu0 %v3017_v28  ;;  %1624 = vmatpush.msrb.mxu1 %v3019_v29 }
 0x5a5   :  { %1646 = vmatpush.msrb.mxu2 %v3021_v30  ;;  %1668 = vmatpush.msrb.mxu3 %v3037_v41 }
 0x5a6   :  { %1603 = vmatpush.msrb.mxu0 %v3027_v36  ;;  %1625 = vmatpush.msrb.mxu1 %v3029_v37 }
 0x5a7   :  { %1647 = vmatpush.msrb.mxu2 %v3035_v40  ;;  %1669 = vmatpush.msrb.mxu3 %v3041_v43 }
 0x61b   :  { %v1387_v10 = vpop.f32.mrf.mxu0  ;;  %v1409_v12 = vpop.f32.mrf.mxu1 }
 0x61c   :  { %v1390_v13 = vadd.f32 %v1387_v10, %v1366_v9  ;;  %v1412_v14 = vadd.f32 %v1409_v12, %v1391_v11 }
 0x61e   :  { %v1457_v15 = vmul.f32 0.5, %v1390_v13  ;;  %v1461_v16 = vmul.f32 0.5, %v1412_v14 }
 0x620   :  { %2433 = vtanh.f32 %v1457_v15 }
 0x621   :  { %2435 = vtanh.f32 %v1461_v16 }
 0x622   :  { %v1431_v26 = vpop.f32.mrf.mxu2  ;;  %v1453_v21 = vpop.f32.mrf.mxu3 }
 0x623   :  { %v1434_v22 = vadd.f32 %v1431_v26, %v1413_v19  ;;  %v1456_v23 = vadd.f32 %v1453_v21, %v1435_v20 }
 0x625   :  { %2437 = vtanh.f32 %v1434_v22  ;;  %v1466_v60 = vmul.f32 0.5, %v1456_v23  ;;  %v1584_v23 = vld [vmem:[#allocation2 + $0x6] sm:$0x3] }
 0x626   :  { %v2434_v61 = vpop.eup %2433 }
 0x627   :  { %v2436_v62 = vpop.eup %2435  ;;  %v1459_v63 = vmul.f32 0.5, %v2434_v61  ;;  %2439 = vtanh.f32 %v1466_v60  ;;  %v1609_v61 = vld [vmem:[#allocation2 + $0x16] sm:$0x3] }
 0x628   :  { %v1463_v1 = vmul.f32 0.5, %v2436_v62 }
 0x629   :  { %v1460_v2 = vadd.f32 0.5, %v1459_v63 }
 0x62a   :  { %v1464_v3 = vadd.f32 0.5, %v1463_v1 }
 0x62b   :  { %v2438_v4 = vpop.eup %2437 }
 0x62c   :  { %v1470_v7 = vmul.f32 %v1464_v3, %v1363_v51  ;;  %v1471_v5 = vmul.f32 %v2438_v4, %v1460_v2  ;;  %v1631_v4 = vld [vmem:[#allocation2 + $0x26] sm:$0x3] }
 0x62d   :  { %v2440_v6 = vpop.eup %2439 }
 0x62e   :  { %v1472_v8 = vadd.f32 %v1471_v5, %v1470_v7  ;;  %v1468_v18 = vmul.f32 0.5, %v2440_v6  ;;  %v1653_v5 = vld [vmem:[#allocation2 + $0x36] sm:$0x3] }
 0x630   :  { %2441 = vtanh.f32 %v1472_v8  ;;  %v1469_v27 = vadd.f32 0.5, %v1468_v18 }
 0x636   :  { %v2442_v31 = vpop.eup %2441 }
 0x637   :  { %v1474_v32 = vmul.f32 %v2442_v31, %v1469_v27 }
 0x639   :  { %2303 = vmatmul.msk.f32.vlgmr.msra.gmra.mxu0 %vm90_vm1, %v1474_v32  ;;  %2304 = vmatmul.msk.f32.vlgmr.msra.gmra.mxu1 %vm90_vm1, %v1474_v32 }
 0x63a   :  { %2305 = vmatmul.msk.f32.vlgmr.msra.gmra.mxu2 %vm90_vm1, %v1474_v32  ;;  %2306 = vmatmul.msk.f32.vlgmr.msra.gmra.mxu3 %vm90_vm1, %v1474_v32 }
 0x63b   :  { %1709 = vmatpush.msra.mxu0 %v2986_v24  ;;  %1731 = vmatpush.msra.mxu1 %v2988_v56 }
 0x63c   :  { %1753 = vmatpush.msra.mxu2 %v2990_v25  ;;  %1775 = vmatpush.msra.mxu3 %v3001_v0 }
 0x63d   :  { %1710 = vmatpush.msra.mxu0 %v2994_v57  ;;  %1732 = vmatpush.msra.mxu1 %v2996_v58 }
 0x63e   :  { %1754 = vmatpush.msra.mxu2 %v2998_v59  ;;  %1776 = vmatpush.msra.mxu3 %v3025_v35 }
 0x63f   :  { %1711 = vmatpush.msra.mxu0 %v3017_v28  ;;  %1733 = vmatpush.msra.mxu1 %v3019_v29 }
 0x640   :  { %1755 = vmatpush.msra.mxu2 %v3021_v30  ;;  %1777 = vmatpush.msra.mxu3 %v3037_v41 }
 0x641   :  { %1712 = vmatpush.msra.mxu0 %v3027_v36  ;;  %1734 = vmatpush.msra.mxu1 %v3029_v37 }
 0x642   :  { %1756 = vmatpush.msra.mxu2 %v3035_v40  ;;  %1778 = vmatpush.msra.mxu3 %v3041_v43 }
 0x6b6   :  { %v1496_v34 = vpop.f32.mrf.mxu0  ;;  %v1518_v39 = vpop.f32.mrf.mxu1 }
 0x6b7   :  { %v1499_v42 = vadd.f32 %v1496_v34, %v1475_v33  ;;  %v1521_v44 = vadd.f32 %v1518_v39, %v1500_v38 }
 0x6b9   :  { %v1566_v45 = vmul.f32 0.5, %v1499_v42  ;;  %v1570_v46 = vmul.f32 0.5, %v1521_v44 }
 0x6bb   :  { %2443 = vtanh.f32 %v1566_v45 }
 0x6bc   :  { %2445 = vtanh.f32 %v1570_v46 }
 0x6bd   :  { %v1540_v48 = vpop.f32.mrf.mxu2  ;;  %v1562_v50 = vpop.f32.mrf.mxu3 }
 0x6be   :  { %v1543_v51 = vadd.f32 %v1540_v48, %v1522_v47  ;;  %v1565_v52 = vadd.f32 %v1562_v50, %v1544_v49 }
 0x6c0   :  { %2447 = vtanh.f32 %v1543_v51  ;;  %v1575_v53 = vmul.f32 0.5, %v1565_v52  ;;  %v1693_v52 = vld [vmem:[#allocation2 + $0x8] sm:$0x3] }
 0x6c1   :  { %v2444_v54 = vpop.eup %2443 }
 0x6c2   :  { %v2446_v55 = vpop.eup %2445  ;;  %v1568_v9 = vmul.f32 0.5, %v2444_v54  ;;  %2449 = vtanh.f32 %v1575_v53  ;;  %v1718_v54 = vld [vmem:[#allocation2 + $0x18] sm:$0x3] }
 0x6c3   :  { %v1572_v10 = vmul.f32 0.5, %v2446_v55 }
 0x6c4   :  { %v1569_v11 = vadd.f32 0.5, %v1568_v9 }
 0x6c5   :  { %v1573_v12 = vadd.f32 0.5, %v1572_v10 }
 0x6c6   :  { %v2448_v13 = vpop.eup %2447 }
 0x6c7   :  { %v1579_v14 = vmul.f32 %v1573_v12, %v1472_v8  ;;  %v1580_v15 = vmul.f32 %v2448_v13, %v1569_v11  ;;  %v1740_v13 = vld [vmem:[#allocation2 + $0x28] sm:$0x3] }
 0x6c8   :  { %v2450_v16 = vpop.eup %2449 }
 0x6c9   :  { %v1581_v19 = vadd.f32 %v1580_v15, %v1579_v14  ;;  %v1577_v26 = vmul.f32 0.5, %v2450_v16  ;;  %v1762_v15 = vld [vmem:[#allocation2 + $0x38] sm:$0x3] }
 0x6cb   :  { %2451 = vtanh.f32 %v1581_v19  ;;  %v1578_v20 = vadd.f32 0.5, %v1577_v26 }
 0x6d1   :  { %v2452_v21 = vpop.eup %2451 }
 0x6d2   :  { %v1583_v22 = vmul.f32 %v2452_v21, %v1578_v20 }
 0x6d4   :  { %2307 = vmatmul.msk.f32.vlgmr.msrb.gmra.mxu0 %vm90_vm1, %v1583_v22  ;;  %2308 = vmatmul.msk.f32.vlgmr.msrb.gmra.mxu1 %vm90_vm1, %v1583_v22 }
 0x6d5   :  { %2309 = vmatmul.msk.f32.vlgmr.msrb.gmra.mxu2 %vm90_vm1, %v1583_v22  ;;  %2310 = vmatmul.msk.f32.vlgmr.msrb.gmra.mxu3 %vm90_vm1, %v1583_v22 }
 0x6d6   :  { %1818 = vmatpush.msrb.mxu0 %v2986_v24  ;;  %1840 = vmatpush.msrb.mxu1 %v2988_v56 }
 0x6d7   :  { %1862 = vmatpush.msrb.mxu2 %v2990_v25  ;;  %1884 = vmatpush.msrb.mxu3 %v3001_v0 }
 0x6d8   :  { %1819 = vmatpush.msrb.mxu0 %v2994_v57  ;;  %1841 = vmatpush.msrb.mxu1 %v2996_v58 }
 0x6d9   :  { %1863 = vmatpush.msrb.mxu2 %v2998_v59  ;;  %1885 = vmatpush.msrb.mxu3 %v3025_v35 }
 0x6da   :  { %1820 = vmatpush.msrb.mxu0 %v3017_v28  ;;  %1842 = vmatpush.msrb.mxu1 %v3019_v29 }
 0x6db   :  { %1864 = vmatpush.msrb.mxu2 %v3021_v30  ;;  %1886 = vmatpush.msrb.mxu3 %v3037_v41 }
 0x6dc   :  { %1821 = vmatpush.msrb.mxu0 %v3027_v36  ;;  %1843 = vmatpush.msrb.mxu1 %v3029_v37 }
 0x6dd   :  { %1865 = vmatpush.msrb.mxu2 %v3035_v40  ;;  %1887 = vmatpush.msrb.mxu3 %v3041_v43 }
 0x751   :  { %v1605_v60 = vpop.f32.mrf.mxu0  ;;  %v1627_v62 = vpop.f32.mrf.mxu1 }
 0x752   :  { %v1608_v63 = vadd.f32 %v1605_v60, %v1584_v23  ;;  %v1630_v1 = vadd.f32 %v1627_v62, %v1609_v61 }
 0x754   :  { %v1675_v2 = vmul.f32 0.5, %v1608_v63  ;;  %v1679_v3 = vmul.f32 0.5, %v1630_v1 }
 0x756   :  { %2453 = vtanh.f32 %v1675_v2 }
 0x757   :  { %2455 = vtanh.f32 %v1679_v3 }
 0x758   :  { %v1649_v7 = vpop.f32.mrf.mxu2  ;;  %v1671_v6 = vpop.f32.mrf.mxu3 }
 0x759   :  { %v1652_v8 = vadd.f32 %v1649_v7, %v1631_v4  ;;  %v1674_v18 = vadd.f32 %v1671_v6, %v1653_v5 }
 0x75b   :  { %2457 = vtanh.f32 %v1652_v8  ;;  %v1684_v27 = vmul.f32 0.5, %v1674_v18 }
 0x75c   :  { %v2454_v31 = vpop.eup %2453 }
 0x75d   :  { %v2456_v32 = vpop.eup %2455  ;;  %v1677_v33 = vmul.f32 0.5, %v2454_v31  ;;  %2459 = vtanh.f32 %v1684_v27 }
 0x75e   :  { %v1681_v34 = vmul.f32 0.5, %v2456_v32 }
 0x75f   :  { %v1678_v38 = vadd.f32 0.5, %v1677_v33 }
 0x760   :  { %v1682_v39 = vadd.f32 0.5, %v1681_v34 }
 0x761   :  { %v2458_v42 = vpop.eup %2457 }
 0x762   :  { %v1688_v44 = vmul.f32 %v1682_v39, %v1581_v19  ;;  %v1689_v45 = vmul.f32 %v2458_v42, %v1678_v38 }
 0x763   :  { %v2460_v46 = vpop.eup %2459 }
 0x764   :  { %v1690_v47 = vadd.f32 %v1689_v45, %v1688_v44  ;;  %v1686_v48 = vmul.f32 0.5, %v2460_v46 }
 0x766   :  { %2461 = vtanh.f32 %v1690_v47  ;;  %v1687_v49 = vadd.f32 0.5, %v1686_v48 }
 0x76c   :  { %v2462_v50 = vpop.eup %2461 }
 0x76d   :  { %v1692_v51 = vmul.f32 %v2462_v50, %v1687_v49  ;;  %v2132_v49 = vld [vmem:[%s3266_s7 + $0x18] sm:$0xff]  ;;  %v2131_v50 = vld [vmem:[%s3266_s7 + $0x10] sm:$0xff] }
 0x76f   :  { %2311 = vmatmul.msk.f32.vlgmr.msra.gmra.mxu0 %vm90_vm1, %v1692_v51  ;;  %2312 = vmatmul.msk.f32.vlgmr.msra.gmra.mxu1 %vm90_vm1, %v1692_v51 }
 0x770   :  { %2313 = vmatmul.msk.f32.vlgmr.msra.gmra.mxu2 %vm90_vm1, %v1692_v51  ;;  %2314 = vmatmul.msk.f32.vlgmr.msra.gmra.mxu3 %vm90_vm1, %v1692_v51  ;;  %v1911_v51 = vld [vmem:[#allocation2 + $0xc] sm:$0x3] }
 0x771   :  { %1927 = vmatpush.msra.mxu0 %v2986_v24  ;;  %1949 = vmatpush.msra.mxu1 %v2988_v56 }
 0x772   :  { %1971 = vmatpush.msra.mxu2 %v2990_v25  ;;  %1993 = vmatpush.msra.mxu3 %v3001_v0 }
 0x773   :  { %1928 = vmatpush.msra.mxu0 %v2994_v57  ;;  %1950 = vmatpush.msra.mxu1 %v2996_v58 }
 0x774   :  { %1972 = vmatpush.msra.mxu2 %v2998_v59  ;;  %1994 = vmatpush.msra.mxu3 %v3025_v35 }
 0x775   :  { %1929 = vmatpush.msra.mxu0 %v3017_v28  ;;  %1951 = vmatpush.msra.mxu1 %v3019_v29 }
 0x776   :  { %1973 = vmatpush.msra.mxu2 %v3021_v30  ;;  %1995 = vmatpush.msra.mxu3 %v3037_v41 }
 0x777   :  { %1930 = vmatpush.msra.mxu0 %v3027_v36  ;;  %1952 = vmatpush.msra.mxu1 %v3029_v37 }
 0x778   :  { %1974 = vmatpush.msra.mxu2 %v3035_v40  ;;  %1996 = vmatpush.msra.mxu3 %v3041_v43 }
 0x7ec   :  { %v1714_v53 = vpop.f32.mrf.mxu0  ;;  %v1736_v55 = vpop.f32.mrf.mxu1 }
 0x7ed   :  { %v1717_v9 = vadd.f32 %v1714_v53, %v1693_v52  ;;  %v1739_v10 = vadd.f32 %v1736_v55, %v1718_v54  ;;  %v1936_v53 = vld [vmem:[#allocation2 + $0x1c] sm:$0x3] }
 0x7ef   :  { %v1784_v11 = vmul.f32 0.5, %v1717_v9  ;;  %v1788_v12 = vmul.f32 0.5, %v1739_v10  ;;  %v2130_v10 = vld [vmem:[%s3266_s7 + $0x8] sm:$0xff] }
 0x7f1   :  { %2463 = vtanh.f32 %v1784_v11 }
 0x7f2   :  { %2465 = vtanh.f32 %v1788_v12 }
 0x7f3   :  { %v1758_v14 = vpop.f32.mrf.mxu2  ;;  %v1780_v16 = vpop.f32.mrf.mxu3 }
 0x7f4   :  { %v1761_v19 = vadd.f32 %v1758_v14, %v1740_v13  ;;  %v1783_v26 = vadd.f32 %v1780_v16, %v1762_v15  ;;  %v2129_v13 = vld [vmem:[%s3266_s7] sm:$0xff]  ;;  %v1958_v14 = vld [vmem:[#allocation2 + $0x2c] sm:$0x3]  ;;  %v1980_v16 = vld [vmem:[#allocation2 + $0x3c] sm:$0x3] }
 0x7f6   :  { %2467 = vtanh.f32 %v1761_v19  ;;  %v1793_v20 = vmul.f32 0.5, %v1783_v26 }
 0x7f7   :  { %v2464_v21 = vpop.eup %2463 }
 0x7f8   :  { %v2466_v22 = vpop.eup %2465  ;;  %v1786_v23 = vmul.f32 0.5, %v2464_v21  ;;  %2469 = vtanh.f32 %v1793_v20 }
 0x7f9   :  { %v1790_v60 = vmul.f32 0.5, %v2466_v22 }
 0x7fa   :  { %v1787_v61 = vadd.f32 0.5, %v1786_v23 }
 0x7fb   :  { %v1791_v62 = vadd.f32 0.5, %v1790_v60 }
 0x7fc   :  { %v2468_v63 = vpop.eup %2467 }
 0x7fd   :  { %v1797_v1 = vmul.f32 %v1791_v62, %v1690_v47  ;;  %v1798_v2 = vmul.f32 %v2468_v63, %v1787_v61 }
 0x7fe   :  { %v2470_v3 = vpop.eup %2469 }
 0x7ff   :  { %v1799_v4 = vadd.f32 %v1798_v2, %v1797_v1  ;;  %v1795_v7 = vmul.f32 0.5, %v2470_v3 }
 0x801   :  { %2471 = vtanh.f32 %v1799_v4  ;;  %v1796_v5 = vadd.f32 0.5, %v1795_v7 }
 0x807   :  { %v2472_v6 = vpop.eup %2471 }
 0x808   :  { %v1801_v8 = vmul.f32 %v2472_v6, %v1796_v5 }
 0x80a   :  { %2315 = vmatmul.msk.f32.vlgmr.msrb.gmra.mxu0 %vm90_vm1, %v1801_v8  ;;  %2316 = vmatmul.msk.f32.vlgmr.msrb.gmra.mxu1 %vm90_vm1, %v1801_v8 }
 0x80b   :  { %2317 = vmatmul.msk.f32.vlgmr.msrb.gmra.mxu2 %vm90_vm1, %v1801_v8  ;;  %2318 = vmatmul.msk.f32.vlgmr.msrb.gmra.mxu3 %vm90_vm1, %v1801_v8 }
 0x80c   :  { %2036 = vmatpush.msrb.mxu0 %v2986_v24  ;;  %2058 = vmatpush.msrb.mxu1 %v2988_v56  ;;  %v1802_v24 = vld [vmem:[#allocation2 + $0xa] sm:$0x3] }
 0x80d   :  { %2080 = vmatpush.msrb.mxu2 %v2990_v25  ;;  %2102 = vmatpush.msrb.mxu3 %v3001_v0  ;;  %v1827_v25 = vld [vmem:[#allocation2 + $0x1a] sm:$0x3] }
 0x80e   :  { %2037 = vmatpush.msrb.mxu0 %v2994_v57  ;;  %2059 = vmatpush.msrb.mxu1 %v2996_v58 }
 0x80f   :  { %2081 = vmatpush.msrb.mxu2 %v2998_v59  ;;  %2103 = vmatpush.msrb.mxu3 %v3025_v35  ;;  %v1871_v35 = vld [vmem:[#allocation2 + $0x3a] sm:$0x3] }
 0x810   :  { %2038 = vmatpush.msrb.mxu0 %v3017_v28  ;;  %2060 = vmatpush.msrb.mxu1 %v3019_v29  ;;  %v1849_v29 = vld [vmem:[#allocation2 + $0x2a] sm:$0x3] }
 0x811   :  { %2082 = vmatpush.msrb.mxu2 %v3021_v30  ;;  %2104 = vmatpush.msrb.mxu3 %v3037_v41 }
 0x812   :  { %2039 = vmatpush.msrb.mxu0 %v3027_v36  ;;  %2061 = vmatpush.msrb.mxu1 %v3029_v37 }
 0x813   :  { %2083 = vmatpush.msrb.mxu2 %v3035_v40  ;;  %2105 = vmatpush.msrb.mxu3 %v3041_v43 }
 0x887   :  { %v1823_v56 = vpop.f32.mrf.mxu0  ;;  %v1845_v57 = vpop.f32.mrf.mxu1 }
 0x888   :  { %v1826_v58 = vadd.f32 %v1823_v56, %v1802_v24  ;;  %v1848_v59 = vadd.f32 %v1845_v57, %v1827_v25  ;;  %v2136_v56 = vld [vmem:[%s3267_s8 + $0x18] sm:$0xff]  ;;  %v2135_v25 = vld [vmem:[%s3267_s8 + $0x10] sm:$0xff]  ;;  %v2134_v57 = vld [vmem:[%s3267_s8 + $0x8] sm:$0xff] }
 0x88a   :  { %v1893_v0 = vmul.f32 0.5, %v1826_v58  ;;  %v1897_v28 = vmul.f32 0.5, %v1848_v59  ;;  %v2133_v58 = vld [vmem:[%s3267_s8] sm:$0xff] }
 0x88c   :  { %2473 = vtanh.f32 %v1893_v0  ;;  %v2045_v0 = vld [vmem:[#allocation2 + $0x1e] sm:$0x3] }
 0x88d   :  { %2475 = vtanh.f32 %v1897_v28 }
 0x88e   :  { %v1867_v30 = vpop.f32.mrf.mxu2  ;;  %v1889_v36 = vpop.f32.mrf.mxu3 }
 0x88f   :  { %v1870_v41 = vadd.f32 %v1867_v30, %v1849_v29  ;;  %v1892_v37 = vadd.f32 %v1889_v36, %v1871_v35 }
 0x891   :  { %2477 = vtanh.f32 %v1870_v41  ;;  %v1902_v40 = vmul.f32 0.5, %v1892_v37  ;;  %v2067_v41 = vld [vmem:[#allocation2 + $0x2e] sm:$0x3] }
 0x892   :  { %v2474_v18 = vpop.eup %2473 }
 0x893   :  { %v2476_v43 = vpop.eup %2475  ;;  %v1895_v27 = vmul.f32 0.5, %v2474_v18  ;;  %2479 = vtanh.f32 %v1902_v40  ;;  %v2089_v40 = vld [vmem:[#allocation2 + $0x3e] sm:$0x3] }
 0x894   :  { %v1899_v31 = vmul.f32 0.5, %v2476_v43 }
 0x895   :  { %v1896_v32 = vadd.f32 0.5, %v1895_v27 }
 0x896   :  { %v1900_v33 = vadd.f32 0.5, %v1899_v31 }
 0x897   :  { %v2478_v34 = vpop.eup %2477 }
 0x898   :  { %v1906_v38 = vmul.f32 %v1900_v33, %v1799_v4  ;;  %v1907_v39 = vmul.f32 %v2478_v34, %v1896_v32 }
 0x899   :  { %v2480_v42 = vpop.eup %2479 }
 0x89a   :  { %v1908_v44 = vadd.f32 %v1907_v39, %v1906_v38  ;;  %v1904_v45 = vmul.f32 0.5, %v2480_v42 }
 0x89c   :  { %2481 = vtanh.f32 %v1908_v44  ;;  %v1905_v46 = vadd.f32 0.5, %v1904_v45 }
 0x8a2   :  { %v2482_v47 = vpop.eup %2481 }
 0x8a3   :  { %v1910_v48 = vmul.f32 %v2482_v47, %v1905_v46 }
 0x8a5   :  { %2319 = vmatmul.msk.f32.vlgmr.msra.gmra.mxu0 %vm90_vm1, %v1910_v48  ;;  %2320 = vmatmul.msk.f32.vlgmr.msra.gmra.mxu1 %vm90_vm1, %v1910_v48 }
 0x8a6   :  { %2321 = vmatmul.msk.f32.vlgmr.msra.gmra.mxu2 %vm90_vm1, %v1910_v48  ;;  %2322 = vmatmul.msk.f32.vlgmr.msra.gmra.mxu3 %vm90_vm1, %v1910_v48 }
 0x8a7   :  { %2175 = vmatpush.msra.mxu1 %v2132_v49  ;;  %2152 = vmatpush.msra.mxu0 %v2136_v56 }
 0x8a9   :  { %2176 = vmatpush.msra.mxu1 %v2131_v50  ;;  %2153 = vmatpush.msra.mxu0 %v2135_v25 }
 0x8ab   :  { %2177 = vmatpush.msra.mxu1 %v2130_v10  ;;  %2154 = vmatpush.msra.mxu0 %v2134_v57 }
 0x8ad   :  { %2178 = vmatpush.msra.mxu1 %v2129_v13  ;;  %2155 = vmatpush.msra.mxu0 %v2133_v58 }
 0x922   :  { %v1932_v52 = vpop.f32.mrf.mxu0  ;;  %v1954_v54 = vpop.f32.mrf.mxu1 }
 0x923   :  { %v1935_v55 = vadd.f32 %v1932_v52, %v1911_v51  ;;  %v1957_v9 = vadd.f32 %v1954_v54, %v1936_v53  ;;  %v2342_v53 = vld [vmem:[%s3268_s9] ss:$0 sm:$0xff]  ;;  %s2563_s9 = smov [#allocation7]  }
 0x924   :  { %s2207_s16 = sshll.u32 %s2563_s9, 4  ;;  %s2208_s16 = int_to_ptr.vmem [resolvable:$true] %s2207_s16 }
 0x925   :  { %v2002_v11 = vmul.f32 0.5, %v1935_v55  ;;  %v2006_v12 = vmul.f32 0.5, %v1957_v9 }
 0x927   :  { %2483 = vtanh.f32 %v2002_v11 }
 0x928   :  { %2485 = vtanh.f32 %v2006_v12 }
 0x929   :  { %v1976_v15 = vpop.f32.mrf.mxu2  ;;  %v1998_v19 = vpop.f32.mrf.mxu3 }
 0x92a   :  { %v1979_v26 = vadd.f32 %v1976_v15, %v1958_v14  ;;  %v2001_v20 = vadd.f32 %v1998_v19, %v1980_v16 }
 0x92c   :  { %2487 = vtanh.f32 %v1979_v26  ;;  %v2011_v21 = vmul.f32 0.5, %v2001_v20 }
 0x92d   :  { %v2484_v22 = vpop.eup %2483 }
 0x92e   :  { %v2486_v23 = vpop.eup %2485  ;;  %v2004_v60 = vmul.f32 0.5, %v2484_v22  ;;  %2489 = vtanh.f32 %v2011_v21 }
 0x92f   :  { %v2008_v61 = vmul.f32 0.5, %v2486_v23 }
 0x930   :  { %v2005_v62 = vadd.f32 0.5, %v2004_v60 }
 0x931   :  { %v2009_v63 = vadd.f32 0.5, %v2008_v61 }
 0x932   :  { %v2488_v1 = vpop.eup %2487 }
 0x933   :  { %v2015_v2 = vmul.f32 %v2009_v63, %v1908_v44  ;;  %v2016_v3 = vmul.f32 %v2488_v1, %v2005_v62 }
 0x934   :  { %v2490_v4 = vpop.eup %2489 }
 0x935   :  { %v2017_v7 = vadd.f32 %v2016_v3, %v2015_v2  ;;  %v2013_v5 = vmul.f32 0.5, %v2490_v4 }
 0x937   :  { %2491 = vtanh.f32 %v2017_v7  ;;  %v2014_v6 = vadd.f32 0.5, %v2013_v5 }
 0x93d   :  { %v2492_v8 = vpop.eup %2491 }
 0x93e   :  { %v2019_v24 = vmul.f32 %v2492_v8, %v2014_v6 }
 0x940   :  { %2323 = vmatmul.msk.f32.vlgmr.msrb.gmra.mxu0 %vm90_vm1, %v2019_v24  ;;  %2324 = vmatmul.msk.f32.vlgmr.msrb.gmra.mxu1 %vm90_vm1, %v2019_v24 }
 0x941   :  { %2325 = vmatmul.msk.f32.vlgmr.msrb.gmra.mxu2 %vm90_vm1, %v2019_v24  ;;  %2326 = vmatmul.msk.f32.vlgmr.msrb.gmra.mxu3 %vm90_vm1, %v2019_v24 }
 0x948   :  { %2328 = vmatmul.msk.f32.vlgmr.msra.gmra.mxu1 %vm90_vm1, %v3079_v17  ;;  %v2020_v17 = vld [vmem:[#allocation2 + $0xe] sm:$0x3] }
 0x9bd   :  { %v2041_v59 = vpop.f32.mrf.mxu0  ;;  %v2063_v28 = vpop.f32.mrf.mxu1 }
 0x9be   :  { %v2044_v29 = vadd.f32 %v2041_v59, %v2020_v17  ;;  %v2066_v30 = vadd.f32 %v2063_v28, %v2045_v0 }
 0x9c0   :  { %v2111_v35 = vmul.f32 0.5, %v2044_v29  ;;  %v2115_v36 = vmul.f32 0.5, %v2066_v30 }
 0x9c2   :  { %2493 = vtanh.f32 %v2111_v35 }
 0x9c3   :  { %2495 = vtanh.f32 %v2115_v36 }
 0x9c4   :  { %v2085_v37 = vpop.f32.mrf.mxu2  ;;  %v2107_v18 = vpop.f32.mrf.mxu3 }
 0x9c5   :  { %v2088_v43 = vadd.f32 %v2085_v37, %v2067_v41  ;;  %v2110_v27 = vadd.f32 %v2107_v18, %v2089_v40  ;;  %v2180_v54 = vpop.f32.mrf.mxu1 }
 0x9c7   :  { %2497 = vtanh.f32 %v2088_v43  ;;  %v2120_v31 = vmul.f32 0.5, %v2110_v27 }
 0x9c8   :  { %v2494_v32 = vpop.eup %2493 }
 0x9c9   :  { %v2496_v33 = vpop.eup %2495  ;;  %v2113_v34 = vmul.f32 0.5, %v2494_v32  ;;  %2499 = vtanh.f32 %v2120_v31 }
 0x9ca   :  { %v2117_v38 = vmul.f32 0.5, %v2496_v33 }
 0x9cb   :  { %v2114_v39 = vadd.f32 0.5, %v2113_v34 }
 0x9cc   :  { %v2118_v42 = vadd.f32 0.5, %v2117_v38 }
 0x9cd   :  { %v2498_v44 = vpop.eup %2497 }
 0x9ce   :  { %v2124_v45 = vmul.f32 %v2118_v42, %v2017_v7  ;;  %v2125_v46 = vmul.f32 %v2498_v44, %v2114_v39 }
 0x9cf   :  { %v2500_v47 = vpop.eup %2499 }
 0x9d0   :  { %v2126_v48 = vadd.f32 %v2125_v46, %v2124_v45  ;;  %v2122_v49 = vmul.f32 0.5, %v2500_v47 }
 0x9d2   :  { %2501 = vtanh.f32 %v2126_v48  ;;  %v2123_v50 = vadd.f32 0.5, %v2122_v49 }
 0x9d8   :  { %v2502_v51 = vpop.eup %2501 }
 0x9d9   :  { %v2128_v52 = vmul.f32 %v2502_v51, %v2123_v50 }
 0x9db   :  { %2327 = vmatmul.msk.f32.vlgmr.msra.gmra.mxu0 %vm90_vm1, %v2128_v52 }
 0xa58   :  { %v2157_v55 = vpop.f32.mrf.mxu0 }
 0xa59   :  { %v2181_v9 = vadd.f32 %v2180_v54, %v2157_v55 }
 0xa5b   :  { %v2187_v10 = vadd.f32 %v2342_v53, %v2181_v9 }
 0xa5d   :  { %v2189_v11 = vsel %vm2188_vm3, %v2187_v10, -inf }
 0xa5e   :  { %2190 = vmax.xlane.f32.xlu0 %v2189_v11 }
 0xad1   :  { %v2191_v12 = vpop.xlane.xlu0 %2190 }
 0xad2   :  { %v2192_v13 = vsub.f32 %v2187_v10, %v2191_v12 }
 0xad4   :  { %v2193_v14 = vmul.f32 1.442695, %v2192_v13 }
 0xad6   :  { %2503 = vpow2.f32 %v2193_v14 }
 0xadc   :  { %v2504_v15 = vpop.eup %2503 }
 0xadd   :  { %v2195_v16 = vsel %vm2188_vm3, %v2504_v15, 0.0 }
 0xade   :  { %2196 = vadd.xlane.f32.xlu0 %v2195_v16 }
 0xb51   :  { %v2197_v19 = vpop.xlane.xlu0 %2196 }
 0xb52   :  { %2505 = vlog2.f32 %v2197_v19 }
 0xb58   :  { %v2506_v26 = vpop.eup %2505 }
 0xb59   :  { %v2199_v20 = vmul.f32 0.6931472, %v2506_v26 }
 0xb5b   :  { %v2200_v21 = vsub.f32 %v2192_v13, %v2199_v20 }
 0xb5d   :  { %2201 = vst.msk [vmem:[#allocation7] sm:$0x3] %vm2188_vm3, %v2200_v21 }
 0xb5e   :  { %2212 = dma.vmem_to_hbm [thread:$0]  %s2208_s16, 32, %s2210_s4, [#allocation6]  }
 0xb5f   :  { %2557 = dma.done.wait [#allocation6], 32  }
 0xb60   :  { %2558 = vsyncadd [#allocation6], 4294967264 }
 0xb61   :  { %2217 = vsyncpa [#allocation5], 1 }
 0xb62   :  { %2218 = vsyncpa [#allocation6], 1 }

</bundles_post_ra>
